<compile_context>
chip_gen: v7x
topology: tpu7x:2x2x1
jax: 0.10.0
libtpu: 0.0.40
codegen_flags: <defaults>
</compile_context>

<pallas_src>
import math
import jax
import jax.numpy as jnp
from jax import lax
from jax.experimental import pallas as pl
from jax.experimental.pallas import tpu as pltpu

D_MODEL = 32
NUM_HEADS = 4
D_HEAD = D_MODEL // NUM_HEADS
DIM_FF = 64
EPS_SELF = 1e-5      # nn.LayerNorm default (self_attn_layer_norm)
EPS_OTHER = 1e-12    # eps passed to encoder_attn / final layer norms

NEG_MIN = float(jnp.finfo(jnp.float32).min)   # torch.finfo(dtype).min


# --------------------------------------------------------------------------
# shared math helpers (used by both the kernel and the pure-JAX reference)
# --------------------------------------------------------------------------
def _layer_norm(x, g, b, eps):
    mu = jnp.mean(x, axis=-1, keepdims=True)
    var = jnp.mean((x - mu) ** 2, axis=-1, keepdims=True)
    return (x - mu) / jnp.sqrt(var + eps) * g + b


def _softmax(x):
    m = jnp.max(x, axis=-1, keepdims=True)
    e = jnp.exp(x - m)
    return e / jnp.sum(e, axis=-1, keepdims=True)


def _gelu_exact(x):
    # nn.GELU() default: exact erf form.
    return 0.5 * x * (1.0 + lax.erf(x / math.sqrt(2.0)))


# --------------------------------------------------------------------------
# in-kernel attention helpers (all shapes static)
# --------------------------------------------------------------------------
def _split_heads(x2, b_sz, seq, col_off):
    """x2: (b_sz*seq, C) -> (b_sz*NUM_HEADS, seq, D_HEAD), (b major, h minor).

    Columns [col_off, col_off + D_MODEL) hold the projection being split.
    Uses static slices + stack (well-supported lowering) instead of a
    lane-splitting reshape/transpose."""
    parts = []
    for b in range(b_sz):
        rows = x2[b * seq:(b + 1) * seq, :]
        for h in range(NUM_HEADS):
            lo = col_off + h * D_HEAD
            parts.append(rows[:, lo:lo + D_HEAD])
    return jnp.stack(parts, axis=0)


def _merge_heads(ctx, b_sz, seq):
    """ctx: (b_sz*NUM_HEADS, seq, D_HEAD) -> (b_sz*seq, D_MODEL) (concat heads)."""
    rows = []
    for b in range(b_sz):
        rows.append(jnp.concatenate(
            [ctx[b * NUM_HEADS + h] for h in range(NUM_HEADS)], axis=-1))
    return jnp.concatenate(rows, axis=0)


def _weights_lane_dense(w, b_sz):
    """w: (b_sz*NUM_HEADS, Sq, Sk) -> (b_sz, Sq, NUM_HEADS*Sk) lane-dense layout."""
    rows = []
    for b in range(b_sz):
        rows.append(jnp.concatenate(
            [w[b * NUM_HEADS + h] for h in range(NUM_HEADS)], axis=-1))
    return jnp.stack(rows, axis=0)


def _attn_core(q, k, v, bias):
    """q: (BH, Sq, dk), k/v: (BH, Sk, dk), bias: (BH, Sq, Sk) additive.

    One batched score matmul (contraction on d_k, no k transpose), one batched
    context matmul, single softmax over the whole score block."""
    scale = 1.0 / math.sqrt(D_HEAD)
    scores = jnp.einsum('bqd,bkd->bqk', q, k,
                        preferred_element_type=jnp.float32) * scale
    w = _softmax(scores + bias)
    ctx = jnp.einsum('bqk,bkd->bqd', w, v,
                     preferred_element_type=jnp.float32)
    return w, ctx


# --------------------------------------------------------------------------
# the fused decoder-layer kernel (one grid step covers a whole batch tile)
# --------------------------------------------------------------------------
def decoder_layer_kernel(
    x_ref, enc_ref, sa_bias_ref, ca_bias_ref,
    sa_wqkv, sa_bqkv, sa_wo, sa_bo, ln1_g, ln1_b,
    ca_wq, ca_bq, ca_wkv, ca_bkv, ca_wo, ca_bo, ln2_g, ln2_b,
    fc1_w, fc1_b, fc2_w, fc2_b, ln3_g, ln3_b,
    out_ref, dec_attn_ref, cross_attn_ref,
):
    Bt, S, D = x_ref.shape
    Se = enc_ref.shape[1]
    H = NUM_HEADS

    x2 = x_ref[...].reshape(Bt * S, D)        # flatten (B, S) -> rows
    enc2 = enc_ref[...].reshape(Bt * Se, D)

    # ---------------- self-attention block ----------------
    residual = x2
    qkv = jnp.dot(x2, sa_wqkv[...],
                  preferred_element_type=jnp.float32) + sa_bqkv[...]   # (rows, 3D)
    q = _split_heads(qkv, Bt, S, 0)
    k = _split_heads(qkv, Bt, S, D)
    v = _split_heads(qkv, Bt, S, 2 * D)
    w, ctx = _attn_core(q, k, v, sa_bias_ref[...].reshape(Bt * H, S, S))
    dec_attn_ref[...] = _weights_lane_dense(w, Bt)
    sa = jnp.dot(_merge_heads(ctx, Bt, S), sa_wo[...],
                 preferred_element_type=jnp.float32) + sa_bo[...]
    # TODO(synk): dropout on attention / block outputs omitted (inference mode).
    x2 = _layer_norm(residual + sa, ln1_g[...], ln1_b[...], EPS_SELF)

    # ---------------- encoder (cross) attention block ----------------
    residual = x2
    qc = jnp.dot(x2, ca_wq[...],
                 preferred_element_type=jnp.float32) + ca_bq[...]       # (rows, D)
    kvc = jnp.dot(enc2, ca_wkv[...],
                  preferred_element_type=jnp.float32) + ca_bkv[...]     # (rows_e, 2D)
    q = _split_heads(qc, Bt, S, 0)
    k = _split_heads(kvc, Bt, Se, 0)
    v = _split_heads(kvc, Bt, Se, D)
    w, ctx = _attn_core(q, k, v, ca_bias_ref[...].reshape(Bt * H, S, Se))
    cross_attn_ref[...] = _weights_lane_dense(w, Bt)
    ca = jnp.dot(_merge_heads(ctx, Bt, S), ca_wo[...],
                 preferred_element_type=jnp.float32) + ca_bo[...]
    x2 = _layer_norm(residual + ca, ln2_g[...], ln2_b[...], EPS_OTHER)

    # ---------------- feed-forward block ----------------
    residual = x2
    h = jnp.dot(x2, fc1_w[...], preferred_element_type=jnp.float32) + fc1_b[...]
    h = _gelu_exact(h)
    h = jnp.dot(h, fc2_w[...], preferred_element_type=jnp.float32) + fc2_b[...]
    x2 = _layer_norm(residual + h, ln3_g[...], ln3_b[...], EPS_OTHER)

    out_ref[...] = x2.reshape(Bt, S, D)


# --------------------------------------------------------------------------
# wrapper
# --------------------------------------------------------------------------
def transformer_decoder_layer(x, enc_output, look_ahead_mask, enc_pad_mask,
                              params, *, batch_tiles=1):
    """batch_tiles=1 fully fuses the batch into one grid step (best on v5e/v6e);
    set batch_tiles=2 on v7x to shard the "parallel" grid axis across both
    TensorCores."""
    B, S, D = x.shape
    Se = enc_output.shape[1]
    H = NUM_HEADS
    assert D == D_MODEL and B % batch_tiles == 0
    Bt = B // batch_tiles

    (sa_wq, sa_bq, sa_wk, sa_bk, sa_wv, sa_bv, sa_wo, sa_bo,
     ln1_g, ln1_b,
     ca_wq, ca_bq, ca_wk, ca_bk, ca_wv, ca_bv, ca_wo, ca_bo,
     ln2_g, ln2_b,
     fc1_w, fc1_b, fc2_w, fc2_b,
     ln3_g, ln3_b) = params

    # Fuse QKV (self-attn) and KV (cross-attn) projection weights once, outside
    # the kernel, so the kernel issues one matmul instead of three / two.
    sa_wqkv = jnp.concatenate([sa_wq, sa_wk, sa_wv], axis=1)   # (D, 3D)
    sa_bqkv = jnp.concatenate([sa_bq, sa_bk, sa_bv], axis=1)   # (1, 3D)
    ca_wkv = jnp.concatenate([ca_wk, ca_wv], axis=1)           # (D, 2D)
    ca_bkv = jnp.concatenate([ca_bk, ca_bv], axis=1)           # (1, 2D)

    # PyTorch masked_fill semantics precomputed as an additive bias:
    # bias = finfo(f32).min where (1 - mask) != 0 else 0.
    def to_bias(mask):
        inv = 1.0 - mask.astype(jnp.float32)
        return jnp.where(inv != 0.0, NEG_MIN, 0.0).astype(jnp.float32)

    sa_bias = to_bias(look_ahead_mask)       # (B, H, S, S)
    ca_bias = to_bias(enc_pad_mask)          # (B, H, S, Se)

    fused = [sa_wqkv, sa_bqkv, sa_wo, sa_bo, ln1_g, ln1_b,
             ca_wq, ca_bq, ca_wkv, ca_bkv, ca_wo, ca_bo, ln2_g, ln2_b,
             fc1_w, fc1_b, fc2_w, fc2_b, ln3_g, ln3_b]

    def rep_spec(a):   # whole-array parameter, same block for every grid step
        nd = a.ndim
        return pl.BlockSpec(a.shape, lambda i, nd=nd: (0,) * nd)

    in_specs = [
        pl.BlockSpec((Bt, S, D), lambda i: (i, 0, 0)),          # x
        pl.BlockSpec((Bt, Se, D), lambda i: (i, 0, 0)),         # enc_output
        pl.BlockSpec((Bt, H, S, S), lambda i: (i, 0, 0, 0)),    # self-attn bias
        pl.BlockSpec((Bt, H, S, Se), lambda i: (i, 0, 0, 0)),   # cross-attn bias
    ] + [rep_spec(p) for p in fused]

    out_specs = (
        pl.BlockSpec((Bt, S, D), lambda i: (i, 0, 0)),
        pl.BlockSpec((Bt, S, H * S), lambda i: (i, 0, 0)),      # lane-dense weights
        pl.BlockSpec((Bt, S, H * Se), lambda i: (i, 0, 0)),
    )
    out_shape = (
        jax.ShapeDtypeStruct((B, S, D), jnp.float32),
        jax.ShapeDtypeStruct((B, S, H * S), jnp.float32),
        jax.ShapeDtypeStruct((B, S, H * Se), jnp.float32),
    )

    fn = pl.pallas_call(
        decoder_layer_kernel,
        out_shape=out_shape,
        grid=(batch_tiles,),
        in_specs=in_specs,
        out_specs=out_specs,
        compiler_params=pltpu.CompilerParams(
            dimension_semantics=("parallel",)),
    )
    out, dec_ld, cross_ld = fn(x, enc_output, sa_bias, ca_bias, *fused)

    # Restore the PyTorch (B, H, Sq, Sk) attention-weight layout (wrapper-side,
    # plain XLA reshape/transpose).
    dec_attn = dec_ld.reshape(B, S, H, S).transpose(0, 2, 1, 3)
    cross_attn = cross_ld.reshape(B, S, H, Se).transpose(0, 2, 1, 3)
    return out, dec_attn, cross_attn


# --------------------------------------------------------------------------
# parameter init (PyTorch-style: per-projection weights, pre-transposed (in, out))
# --------------------------------------------------------------------------
def init_params(key):
    ks = list(jax.random.split(key, 20))
    it = iter(ks)

    def lin(fi, fo):
        w = jax.random.normal(next(it), (fi, fo), jnp.float32) * 0.02
        b = jax.random.normal(next(it), (1, fo), jnp.float32) * 0.02
        return w, b

    sa_wq, sa_bq = lin(D_MODEL, D_MODEL)
    sa_wk, sa_bk = lin(D_MODEL, D_MODEL)
    sa_wv, sa_bv = lin(D_MODEL, D_MODEL)
    sa_wo, sa_bo = lin(D_MODEL, D_MODEL)
    ca_wq, ca_bq = lin(D_MODEL, D_MODEL)
    ca_wk, ca_bk = lin(D_MODEL, D_MODEL)
    ca_wv, ca_bv = lin(D_MODEL, D_MODEL)
    ca_wo, ca_bo = lin(D_MODEL, D_MODEL)
    fc1_w, fc1_b = lin(D_MODEL, DIM_FF)
    fc2_w, fc2_b = lin(DIM_FF, D_MODEL)

    ln_g = jnp.ones((1, D_MODEL), jnp.float32)   # PyTorch LayerNorm default init
    ln_b = jnp.zeros((1, D_MODEL), jnp.float32)

    return [
        sa_wq, sa_bq, sa_wk, sa_bk, sa_wv, sa_bv, sa_wo, sa_bo,
        ln_g, ln_b,
        ca_wq, ca_bq, ca_wk, ca_bk, ca_wv, ca_bv, ca_wo, ca_bo,
        ln_g, ln_b,
        fc1_w, fc1_b, fc2_w, fc2_b,
        ln_g, ln_b,
    ]


# --------------------------------------------------------------------------
# pure-JAX reference of the PyTorch module (eval mode) for validation
# --------------------------------------------------------------------------
def reference_decoder_layer(x, enc, look_ahead_mask, enc_pad_mask, params):
    (sa_wq, sa_bq, sa_wk, sa_bk, sa_wv, sa_bv, sa_wo, sa_bo,
     ln1_g, ln1_b,
     ca_wq, ca_bq, ca_wk, ca_bk, ca_wv, ca_bv, ca_wo, ca_bo,
     ln2_g, ln2_b,
     fc1_w, fc1_b, fc2_w, fc2_b,
     ln3_g, ln3_b) = params
    B = x.shape[0]
    H, dk = NUM_HEADS, D_HEAD

    def split(t):
        return t.reshape(B, -1, H, dk).transpose(0, 2, 1, 3)

    def attn(xq, xkv, wq, bq, wk, bk, wv, bv, wo, bo, mask):
        q, k, v = split(xq @ wq + bq), split(xkv @ wk + bk), split(xkv @ wv + bv)
        scores = jnp.einsum('bhqd,bhkd->bhqk', q, k) / math.sqrt(dk)
        scores = scores + jnp.where((1.0 - mask) != 0.0, NEG_MIN, 0.0)
        w = jax.nn.softmax(scores, axis=-1)
        ctx = jnp.einsum('bhqk,bhkd->bhqd', w, v)
        ctx = ctx.transpose(0, 2, 1, 3).reshape(B, -1, D_MODEL)
        return ctx @ wo + bo, w

    sa, wa = attn(x, x, sa_wq, sa_bq, sa_wk, sa_bk, sa_wv, sa_bv, sa_wo, sa_bo,
                  look_ahead_mask)
    x1 = _layer_norm(x + sa, ln1_g, ln1_b, EPS_SELF)
    ca, wc = attn(x1, enc, ca_wq, ca_bq, ca_wk, ca_bk, ca_wv, ca_bv, ca_wo, ca_bo,
                  enc_pad_mask)
    x2 = _layer_norm(x1 + ca, ln2_g, ln2_b, EPS_OTHER)
    h = _gelu_exact(x2 @ fc1_w + fc1_b)
    h = h @ fc2_w + fc2_b
    x3 = _layer_norm(x2 + h, ln3_g, ln3_b, EPS_OTHER)
    return x3, wa, wc


if __name__ == "__main__":
    key = jax.random.PRNGKey(0)
    kx, ke, kp = jax.random.split(key, 3)

    B, S, Se = 2, 8, 8
    x = jax.random.normal(kx, (B, S, D_MODEL), jnp.float32)
    enc = jax.random.normal(ke, (B, Se, D_MODEL), jnp.float32)

    # causal look-ahead mask: 1.0 = attend, 0.0 = masked
    lam = jnp.broadcast_to(
        jnp.tril(jnp.ones((S, S), jnp.float32)), (B, NUM_HEADS, S, S))
    # encoder pad mask: batch 1 has the last 2 encoder positions padded out
    epm = jnp.ones((B, NUM_HEADS, S, Se), jnp.float32)
    epm = epm.at[1, :, :, Se - 2:].set(0.0)

    params = init_params(kp)

    out, dec_attn, cross_attn = transformer_decoder_layer(x, enc, lam, epm, params)
    jax.block_until_ready((out, dec_attn, cross_attn))

    assert out.shape == (B, S, D_MODEL)
    assert dec_attn.shape == (B, NUM_HEADS, S, S)
    assert cross_attn.shape == (B, NUM_HEADS, S, Se)
    assert bool(jnp.all(jnp.isfinite(out)))
    # attention rows must sum to 1
    assert bool(jnp.allclose(jnp.sum(dec_attn, -1), 1.0, atol=1e-5))
    assert bool(jnp.allclose(jnp.sum(cross_attn, -1), 1.0, atol=1e-5))

    # numerical check against the pure-JAX reference of the PyTorch module
    with jax.default_matmul_precision("highest"):
        ref_out, ref_da, ref_ca = reference_decoder_layer(x, enc, lam, epm, params)
    assert bool(jnp.allclose(out, ref_out, atol=2e-3, rtol=2e-3))
    assert bool(jnp.allclose(dec_attn, ref_da, atol=2e-3, rtol=2e-3))
    assert bool(jnp.allclose(cross_attn, ref_ca, atol=2e-3, rtol=2e-3))

    print("KERNEL_OK")
</pallas_src>

<mosaic_0001>
module attributes {stable_mosaic.version = 11 : i64} {
  func.func @decoder_layer_kernel(%arg0: i32, %arg1: memref<2x8x32xf32, #tpu.memory_space<vmem>>, %arg2: memref<2x8x32xf32, #tpu.memory_space<vmem>>, %arg3: memref<2x4x8x8xf32, #tpu.memory_space<vmem>>, %arg4: memref<2x4x8x8xf32, #tpu.memory_space<vmem>>, %arg5: memref<32x96xf32, #tpu.memory_space<vmem>>, %arg6: memref<1x96xf32, #tpu.memory_space<vmem>>, %arg7: memref<32x32xf32, #tpu.memory_space<vmem>>, %arg8: memref<1x32xf32, #tpu.memory_space<vmem>>, %arg9: memref<1x32xf32, #tpu.memory_space<vmem>>, %arg10: memref<1x32xf32, #tpu.memory_space<vmem>>, %arg11: memref<32x32xf32, #tpu.memory_space<vmem>>, %arg12: memref<1x32xf32, #tpu.memory_space<vmem>>, %arg13: memref<32x64xf32, #tpu.memory_space<vmem>>, %arg14: memref<1x64xf32, #tpu.memory_space<vmem>>, %arg15: memref<32x32xf32, #tpu.memory_space<vmem>>, %arg16: memref<1x32xf32, #tpu.memory_space<vmem>>, %arg17: memref<1x32xf32, #tpu.memory_space<vmem>>, %arg18: memref<1x32xf32, #tpu.memory_space<vmem>>, %arg19: memref<32x64xf32, #tpu.memory_space<vmem>>, %arg20: memref<1x64xf32, #tpu.memory_space<vmem>>, %arg21: memref<64x32xf32, #tpu.memory_space<vmem>>, %arg22: memref<1x32xf32, #tpu.memory_space<vmem>>, %arg23: memref<1x32xf32, #tpu.memory_space<vmem>>, %arg24: memref<1x32xf32, #tpu.memory_space<vmem>>, %arg25: memref<2x8x32xf32, #tpu.memory_space<vmem>>, %arg26: memref<2x8x32xf32, #tpu.memory_space<vmem>>, %arg27: memref<2x8x32xf32, #tpu.memory_space<vmem>>) attributes {dimension_semantics = [#tpu.dimension_semantics<parallel>], iteration_bounds = array<i64: 1>, scalar_prefetch = 0 : i64, scratch_operands = 0 : i64, tpu.core_type = #tpu.core_type<tc>, window_params = [{transform_indices = @transform_0, window_bounds = array<i64: 2, 8, 32>}, {transform_indices = @transform_1, window_bounds = array<i64: 2, 8, 32>}, {transform_indices = @transform_2, window_bounds = array<i64: 2, 4, 8, 8>}, {transform_indices = @transform_3, window_bounds = array<i64: 2, 4, 8, 8>}, {pipeline_mode = #tpu.pipeline_mode<synchronous>, transform_indices = @transform_4, window_bounds = array<i64: 32, 96>}, {pipeline_mode = #tpu.pipeline_mode<synchronous>, transform_indices = @transform_5, window_bounds = array<i64: 1, 96>}, {pipeline_mode = #tpu.pipeline_mode<synchronous>, transform_indices = @transform_6, window_bounds = array<i64: 32, 32>}, {pipeline_mode = #tpu.pipeline_mode<synchronous>, transform_indices = @transform_7, window_bounds = array<i64: 1, 32>}, {pipeline_mode = #tpu.pipeline_mode<synchronous>, transform_indices = @transform_8, window_bounds = array<i64: 1, 32>}, {pipeline_mode = #tpu.pipeline_mode<synchronous>, transform_indices = @transform_9, window_bounds = array<i64: 1, 32>}, {pipeline_mode = #tpu.pipeline_mode<synchronous>, transform_indices = @transform_10, window_bounds = array<i64: 32, 32>}, {pipeline_mode = #tpu.pipeline_mode<synchronous>, transform_indices = @transform_11, window_bounds = array<i64: 1, 32>}, {pipeline_mode = #tpu.pipeline_mode<synchronous>, transform_indices = @transform_12, window_bounds = array<i64: 32, 64>}, {pipeline_mode = #tpu.pipeline_mode<synchronous>, transform_indices = @transform_13, window_bounds = array<i64: 1, 64>}, {pipeline_mode = #tpu.pipeline_mode<synchronous>, transform_indices = @transform_14, window_bounds = array<i64: 32, 32>}, {pipeline_mode = #tpu.pipeline_mode<synchronous>, transform_indices = @transform_15, window_bounds = array<i64: 1, 32>}, {pipeline_mode = #tpu.pipeline_mode<synchronous>, transform_indices = @transform_16, window_bounds = array<i64: 1, 32>}, {pipeline_mode = #tpu.pipeline_mode<synchronous>, transform_indices = @transform_17, window_bounds = array<i64: 1, 32>}, {pipeline_mode = #tpu.pipeline_mode<synchronous>, transform_indices = @transform_18, window_bounds = array<i64: 32, 64>}, {pipeline_mode = #tpu.pipeline_mode<synchronous>, transform_indices = @transform_19, window_bounds = array<i64: 1, 64>}, {pipeline_mode = #tpu.pipeline_mode<synchronous>, transform_indices = @transform_20, window_bounds = array<i64: 64, 32>}, {pipeline_mode = #tpu.pipeline_mode<synchronous>, transform_indices = @transform_21, window_bounds = array<i64: 1, 32>}, {pipeline_mode = #tpu.pipeline_mode<synchronous>, transform_indices = @transform_22, window_bounds = array<i64: 1, 32>}, {pipeline_mode = #tpu.pipeline_mode<synchronous>, transform_indices = @transform_23, window_bounds = array<i64: 1, 32>}, {transform_indices = @transform_24, window_bounds = array<i64: 2, 8, 32>}, {transform_indices = @transform_25, window_bounds = array<i64: 2, 8, 32>}, {transform_indices = @transform_26, window_bounds = array<i64: 2, 8, 32>}]} {
    %c0 = arith.constant 0 : index
    %c0_0 = arith.constant 0 : index
    %c0_1 = arith.constant 0 : index
    %0 = vector.load %arg1[%c0, %c0_0, %c0_1] : memref<2x8x32xf32, #tpu.memory_space<vmem>>, vector<2x8x32xf32>
    %1 = vector.shape_cast %0 : vector<2x8x32xf32> to vector<16x32xf32>
    %c0_2 = arith.constant 0 : index
    %c0_3 = arith.constant 0 : index
    %c0_4 = arith.constant 0 : index
    %2 = vector.load %arg2[%c0_2, %c0_3, %c0_4] : memref<2x8x32xf32, #tpu.memory_space<vmem>>, vector<2x8x32xf32>
    %3 = vector.shape_cast %2 : vector<2x8x32xf32> to vector<16x32xf32>
    %c0_5 = arith.constant 0 : index
    %c0_6 = arith.constant 0 : index
    %4 = vector.load %arg5[%c0_5, %c0_6] : memref<32x96xf32, #tpu.memory_space<vmem>>, vector<32x96xf32>
    %cst = arith.constant dense<0.000000e+00> : vector<16x96xf32>
    %5 = tpu.matmul %1, %4, %cst {dimension_numbers = #tpu.dot_dimension_numbers<[1], [0], [0], [1], [0, 0, 1, 1], [], []>} : vector<16x32xf32>, vector<32x96xf32>, vector<16x96xf32> -> vector<16x96xf32>
    %c0_7 = arith.constant 0 : index
    %c0_8 = arith.constant 0 : index
    %6 = vector.load %arg6[%c0_7, %c0_8] : memref<1x96xf32, #tpu.memory_space<vmem>>, vector<1x96xf32>
    %7 = vector.broadcast %6 : vector<1x96xf32> to vector<16x96xf32>
    %8 = arith.addf %5, %7 : vector<16x96xf32>
    %9 = vector.extract_strided_slice %8 {offsets = [0, 0], sizes = [8, 96], strides = [1, 1]} : vector<16x96xf32> to vector<8x96xf32>
    %10 = vector.extract_strided_slice %9 {offsets = [0, 0], sizes = [8, 8], strides = [1, 1]} : vector<8x96xf32> to vector<8x8xf32>
    %11 = vector.extract_strided_slice %9 {offsets = [0, 8], sizes = [8, 8], strides = [1, 1]} : vector<8x96xf32> to vector<8x8xf32>
    %12 = vector.extract_strided_slice %9 {offsets = [0, 16], sizes = [8, 8], strides = [1, 1]} : vector<8x96xf32> to vector<8x8xf32>
    %13 = vector.extract_strided_slice %9 {offsets = [0, 24], sizes = [8, 8], strides = [1, 1]} : vector<8x96xf32> to vector<8x8xf32>
    %14 = vector.extract_strided_slice %8 {offsets = [8, 0], sizes = [8, 96], strides = [1, 1]} : vector<16x96xf32> to vector<8x96xf32>
    %15 = vector.extract_strided_slice %14 {offsets = [0, 0], sizes = [8, 8], strides = [1, 1]} : vector<8x96xf32> to vector<8x8xf32>
    %16 = vector.extract_strided_slice %14 {offsets = [0, 8], sizes = [8, 8], strides = [1, 1]} : vector<8x96xf32> to vector<8x8xf32>
    %17 = vector.extract_strided_slice %14 {offsets = [0, 16], sizes = [8, 8], strides = [1, 1]} : vector<8x96xf32> to vector<8x8xf32>
    %18 = vector.extract_strided_slice %14 {offsets = [0, 24], sizes = [8, 8], strides = [1, 1]} : vector<8x96xf32> to vector<8x8xf32>
    %19 = vector.shape_cast %10 : vector<8x8xf32> to vector<1x8x8xf32>
    %20 = vector.shape_cast %11 : vector<8x8xf32> to vector<1x8x8xf32>
    %21 = vector.shape_cast %12 : vector<8x8xf32> to vector<1x8x8xf32>
    %22 = vector.shape_cast %13 : vector<8x8xf32> to vector<1x8x8xf32>
    %23 = vector.shape_cast %15 : vector<8x8xf32> to vector<1x8x8xf32>
    %24 = vector.shape_cast %16 : vector<8x8xf32> to vector<1x8x8xf32>
    %25 = vector.shape_cast %17 : vector<8x8xf32> to vector<1x8x8xf32>
    %26 = vector.shape_cast %18 : vector<8x8xf32> to vector<1x8x8xf32>
    %27 = tpu.concatenate %19, %20, %21, %22, %23, %24, %25, %26 in 0 : vector<1x8x8xf32>, vector<1x8x8xf32>, vector<1x8x8xf32>, vector<1x8x8xf32>, vector<1x8x8xf32>, vector<1x8x8xf32>, vector<1x8x8xf32>, vector<1x8x8xf32> -> vector<8x8x8xf32>
    %28 = vector.extract_strided_slice %8 {offsets = [0, 0], sizes = [8, 96], strides = [1, 1]} : vector<16x96xf32> to vector<8x96xf32>
    %29 = vector.extract_strided_slice %28 {offsets = [0, 32], sizes = [8, 8], strides = [1, 1]} : vector<8x96xf32> to vector<8x8xf32>
    %30 = vector.extract_strided_slice %28 {offsets = [0, 40], sizes = [8, 8], strides = [1, 1]} : vector<8x96xf32> to vector<8x8xf32>
    %31 = vector.extract_strided_slice %28 {offsets = [0, 48], sizes = [8, 8], strides = [1, 1]} : vector<8x96xf32> to vector<8x8xf32>
    %32 = vector.extract_strided_slice %28 {offsets = [0, 56], sizes = [8, 8], strides = [1, 1]} : vector<8x96xf32> to vector<8x8xf32>
    %33 = vector.extract_strided_slice %8 {offsets = [8, 0], sizes = [8, 96], strides = [1, 1]} : vector<16x96xf32> to vector<8x96xf32>
    %34 = vector.extract_strided_slice %33 {offsets = [0, 32], sizes = [8, 8], strides = [1, 1]} : vector<8x96xf32> to vector<8x8xf32>
    %35 = vector.extract_strided_slice %33 {offsets = [0, 40], sizes = [8, 8], strides = [1, 1]} : vector<8x96xf32> to vector<8x8xf32>
    %36 = vector.extract_strided_slice %33 {offsets = [0, 48], sizes = [8, 8], strides = [1, 1]} : vector<8x96xf32> to vector<8x8xf32>
    %37 = vector.extract_strided_slice %33 {offsets = [0, 56], sizes = [8, 8], strides = [1, 1]} : vector<8x96xf32> to vector<8x8xf32>
    %38 = vector.shape_cast %29 : vector<8x8xf32> to vector<1x8x8xf32>
    %39 = vector.shape_cast %30 : vector<8x8xf32> to vector<1x8x8xf32>
    %40 = vector.shape_cast %31 : vector<8x8xf32> to vector<1x8x8xf32>
    %41 = vector.shape_cast %32 : vector<8x8xf32> to vector<1x8x8xf32>
    %42 = vector.shape_cast %34 : vector<8x8xf32> to vector<1x8x8xf32>
    %43 = vector.shape_cast %35 : vector<8x8xf32> to vector<1x8x8xf32>
    %44 = vector.shape_cast %36 : vector<8x8xf32> to vector<1x8x8xf32>
    %45 = vector.shape_cast %37 : vector<8x8xf32> to vector<1x8x8xf32>
    %46 = tpu.concatenate %38, %39, %40, %41, %42, %43, %44, %45 in 0 : vector<1x8x8xf32>, vector<1x8x8xf32>, vector<1x8x8xf32>, vector<1x8x8xf32>, vector<1x8x8xf32>, vector<1x8x8xf32>, vector<1x8x8xf32>, vector<1x8x8xf32> -> vector<8x8x8xf32>
    %47 = vector.extract_strided_slice %8 {offsets = [0, 0], sizes = [8, 96], strides = [1, 1]} : vector<16x96xf32> to vector<8x96xf32>
    %48 = vector.extract_strided_slice %47 {offsets = [0, 64], sizes = [8, 8], strides = [1, 1]} : vector<8x96xf32> to vector<8x8xf32>
    %49 = vector.extract_strided_slice %47 {offsets = [0, 72], sizes = [8, 8], strides = [1, 1]} : vector<8x96xf32> to vector<8x8xf32>
    %50 = vector.extract_strided_slice %47 {offsets = [0, 80], sizes = [8, 8], strides = [1, 1]} : vector<8x96xf32> to vector<8x8xf32>
    %51 = vector.extract_strided_slice %47 {offsets = [0, 88], sizes = [8, 8], strides = [1, 1]} : vector<8x96xf32> to vector<8x8xf32>
    %52 = vector.extract_strided_slice %8 {offsets = [8, 0], sizes = [8, 96], strides = [1, 1]} : vector<16x96xf32> to vector<8x96xf32>
    %53 = vector.extract_strided_slice %52 {offsets = [0, 64], sizes = [8, 8], strides = [1, 1]} : vector<8x96xf32> to vector<8x8xf32>
    %54 = vector.extract_strided_slice %52 {offsets = [0, 72], sizes = [8, 8], strides = [1, 1]} : vector<8x96xf32> to vector<8x8xf32>
    %55 = vector.extract_strided_slice %52 {offsets = [0, 80], sizes = [8, 8], strides = [1, 1]} : vector<8x96xf32> to vector<8x8xf32>
    %56 = vector.extract_strided_slice %52 {offsets = [0, 88], sizes = [8, 8], strides = [1, 1]} : vector<8x96xf32> to vector<8x8xf32>
    %57 = vector.shape_cast %48 : vector<8x8xf32> to vector<1x8x8xf32>
    %58 = vector.shape_cast %49 : vector<8x8xf32> to vector<1x8x8xf32>
    %59 = vector.shape_cast %50 : vector<8x8xf32> to vector<1x8x8xf32>
    %60 = vector.shape_cast %51 : vector<8x8xf32> to vector<1x8x8xf32>
    %61 = vector.shape_cast %53 : vector<8x8xf32> to vector<1x8x8xf32>
    %62 = vector.shape_cast %54 : vector<8x8xf32> to vector<1x8x8xf32>
    %63 = vector.shape_cast %55 : vector<8x8xf32> to vector<1x8x8xf32>
    %64 = vector.shape_cast %56 : vector<8x8xf32> to vector<1x8x8xf32>
    %65 = tpu.concatenate %57, %58, %59, %60, %61, %62, %63, %64 in 0 : vector<1x8x8xf32>, vector<1x8x8xf32>, vector<1x8x8xf32>, vector<1x8x8xf32>, vector<1x8x8xf32>, vector<1x8x8xf32>, vector<1x8x8xf32>, vector<1x8x8xf32> -> vector<8x8x8xf32>
    %c0_9 = arith.constant 0 : index
    %c0_10 = arith.constant 0 : index
    %c0_11 = arith.constant 0 : index
    %c0_12 = arith.constant 0 : index
    %66 = vector.load %arg3[%c0_9, %c0_10, %c0_11, %c0_12] : memref<2x4x8x8xf32, #tpu.memory_space<vmem>>, vector<2x4x8x8xf32>
    %67 = vector.shape_cast %66 : vector<2x4x8x8xf32> to vector<8x8x8xf32>
    "tpu.trace_start"() <{level = 10 : i32, message = "bqd,bkd->bqk"}> : () -> ()
    %cst_13 = arith.constant dense<0.000000e+00> : vector<8x8x8xf32>
    %68 = tpu.matmul %27, %46, %cst_13 {dimension_numbers = #tpu.dot_dimension_numbers<[2], [2], [1], [1], [0, 0, 0, 1, 1, 1], [0], [0]>} : vector<8x8x8xf32>, vector<8x8x8xf32>, vector<8x8x8xf32> -> vector<8x8x8xf32>
    "tpu.trace_stop"() : () -> ()
    %cst_14 = arith.constant 0.353553385 : f32
    %69 = vector.broadcast %cst_14 : f32 to vector<8x8x8xf32>
    %70 = arith.mulf %68, %69 : vector<8x8x8xf32>
    %71 = arith.addf %70, %67 : vector<8x8x8xf32>
    %cst_15 = arith.constant dense<0xFF800000> : vector<8x8xf32>
    %72 = vector.multi_reduction <maximumf>, %71, %cst_15 [2] : vector<8x8x8xf32> to vector<8x8xf32>
    %73 = vector.shape_cast %72 : vector<8x8xf32> to vector<8x8x1xf32>
    %74 = vector.broadcast %73 : vector<8x8x1xf32> to vector<8x8x8xf32>
    %75 = arith.subf %71, %74 : vector<8x8x8xf32>
    %76 = math.exp %75 : vector<8x8x8xf32>
    %cst_16 = arith.constant dense<0.000000e+00> : vector<8x8xf32>
    %77 = vector.multi_reduction <add>, %76, %cst_16 [2] : vector<8x8x8xf32> to vector<8x8xf32>
    %78 = vector.shape_cast %77 : vector<8x8xf32> to vector<8x8x1xf32>
    %79 = vector.broadcast %78 : vector<8x8x1xf32> to vector<8x8x8xf32>
    %80 = arith.divf %76, %79 : vector<8x8x8xf32>
    "tpu.trace_start"() <{level = 10 : i32, message = "bqk,bkd->bqd"}> : () -> ()
    %cst_17 = arith.constant dense<0.000000e+00> : vector<8x8x8xf32>
    %81 = tpu.matmul %80, %65, %cst_17 {dimension_numbers = #tpu.dot_dimension_numbers<[2], [1], [1], [2], [0, 0, 0, 1, 1, 2], [0], [0]>} : vector<8x8x8xf32>, vector<8x8x8xf32>, vector<8x8x8xf32> -> vector<8x8x8xf32>
    "tpu.trace_stop"() : () -> ()
    %82 = vector.extract_strided_slice %80 {offsets = [0, 0, 0], sizes = [1, 8, 8], strides = [1, 1, 1]} : vector<8x8x8xf32> to vector<1x8x8xf32>
    %83 = vector.shape_cast %82 : vector<1x8x8xf32> to vector<8x8xf32>
    %84 = vector.extract_strided_slice %80 {offsets = [1, 0, 0], sizes = [1, 8, 8], strides = [1, 1, 1]} : vector<8x8x8xf32> to vector<1x8x8xf32>
    %85 = vector.shape_cast %84 : vector<1x8x8xf32> to vector<8x8xf32>
    %86 = vector.extract_strided_slice %80 {offsets = [2, 0, 0], sizes = [1, 8, 8], strides = [1, 1, 1]} : vector<8x8x8xf32> to vector<1x8x8xf32>
    %87 = vector.shape_cast %86 : vector<1x8x8xf32> to vector<8x8xf32>
    %88 = vector.extract_strided_slice %80 {offsets = [3, 0, 0], sizes = [1, 8, 8], strides = [1, 1, 1]} : vector<8x8x8xf32> to vector<1x8x8xf32>
    %89 = vector.shape_cast %88 : vector<1x8x8xf32> to vector<8x8xf32>
    %90 = tpu.concatenate %83, %85, %87, %89 in 1 : vector<8x8xf32>, vector<8x8xf32>, vector<8x8xf32>, vector<8x8xf32> -> vector<8x32xf32>
    %91 = vector.extract_strided_slice %80 {offsets = [4, 0, 0], sizes = [1, 8, 8], strides = [1, 1, 1]} : vector<8x8x8xf32> to vector<1x8x8xf32>
    %92 = vector.shape_cast %91 : vector<1x8x8xf32> to vector<8x8xf32>
    %93 = vector.extract_strided_slice %80 {offsets = [5, 0, 0], sizes = [1, 8, 8], strides = [1, 1, 1]} : vector<8x8x8xf32> to vector<1x8x8xf32>
    %94 = vector.shape_cast %93 : vector<1x8x8xf32> to vector<8x8xf32>
    %95 = vector.extract_strided_slice %80 {offsets = [6, 0, 0], sizes = [1, 8, 8], strides = [1, 1, 1]} : vector<8x8x8xf32> to vector<1x8x8xf32>
    %96 = vector.shape_cast %95 : vector<1x8x8xf32> to vector<8x8xf32>
    %97 = vector.extract_strided_slice %80 {offsets = [7, 0, 0], sizes = [1, 8, 8], strides = [1, 1, 1]} : vector<8x8x8xf32> to vector<1x8x8xf32>
    %98 = vector.shape_cast %97 : vector<1x8x8xf32> to vector<8x8xf32>
    %99 = tpu.concatenate %92, %94, %96, %98 in 1 : vector<8x8xf32>, vector<8x8xf32>, vector<8x8xf32>, vector<8x8xf32> -> vector<8x32xf32>
    %100 = vector.shape_cast %90 : vector<8x32xf32> to vector<1x8x32xf32>
    %101 = vector.shape_cast %99 : vector<8x32xf32> to vector<1x8x32xf32>
    %102 = tpu.concatenate %100, %101 in 0 : vector<1x8x32xf32>, vector<1x8x32xf32> -> vector<2x8x32xf32>
    %c0_18 = arith.constant 0 : index
    %c0_19 = arith.constant 0 : index
    %c0_20 = arith.constant 0 : index
    %103 = vector.load %arg26[%c0_18, %c0_19, %c0_20] : memref<2x8x32xf32, #tpu.memory_space<vmem>>, vector<2x8x32xf32>
    tpu.vector_store %arg26[%c0_18, %c0_19, %c0_20], %102 {strides = array<i32>} : memref<2x8x32xf32, #tpu.memory_space<vmem>>, vector<2x8x32xf32>,
    %104 = vector.extract_strided_slice %81 {offsets = [0, 0, 0], sizes = [1, 8, 8], strides = [1, 1, 1]} : vector<8x8x8xf32> to vector<1x8x8xf32>
    %105 = vector.shape_cast %104 : vector<1x8x8xf32> to vector<8x8xf32>
    %106 = vector.extract_strided_slice %81 {offsets = [1, 0, 0], sizes = [1, 8, 8], strides = [1, 1, 1]} : vector<8x8x8xf32> to vector<1x8x8xf32>
    %107 = vector.shape_cast %106 : vector<1x8x8xf32> to vector<8x8xf32>
    %108 = vector.extract_strided_slice %81 {offsets = [2, 0, 0], sizes = [1, 8, 8], strides = [1, 1, 1]} : vector<8x8x8xf32> to vector<1x8x8xf32>
    %109 = vector.shape_cast %108 : vector<1x8x8xf32> to vector<8x8xf32>
    %110 = vector.extract_strided_slice %81 {offsets = [3, 0, 0], sizes = [1, 8, 8], strides = [1, 1, 1]} : vector<8x8x8xf32> to vector<1x8x8xf32>
    %111 = vector.shape_cast %110 : vector<1x8x8xf32> to vector<8x8xf32>
    %112 = tpu.concatenate %105, %107, %109, %111 in 1 : vector<8x8xf32>, vector<8x8xf32>, vector<8x8xf32>, vector<8x8xf32> -> vector<8x32xf32>
    %113 = vector.extract_strided_slice %81 {offsets = [4, 0, 0], sizes = [1, 8, 8], strides = [1, 1, 1]} : vector<8x8x8xf32> to vector<1x8x8xf32>
    %114 = vector.shape_cast %113 : vector<1x8x8xf32> to vector<8x8xf32>
    %115 = vector.extract_strided_slice %81 {offsets = [5, 0, 0], sizes = [1, 8, 8], strides = [1, 1, 1]} : vector<8x8x8xf32> to vector<1x8x8xf32>
    %116 = vector.shape_cast %115 : vector<1x8x8xf32> to vector<8x8xf32>
    %117 = vector.extract_strided_slice %81 {offsets = [6, 0, 0], sizes = [1, 8, 8], strides = [1, 1, 1]} : vector<8x8x8xf32> to vector<1x8x8xf32>
    %118 = vector.shape_cast %117 : vector<1x8x8xf32> to vector<8x8xf32>
    %119 = vector.extract_strided_slice %81 {offsets = [7, 0, 0], sizes = [1, 8, 8], strides = [1, 1, 1]} : vector<8x8x8xf32> to vector<1x8x8xf32>
    %120 = vector.shape_cast %119 : vector<1x8x8xf32> to vector<8x8xf32>
    %121 = tpu.concatenate %114, %116, %118, %120 in 1 : vector<8x8xf32>, vector<8x8xf32>, vector<8x8xf32>, vector<8x8xf32> -> vector<8x32xf32>
    %122 = tpu.concatenate %112, %121 in 0 : vector<8x32xf32>, vector<8x32xf32> -> vector<16x32xf32>
    %c0_21 = arith.constant 0 : index
    %c0_22 = arith.constant 0 : index
    %123 = vector.load %arg7[%c0_21, %c0_22] : memref<32x32xf32, #tpu.memory_space<vmem>>, vector<32x32xf32>
    %cst_23 = arith.constant dense<0.000000e+00> : vector<16x32xf32>
    %124 = tpu.matmul %122, %123, %cst_23 {dimension_numbers = #tpu.dot_dimension_numbers<[1], [0], [0], [1], [0, 0, 1, 1], [], []>} : vector<16x32xf32>, vector<32x32xf32>, vector<16x32xf32> -> vector<16x32xf32>
    %c0_24 = arith.constant 0 : index
    %c0_25 = arith.constant 0 : index
    %125 = vector.load %arg8[%c0_24, %c0_25] : memref<1x32xf32, #tpu.memory_space<vmem>>, vector<1x32xf32>
    %126 = vector.broadcast %125 : vector<1x32xf32> to vector<16x32xf32>
    %127 = arith.addf %124, %126 : vector<16x32xf32>
    %128 = arith.addf %1, %127 : vector<16x32xf32>
    %c0_26 = arith.constant 0 : index
    %c0_27 = arith.constant 0 : index
    %129 = vector.load %arg9[%c0_26, %c0_27] : memref<1x32xf32, #tpu.memory_space<vmem>>, vector<1x32xf32>
    %c0_28 = arith.constant 0 : index
    %c0_29 = arith.constant 0 : index
    %130 = vector.load %arg10[%c0_28, %c0_29] : memref<1x32xf32, #tpu.memory_space<vmem>>, vector<1x32xf32>
    %cst_30 = arith.constant dense<0.000000e+00> : vector<16xf32>
    %131 = vector.multi_reduction <add>, %128, %cst_30 [1] : vector<16x32xf32> to vector<16xf32>
    %132 = vector.shape_cast %131 : vector<16xf32> to vector<16x1xf32>
    %cst_31 = arith.constant 3.200000e+01 : f32
    %133 = vector.broadcast %cst_31 : f32 to vector<16x1xf32>
    %134 = arith.divf %132, %133 : vector<16x1xf32>
    %135 = vector.broadcast %134 : vector<16x1xf32> to vector<16x32xf32>
    %136 = arith.subf %128, %135 : vector<16x32xf32>
    %137 = arith.mulf %136, %136 : vector<16x32xf32>
    %cst_32 = arith.constant dense<0.000000e+00> : vector<16xf32>
    %138 = vector.multi_reduction <add>, %137, %cst_32 [1] : vector<16x32xf32> to vector<16xf32>
    %139 = vector.shape_cast %138 : vector<16xf32> to vector<16x1xf32>
    %cst_33 = arith.constant 3.200000e+01 : f32
    %140 = vector.broadcast %cst_33 : f32 to vector<16x1xf32>
    %141 = arith.divf %139, %140 : vector<16x1xf32>
    %142 = vector.broadcast %134 : vector<16x1xf32> to vector<16x32xf32>
    %143 = arith.subf %128, %142 : vector<16x32xf32>
    %cst_34 = arith.constant 9.99999974E-6 : f32
    %144 = vector.broadcast %cst_34 : f32 to vector<16x1xf32>
    %145 = arith.addf %141, %144 : vector<16x1xf32>
    %146 = math.sqrt %145 : vector<16x1xf32>
    %147 = vector.broadcast %146 : vector<16x1xf32> to vector<16x32xf32>
    %148 = arith.divf %143, %147 : vector<16x32xf32>
    %149 = vector.broadcast %129 : vector<1x32xf32> to vector<16x32xf32>
    %150 = arith.mulf %148, %149 : vector<16x32xf32>
    %151 = vector.broadcast %130 : vector<1x32xf32> to vector<16x32xf32>
    %152 = arith.addf %150, %151 : vector<16x32xf32>
    %c0_35 = arith.constant 0 : index
    %c0_36 = arith.constant 0 : index
    %153 = vector.load %arg11[%c0_35, %c0_36] : memref<32x32xf32, #tpu.memory_space<vmem>>, vector<32x32xf32>
    %cst_37 = arith.constant dense<0.000000e+00> : vector<16x32xf32>
    %154 = tpu.matmul %152, %153, %cst_37 {dimension_numbers = #tpu.dot_dimension_numbers<[1], [0], [0], [1], [0, 0, 1, 1], [], []>} : vector<16x32xf32>, vector<32x32xf32>, vector<16x32xf32> -> vector<16x32xf32>
    %c0_38 = arith.constant 0 : index
    %c0_39 = arith.constant 0 : index
    %155 = vector.load %arg12[%c0_38, %c0_39] : memref<1x32xf32, #tpu.memory_space<vmem>>, vector<1x32xf32>
    %156 = vector.broadcast %155 : vector<1x32xf32> to vector<16x32xf32>
    %157 = arith.addf %154, %156 : vector<16x32xf32>
    %c0_40 = arith.constant 0 : index
    %c0_41 = arith.constant 0 : index
    %158 = vector.load %arg13[%c0_40, %c0_41] : memref<32x64xf32, #tpu.memory_space<vmem>>, vector<32x64xf32>
    %cst_42 = arith.constant dense<0.000000e+00> : vector<16x64xf32>
    %159 = tpu.matmul %3, %158, %cst_42 {dimension_numbers = #tpu.dot_dimension_numbers<[1], [0], [0], [1], [0, 0, 1, 1], [], []>} : vector<16x32xf32>, vector<32x64xf32>, vector<16x64xf32> -> vector<16x64xf32>
    %c0_43 = arith.constant 0 : index
    %c0_44 = arith.constant 0 : index
    %160 = vector.load %arg14[%c0_43, %c0_44] : memref<1x64xf32, #tpu.memory_space<vmem>>, vector<1x64xf32>
    %161 = vector.broadcast %160 : vector<1x64xf32> to vector<16x64xf32>
    %162 = arith.addf %159, %161 : vector<16x64xf32>
    %163 = vector.extract_strided_slice %157 {offsets = [0, 0], sizes = [8, 32], strides = [1, 1]} : vector<16x32xf32> to vector<8x32xf32>
    %164 = vector.extract_strided_slice %163 {offsets = [0, 0], sizes = [8, 8], strides = [1, 1]} : vector<8x32xf32> to vector<8x8xf32>
    %165 = vector.extract_strided_slice %163 {offsets = [0, 8], sizes = [8, 8], strides = [1, 1]} : vector<8x32xf32> to vector<8x8xf32>
    %166 = vector.extract_strided_slice %163 {offsets = [0, 16], sizes = [8, 8], strides = [1, 1]} : vector<8x32xf32> to vector<8x8xf32>
    %167 = vector.extract_strided_slice %163 {offsets = [0, 24], sizes = [8, 8], strides = [1, 1]} : vector<8x32xf32> to vector<8x8xf32>
    %168 = vector.extract_strided_slice %157 {offsets = [8, 0], sizes = [8, 32], strides = [1, 1]} : vector<16x32xf32> to vector<8x32xf32>
    %169 = vector.extract_strided_slice %168 {offsets = [0, 0], sizes = [8, 8], strides = [1, 1]} : vector<8x32xf32> to vector<8x8xf32>
    %170 = vector.extract_strided_slice %168 {offsets = [0, 8], sizes = [8, 8], strides = [1, 1]} : vector<8x32xf32> to vector<8x8xf32>
    %171 = vector.extract_strided_slice %168 {offsets = [0, 16], sizes = [8, 8], strides = [1, 1]} : vector<8x32xf32> to vector<8x8xf32>
    %172 = vector.extract_strided_slice %168 {offsets = [0, 24], sizes = [8, 8], strides = [1, 1]} : vector<8x32xf32> to vector<8x8xf32>
    %173 = vector.shape_cast %164 : vector<8x8xf32> to vector<1x8x8xf32>
    %174 = vector.shape_cast %165 : vector<8x8xf32> to vector<1x8x8xf32>
    %175 = vector.shape_cast %166 : vector<8x8xf32> to vector<1x8x8xf32>
    %176 = vector.shape_cast %167 : vector<8x8xf32> to vector<1x8x8xf32>
    %177 = vector.shape_cast %169 : vector<8x8xf32> to vector<1x8x8xf32>
    %178 = vector.shape_cast %170 : vector<8x8xf32> to vector<1x8x8xf32>
    %179 = vector.shape_cast %171 : vector<8x8xf32> to vector<1x8x8xf32>
    %180 = vector.shape_cast %172 : vector<8x8xf32> to vector<1x8x8xf32>
    %181 = tpu.concatenate %173, %174, %175, %176, %177, %178, %179, %180 in 0 : vector<1x8x8xf32>, vector<1x8x8xf32>, vector<1x8x8xf32>, vector<1x8x8xf32>, vector<1x8x8xf32>, vector<1x8x8xf32>, vector<1x8x8xf32>, vector<1x8x8xf32> -> vector<8x8x8xf32>
    %182 = vector.extract_strided_slice %162 {offsets = [0, 0], sizes = [8, 64], strides = [1, 1]} : vector<16x64xf32> to vector<8x64xf32>
    %183 = vector.extract_strided_slice %182 {offsets = [0, 0], sizes = [8, 8], strides = [1, 1]} : vector<8x64xf32> to vector<8x8xf32>
    %184 = vector.extract_strided_slice %182 {offsets = [0, 8], sizes = [8, 8], strides = [1, 1]} : vector<8x64xf32> to vector<8x8xf32>
    %185 = vector.extract_strided_slice %182 {offsets = [0, 16], sizes = [8, 8], strides = [1, 1]} : vector<8x64xf32> to vector<8x8xf32>
    %186 = vector.extract_strided_slice %182 {offsets = [0, 24], sizes = [8, 8], strides = [1, 1]} : vector<8x64xf32> to vector<8x8xf32>
    %187 = vector.extract_strided_slice %162 {offsets = [8, 0], sizes = [8, 64], strides = [1, 1]} : vector<16x64xf32> to vector<8x64xf32>
    %188 = vector.extract_strided_slice %187 {offsets = [0, 0], sizes = [8, 8], strides = [1, 1]} : vector<8x64xf32> to vector<8x8xf32>
    %189 = vector.extract_strided_slice %187 {offsets = [0, 8], sizes = [8, 8], strides = [1, 1]} : vector<8x64xf32> to vector<8x8xf32>
    %190 = vector.extract_strided_slice %187 {offsets = [0, 16], sizes = [8, 8], strides = [1, 1]} : vector<8x64xf32> to vector<8x8xf32>
    %191 = vector.extract_strided_slice %187 {offsets = [0, 24], sizes = [8, 8], strides = [1, 1]} : vector<8x64xf32> to vector<8x8xf32>
    %192 = vector.shape_cast %183 : vector<8x8xf32> to vector<1x8x8xf32>
    %193 = vector.shape_cast %184 : vector<8x8xf32> to vector<1x8x8xf32>
    %194 = vector.shape_cast %185 : vector<8x8xf32> to vector<1x8x8xf32>
    %195 = vector.shape_cast %186 : vector<8x8xf32> to vector<1x8x8xf32>
    %196 = vector.shape_cast %188 : vector<8x8xf32> to vector<1x8x8xf32>
    %197 = vector.shape_cast %189 : vector<8x8xf32> to vector<1x8x8xf32>
    %198 = vector.shape_cast %190 : vector<8x8xf32> to vector<1x8x8xf32>
    %199 = vector.shape_cast %191 : vector<8x8xf32> to vector<1x8x8xf32>
    %200 = tpu.concatenate %192, %193, %194, %195, %196, %197, %198, %199 in 0 : vector<1x8x8xf32>, vector<1x8x8xf32>, vector<1x8x8xf32>, vector<1x8x8xf32>, vector<1x8x8xf32>, vector<1x8x8xf32>, vector<1x8x8xf32>, vector<1x8x8xf32> -> vector<8x8x8xf32>
    %201 = vector.extract_strided_slice %162 {offsets = [0, 0], sizes = [8, 64], strides = [1, 1]} : vector<16x64xf32> to vector<8x64xf32>
    %202 = vector.extract_strided_slice %201 {offsets = [0, 32], sizes = [8, 8], strides = [1, 1]} : vector<8x64xf32> to vector<8x8xf32>
    %203 = vector.extract_strided_slice %201 {offsets = [0, 40], sizes = [8, 8], strides = [1, 1]} : vector<8x64xf32> to vector<8x8xf32>
    %204 = vector.extract_strided_slice %201 {offsets = [0, 48], sizes = [8, 8], strides = [1, 1]} : vector<8x64xf32> to vector<8x8xf32>
    %205 = vector.extract_strided_slice %201 {offsets = [0, 56], sizes = [8, 8], strides = [1, 1]} : vector<8x64xf32> to vector<8x8xf32>
    %206 = vector.extract_strided_slice %162 {offsets = [8, 0], sizes = [8, 64], strides = [1, 1]} : vector<16x64xf32> to vector<8x64xf32>
    %207 = vector.extract_strided_slice %206 {offsets = [0, 32], sizes = [8, 8], strides = [1, 1]} : vector<8x64xf32> to vector<8x8xf32>
    %208 = vector.extract_strided_slice %206 {offsets = [0, 40], sizes = [8, 8], strides = [1, 1]} : vector<8x64xf32> to vector<8x8xf32>
    %209 = vector.extract_strided_slice %206 {offsets = [0, 48], sizes = [8, 8], strides = [1, 1]} : vector<8x64xf32> to vector<8x8xf32>
    %210 = vector.extract_strided_slice %206 {offsets = [0, 56], sizes = [8, 8], strides = [1, 1]} : vector<8x64xf32> to vector<8x8xf32>
    %211 = vector.shape_cast %202 : vector<8x8xf32> to vector<1x8x8xf32>
    %212 = vector.shape_cast %203 : vector<8x8xf32> to vector<1x8x8xf32>
    %213 = vector.shape_cast %204 : vector<8x8xf32> to vector<1x8x8xf32>
    %214 = vector.shape_cast %205 : vector<8x8xf32> to vector<1x8x8xf32>
    %215 = vector.shape_cast %207 : vector<8x8xf32> to vector<1x8x8xf32>
    %216 = vector.shape_cast %208 : vector<8x8xf32> to vector<1x8x8xf32>
    %217 = vector.shape_cast %209 : vector<8x8xf32> to vector<1x8x8xf32>
    %218 = vector.shape_cast %210 : vector<8x8xf32> to vector<1x8x8xf32>
    %219 = tpu.concatenate %211, %212, %213, %214, %215, %216, %217, %218 in 0 : vector<1x8x8xf32>, vector<1x8x8xf32>, vector<1x8x8xf32>, vector<1x8x8xf32>, vector<1x8x8xf32>, vector<1x8x8xf32>, vector<1x8x8xf32>, vector<1x8x8xf32> -> vector<8x8x8xf32>
    %c0_45 = arith.constant 0 : index
    %c0_46 = arith.constant 0 : index
    %c0_47 = arith.constant 0 : index
    %c0_48 = arith.constant 0 : index
    %220 = vector.load %arg4[%c0_45, %c0_46, %c0_47, %c0_48] : memref<2x4x8x8xf32, #tpu.memory_space<vmem>>, vector<2x4x8x8xf32>
    %221 = vector.shape_cast %220 : vector<2x4x8x8xf32> to vector<8x8x8xf32>
    "tpu.trace_start"() <{level = 10 : i32, message = "bqd,bkd->bqk"}> : () -> ()
    %cst_49 = arith.constant dense<0.000000e+00> : vector<8x8x8xf32>
    %222 = tpu.matmul %181, %200, %cst_49 {dimension_numbers = #tpu.dot_dimension_numbers<[2], [2], [1], [1], [0, 0, 0, 1, 1, 1], [0], [0]>} : vector<8x8x8xf32>, vector<8x8x8xf32>, vector<8x8x8xf32> -> vector<8x8x8xf32>
    "tpu.trace_stop"() : () -> ()
    %cst_50 = arith.constant 0.353553385 : f32
    %223 = vector.broadcast %cst_50 : f32 to vector<8x8x8xf32>
    %224 = arith.mulf %222, %223 : vector<8x8x8xf32>
    %225 = arith.addf %224, %221 : vector<8x8x8xf32>
    %cst_51 = arith.constant dense<0xFF800000> : vector<8x8xf32>
    %226 = vector.multi_reduction <maximumf>, %225, %cst_51 [2] : vector<8x8x8xf32> to vector<8x8xf32>
    %227 = vector.shape_cast %226 : vector<8x8xf32> to vector<8x8x1xf32>
    %228 = vector.broadcast %227 : vector<8x8x1xf32> to vector<8x8x8xf32>
    %229 = arith.subf %225, %228 : vector<8x8x8xf32>
    %230 = math.exp %229 : vector<8x8x8xf32>
    %cst_52 = arith.constant dense<0.000000e+00> : vector<8x8xf32>
    %231 = vector.multi_reduction <add>, %230, %cst_52 [2] : vector<8x8x8xf32> to vector<8x8xf32>
    %232 = vector.shape_cast %231 : vector<8x8xf32> to vector<8x8x1xf32>
    %233 = vector.broadcast %232 : vector<8x8x1xf32> to vector<8x8x8xf32>
    %234 = arith.divf %230, %233 : vector<8x8x8xf32>
    "tpu.trace_start"() <{level = 10 : i32, message = "bqk,bkd->bqd"}> : () -> ()
    %cst_53 = arith.constant dense<0.000000e+00> : vector<8x8x8xf32>
    %235 = tpu.matmul %234, %219, %cst_53 {dimension_numbers = #tpu.dot_dimension_numbers<[2], [1], [1], [2], [0, 0, 0, 1, 1, 2], [0], [0]>} : vector<8x8x8xf32>, vector<8x8x8xf32>, vector<8x8x8xf32> -> vector<8x8x8xf32>
    "tpu.trace_stop"() : () -> ()
    %236 = vector.extract_strided_slice %234 {offsets = [0, 0, 0], sizes = [1, 8, 8], strides = [1, 1, 1]} : vector<8x8x8xf32> to vector<1x8x8xf32>
    %237 = vector.shape_cast %236 : vector<1x8x8xf32> to vector<8x8xf32>
    %238 = vector.extract_strided_slice %234 {offsets = [1, 0, 0], sizes = [1, 8, 8], strides = [1, 1, 1]} : vector<8x8x8xf32> to vector<1x8x8xf32>
    %239 = vector.shape_cast %238 : vector<1x8x8xf32> to vector<8x8xf32>
    %240 = vector.extract_strided_slice %234 {offsets = [2, 0, 0], sizes = [1, 8, 8], strides = [1, 1, 1]} : vector<8x8x8xf32> to vector<1x8x8xf32>
    %241 = vector.shape_cast %240 : vector<1x8x8xf32> to vector<8x8xf32>
    %242 = vector.extract_strided_slice %234 {offsets = [3, 0, 0], sizes = [1, 8, 8], strides = [1, 1, 1]} : vector<8x8x8xf32> to vector<1x8x8xf32>
    %243 = vector.shape_cast %242 : vector<1x8x8xf32> to vector<8x8xf32>
    %244 = tpu.concatenate %237, %239, %241, %243 in 1 : vector<8x8xf32>, vector<8x8xf32>, vector<8x8xf32>, vector<8x8xf32> -> vector<8x32xf32>
    %245 = vector.extract_strided_slice %234 {offsets = [4, 0, 0], sizes = [1, 8, 8], strides = [1, 1, 1]} : vector<8x8x8xf32> to vector<1x8x8xf32>
    %246 = vector.shape_cast %245 : vector<1x8x8xf32> to vector<8x8xf32>
    %247 = vector.extract_strided_slice %234 {offsets = [5, 0, 0], sizes = [1, 8, 8], strides = [1, 1, 1]} : vector<8x8x8xf32> to vector<1x8x8xf32>
    %248 = vector.shape_cast %247 : vector<1x8x8xf32> to vector<8x8xf32>
    %249 = vector.extract_strided_slice %234 {offsets = [6, 0, 0], sizes = [1, 8, 8], strides = [1, 1, 1]} : vector<8x8x8xf32> to vector<1x8x8xf32>
    %250 = vector.shape_cast %249 : vector<1x8x8xf32> to vector<8x8xf32>
    %251 = vector.extract_strided_slice %234 {offsets = [7, 0, 0], sizes = [1, 8, 8], strides = [1, 1, 1]} : vector<8x8x8xf32> to vector<1x8x8xf32>
    %252 = vector.shape_cast %251 : vector<1x8x8xf32> to vector<8x8xf32>
    %253 = tpu.concatenate %246, %248, %250, %252 in 1 : vector<8x8xf32>, vector<8x8xf32>, vector<8x8xf32>, vector<8x8xf32> -> vector<8x32xf32>
    %254 = vector.shape_cast %244 : vector<8x32xf32> to vector<1x8x32xf32>
    %255 = vector.shape_cast %253 : vector<8x32xf32> to vector<1x8x32xf32>
    %256 = tpu.concatenate %254, %255 in 0 : vector<1x8x32xf32>, vector<1x8x32xf32> -> vector<2x8x32xf32>
    %c0_54 = arith.constant 0 : index
    %c0_55 = arith.constant 0 : index
    %c0_56 = arith.constant 0 : index
    %257 = vector.load %arg27[%c0_54, %c0_55, %c0_56] : memref<2x8x32xf32, #tpu.memory_space<vmem>>, vector<2x8x32xf32>
    tpu.vector_store %arg27[%c0_54, %c0_55, %c0_56], %256 {strides = array<i32>} : memref<2x8x32xf32, #tpu.memory_space<vmem>>, vector<2x8x32xf32>,
    %258 = vector.extract_strided_slice %235 {offsets = [0, 0, 0], sizes = [1, 8, 8], strides = [1, 1, 1]} : vector<8x8x8xf32> to vector<1x8x8xf32>
    %259 = vector.shape_cast %258 : vector<1x8x8xf32> to vector<8x8xf32>
    %260 = vector.extract_strided_slice %235 {offsets = [1, 0, 0], sizes = [1, 8, 8], strides = [1, 1, 1]} : vector<8x8x8xf32> to vector<1x8x8xf32>
    %261 = vector.shape_cast %260 : vector<1x8x8xf32> to vector<8x8xf32>
    %262 = vector.extract_strided_slice %235 {offsets = [2, 0, 0], sizes = [1, 8, 8], strides = [1, 1, 1]} : vector<8x8x8xf32> to vector<1x8x8xf32>
    %263 = vector.shape_cast %262 : vector<1x8x8xf32> to vector<8x8xf32>
    %264 = vector.extract_strided_slice %235 {offsets = [3, 0, 0], sizes = [1, 8, 8], strides = [1, 1, 1]} : vector<8x8x8xf32> to vector<1x8x8xf32>
    %265 = vector.shape_cast %264 : vector<1x8x8xf32> to vector<8x8xf32>
    %266 = tpu.concatenate %259, %261, %263, %265 in 1 : vector<8x8xf32>, vector<8x8xf32>, vector<8x8xf32>, vector<8x8xf32> -> vector<8x32xf32>
    %267 = vector.extract_strided_slice %235 {offsets = [4, 0, 0], sizes = [1, 8, 8], strides = [1, 1, 1]} : vector<8x8x8xf32> to vector<1x8x8xf32>
    %268 = vector.shape_cast %267 : vector<1x8x8xf32> to vector<8x8xf32>
    %269 = vector.extract_strided_slice %235 {offsets = [5, 0, 0], sizes = [1, 8, 8], strides = [1, 1, 1]} : vector<8x8x8xf32> to vector<1x8x8xf32>
    %270 = vector.shape_cast %269 : vector<1x8x8xf32> to vector<8x8xf32>
    %271 = vector.extract_strided_slice %235 {offsets = [6, 0, 0], sizes = [1, 8, 8], strides = [1, 1, 1]} : vector<8x8x8xf32> to vector<1x8x8xf32>
    %272 = vector.shape_cast %271 : vector<1x8x8xf32> to vector<8x8xf32>
    %273 = vector.extract_strided_slice %235 {offsets = [7, 0, 0], sizes = [1, 8, 8], strides = [1, 1, 1]} : vector<8x8x8xf32> to vector<1x8x8xf32>
    %274 = vector.shape_cast %273 : vector<1x8x8xf32> to vector<8x8xf32>
    %275 = tpu.concatenate %268, %270, %272, %274 in 1 : vector<8x8xf32>, vector<8x8xf32>, vector<8x8xf32>, vector<8x8xf32> -> vector<8x32xf32>
    %276 = tpu.concatenate %266, %275 in 0 : vector<8x32xf32>, vector<8x32xf32> -> vector<16x32xf32>
    %c0_57 = arith.constant 0 : index
    %c0_58 = arith.constant 0 : index
    %277 = vector.load %arg15[%c0_57, %c0_58] : memref<32x32xf32, #tpu.memory_space<vmem>>, vector<32x32xf32>
    %cst_59 = arith.constant dense<0.000000e+00> : vector<16x32xf32>
    %278 = tpu.matmul %276, %277, %cst_59 {dimension_numbers = #tpu.dot_dimension_numbers<[1], [0], [0], [1], [0, 0, 1, 1], [], []>} : vector<16x32xf32>, vector<32x32xf32>, vector<16x32xf32> -> vector<16x32xf32>
    %c0_60 = arith.constant 0 : index
    %c0_61 = arith.constant 0 : index
    %279 = vector.load %arg16[%c0_60, %c0_61] : memref<1x32xf32, #tpu.memory_space<vmem>>, vector<1x32xf32>
    %280 = vector.broadcast %279 : vector<1x32xf32> to vector<16x32xf32>
    %281 = arith.addf %278, %280 : vector<16x32xf32>
    %282 = arith.addf %152, %281 : vector<16x32xf32>
    %c0_62 = arith.constant 0 : index
    %c0_63 = arith.constant 0 : index
    %283 = vector.load %arg17[%c0_62, %c0_63] : memref<1x32xf32, #tpu.memory_space<vmem>>, vector<1x32xf32>
    %c0_64 = arith.constant 0 : index
    %c0_65 = arith.constant 0 : index
    %284 = vector.load %arg18[%c0_64, %c0_65] : memref<1x32xf32, #tpu.memory_space<vmem>>, vector<1x32xf32>
    %cst_66 = arith.constant dense<0.000000e+00> : vector<16xf32>
    %285 = vector.multi_reduction <add>, %282, %cst_66 [1] : vector<16x32xf32> to vector<16xf32>
    %286 = vector.shape_cast %285 : vector<16xf32> to vector<16x1xf32>
    %cst_67 = arith.constant 3.200000e+01 : f32
    %287 = vector.broadcast %cst_67 : f32 to vector<16x1xf32>
    %288 = arith.divf %286, %287 : vector<16x1xf32>
    %289 = vector.broadcast %288 : vector<16x1xf32> to vector<16x32xf32>
    %290 = arith.subf %282, %289 : vector<16x32xf32>
    %291 = arith.mulf %290, %290 : vector<16x32xf32>
    %cst_68 = arith.constant dense<0.000000e+00> : vector<16xf32>
    %292 = vector.multi_reduction <add>, %291, %cst_68 [1] : vector<16x32xf32> to vector<16xf32>
    %293 = vector.shape_cast %292 : vector<16xf32> to vector<16x1xf32>
    %cst_69 = arith.constant 3.200000e+01 : f32
    %294 = vector.broadcast %cst_69 : f32 to vector<16x1xf32>
    %295 = arith.divf %293, %294 : vector<16x1xf32>
    %296 = vector.broadcast %288 : vector<16x1xf32> to vector<16x32xf32>
    %297 = arith.subf %282, %296 : vector<16x32xf32>
    %cst_70 = arith.constant 9.99999996E-13 : f32
    %298 = vector.broadcast %cst_70 : f32 to vector<16x1xf32>
    %299 = arith.addf %295, %298 : vector<16x1xf32>
    %300 = math.sqrt %299 : vector<16x1xf32>
    %301 = vector.broadcast %300 : vector<16x1xf32> to vector<16x32xf32>
    %302 = arith.divf %297, %301 : vector<16x32xf32>
    %303 = vector.broadcast %283 : vector<1x32xf32> to vector<16x32xf32>
    %304 = arith.mulf %302, %303 : vector<16x32xf32>
    %305 = vector.broadcast %284 : vector<1x32xf32> to vector<16x32xf32>
    %306 = arith.addf %304, %305 : vector<16x32xf32>
    %c0_71 = arith.constant 0 : index
    %c0_72 = arith.constant 0 : index
    %307 = vector.load %arg19[%c0_71, %c0_72] : memref<32x64xf32, #tpu.memory_space<vmem>>, vector<32x64xf32>
    %cst_73 = arith.constant dense<0.000000e+00> : vector<16x64xf32>
    %308 = tpu.matmul %306, %307, %cst_73 {dimension_numbers = #tpu.dot_dimension_numbers<[1], [0], [0], [1], [0, 0, 1, 1], [], []>} : vector<16x32xf32>, vector<32x64xf32>, vector<16x64xf32> -> vector<16x64xf32>
    %c0_74 = arith.constant 0 : index
    %c0_75 = arith.constant 0 : index
    %309 = vector.load %arg20[%c0_74, %c0_75] : memref<1x64xf32, #tpu.memory_space<vmem>>, vector<1x64xf32>
    %310 = vector.broadcast %309 : vector<1x64xf32> to vector<16x64xf32>
    %311 = arith.addf %308, %310 : vector<16x64xf32>
    %cst_76 = arith.constant 5.000000e-01 : f32
    %312 = vector.broadcast %cst_76 : f32 to vector<16x64xf32>
    %313 = arith.mulf %312, %311 : vector<16x64xf32>
    %cst_77 = arith.constant 1.41421354 : f32
    %314 = vector.broadcast %cst_77 : f32 to vector<16x64xf32>
    %315 = arith.divf %311, %314 : vector<16x64xf32>
    %316 = math.erf %315 : vector<16x64xf32>
    %cst_78 = arith.constant 1.000000e+00 : f32
    %317 = vector.broadcast %cst_78 : f32 to vector<16x64xf32>
    %318 = arith.addf %317, %316 : vector<16x64xf32>
    %319 = arith.mulf %313, %318 : vector<16x64xf32>
    %c0_79 = arith.constant 0 : index
    %c0_80 = arith.constant 0 : index
    %320 = vector.load %arg21[%c0_79, %c0_80] : memref<64x32xf32, #tpu.memory_space<vmem>>, vector<64x32xf32>
    %cst_81 = arith.constant dense<0.000000e+00> : vector<16x32xf32>
    %321 = tpu.matmul %319, %320, %cst_81 {dimension_numbers = #tpu.dot_dimension_numbers<[1], [0], [0], [1], [0, 0, 1, 1], [], []>} : vector<16x64xf32>, vector<64x32xf32>, vector<16x32xf32> -> vector<16x32xf32>
    %c0_82 = arith.constant 0 : index
    %c0_83 = arith.constant 0 : index
    %322 = vector.load %arg22[%c0_82, %c0_83] : memref<1x32xf32, #tpu.memory_space<vmem>>, vector<1x32xf32>
    %323 = vector.broadcast %322 : vector<1x32xf32> to vector<16x32xf32>
    %324 = arith.addf %321, %323 : vector<16x32xf32>
    %325 = arith.addf %306, %324 : vector<16x32xf32>
    %c0_84 = arith.constant 0 : index
    %c0_85 = arith.constant 0 : index
    %326 = vector.load %arg23[%c0_84, %c0_85] : memref<1x32xf32, #tpu.memory_space<vmem>>, vector<1x32xf32>
    %c0_86 = arith.constant 0 : index
    %c0_87 = arith.constant 0 : index
    %327 = vector.load %arg24[%c0_86, %c0_87] : memref<1x32xf32, #tpu.memory_space<vmem>>, vector<1x32xf32>
    %cst_88 = arith.constant dense<0.000000e+00> : vector<16xf32>
    %328 = vector.multi_reduction <add>, %325, %cst_88 [1] : vector<16x32xf32> to vector<16xf32>
    %329 = vector.shape_cast %328 : vector<16xf32> to vector<16x1xf32>
    %cst_89 = arith.constant 3.200000e+01 : f32
    %330 = vector.broadcast %cst_89 : f32 to vector<16x1xf32>
    %331 = arith.divf %329, %330 : vector<16x1xf32>
    %332 = vector.broadcast %331 : vector<16x1xf32> to vector<16x32xf32>
    %333 = arith.subf %325, %332 : vector<16x32xf32>
    %334 = arith.mulf %333, %333 : vector<16x32xf32>
    %cst_90 = arith.constant dense<0.000000e+00> : vector<16xf32>
    %335 = vector.multi_reduction <add>, %334, %cst_90 [1] : vector<16x32xf32> to vector<16xf32>
    %336 = vector.shape_cast %335 : vector<16xf32> to vector<16x1xf32>
    %cst_91 = arith.constant 3.200000e+01 : f32
    %337 = vector.broadcast %cst_91 : f32 to vector<16x1xf32>
    %338 = arith.divf %336, %337 : vector<16x1xf32>
    %339 = vector.broadcast %331 : vector<16x1xf32> to vector<16x32xf32>
    %340 = arith.subf %325, %339 : vector<16x32xf32>
    %cst_92 = arith.constant 9.99999996E-13 : f32
    %341 = vector.broadcast %cst_92 : f32 to vector<16x1xf32>
    %342 = arith.addf %338, %341 : vector<16x1xf32>
    %343 = math.sqrt %342 : vector<16x1xf32>
    %344 = vector.broadcast %343 : vector<16x1xf32> to vector<16x32xf32>
    %345 = arith.divf %340, %344 : vector<16x32xf32>
    %346 = vector.broadcast %326 : vector<1x32xf32> to vector<16x32xf32>
    %347 = arith.mulf %345, %346 : vector<16x32xf32>
    %348 = vector.broadcast %327 : vector<1x32xf32> to vector<16x32xf32>
    %349 = arith.addf %347, %348 : vector<16x32xf32>
    %350 = vector.shape_cast %349 : vector<16x32xf32> to vector<2x8x32xf32>
    %c0_93 = arith.constant 0 : index
    %c0_94 = arith.constant 0 : index
    %c0_95 = arith.constant 0 : index
    %351 = vector.load %arg25[%c0_93, %c0_94, %c0_95] : memref<2x8x32xf32, #tpu.memory_space<vmem>>, vector<2x8x32xf32>
    tpu.vector_store %arg25[%c0_93, %c0_94, %c0_95], %350 {strides = array<i32>} : memref<2x8x32xf32, #tpu.memory_space<vmem>>, vector<2x8x32xf32>,
    return
  }
  func.func @transform_0(%arg0: i32) -> (i32, i32, i32) {
    %c0_i32 = arith.constant 0 : i32
    %c0_i32_0 = arith.constant 0 : i32
    %c0_i32_1 = arith.constant 0 : i32
    return %arg0, %c0_i32, %c0_i32_0 : i32, i32, i32
  }
  func.func @transform_1(%arg0: i32) -> (i32, i32, i32) {
    %c0_i32 = arith.constant 0 : i32
    %c0_i32_0 = arith.constant 0 : i32
    %c0_i32_1 = arith.constant 0 : i32
    return %arg0, %c0_i32, %c0_i32_0 : i32, i32, i32
  }
  func.func @transform_2(%arg0: i32) -> (i32, i32, i32, i32) {
    %c0_i32 = arith.constant 0 : i32
    %c0_i32_0 = arith.constant 0 : i32
    %c0_i32_1 = arith.constant 0 : i32
    %c0_i32_2 = arith.constant 0 : i32
    return %arg0, %c0_i32, %c0_i32_0, %c0_i32_1 : i32, i32, i32, i32
  }
  func.func @transform_3(%arg0: i32) -> (i32, i32, i32, i32) {
    %c0_i32 = arith.constant 0 : i32
    %c0_i32_0 = arith.constant 0 : i32
    %c0_i32_1 = arith.constant 0 : i32
    %c0_i32_2 = arith.constant 0 : i32
    return %arg0, %c0_i32, %c0_i32_0, %c0_i32_1 : i32, i32, i32, i32
  }
  func.func @transform_4(%arg0: i32) -> (i32, i32) {
    %c0_i32 = arith.constant 0 : i32
    %c0_i32_0 = arith.constant 0 : i32
    %c0_i32_1 = arith.constant 0 : i32
    return %c0_i32, %c0_i32_0 : i32, i32
  }
  func.func @transform_5(%arg0: i32) -> (i32, i32) {
    %c0_i32 = arith.constant 0 : i32
    %c0_i32_0 = arith.constant 0 : i32
    %c0_i32_1 = arith.constant 0 : i32
    return %c0_i32, %c0_i32_0 : i32, i32
  }
  func.func @transform_6(%arg0: i32) -> (i32, i32) {
    %c0_i32 = arith.constant 0 : i32
    %c0_i32_0 = arith.constant 0 : i32
    %c0_i32_1 = arith.constant 0 : i32
    return %c0_i32, %c0_i32_0 : i32, i32
  }
  func.func @transform_7(%arg0: i32) -> (i32, i32) {
    %c0_i32 = arith.constant 0 : i32
    %c0_i32_0 = arith.constant 0 : i32
    %c0_i32_1 = arith.constant 0 : i32
    return %c0_i32, %c0_i32_0 : i32, i32
  }
  func.func @transform_8(%arg0: i32) -> (i32, i32) {
    %c0_i32 = arith.constant 0 : i32
    %c0_i32_0 = arith.constant 0 : i32
    %c0_i32_1 = arith.constant 0 : i32
    return %c0_i32, %c0_i32_0 : i32, i32
  }
  func.func @transform_9(%arg0: i32) -> (i32, i32) {
    %c0_i32 = arith.constant 0 : i32
    %c0_i32_0 = arith.constant 0 : i32
    %c0_i32_1 = arith.constant 0 : i32
    return %c0_i32, %c0_i32_0 : i32, i32
  }
  func.func @transform_10(%arg0: i32) -> (i32, i32) {
    %c0_i32 = arith.constant 0 : i32
    %c0_i32_0 = arith.constant 0 : i32
    %c0_i32_1 = arith.constant 0 : i32
    return %c0_i32, %c0_i32_0 : i32, i32
  }
  func.func @transform_11(%arg0: i32) -> (i32, i32) {
    %c0_i32 = arith.constant 0 : i32
    %c0_i32_0 = arith.constant 0 : i32
    %c0_i32_1 = arith.constant 0 : i32
    return %c0_i32, %c0_i32_0 : i32, i32
  }
  func.func @transform_12(%arg0: i32) -> (i32, i32) {
    %c0_i32 = arith.constant 0 : i32
    %c0_i32_0 = arith.constant 0 : i32
    %c0_i32_1 = arith.constant 0 : i32
    return %c0_i32, %c0_i32_0 : i32, i32
  }
  func.func @transform_13(%arg0: i32) -> (i32, i32) {
    %c0_i32 = arith.constant 0 : i32
    %c0_i32_0 = arith.constant 0 : i32
    %c0_i32_1 = arith.constant 0 : i32
    return %c0_i32, %c0_i32_0 : i32, i32
  }
  func.func @transform_14(%arg0: i32) -> (i32, i32) {
    %c0_i32 = arith.constant 0 : i32
    %c0_i32_0 = arith.constant 0 : i32
    %c0_i32_1 = arith.constant 0 : i32
    return %c0_i32, %c0_i32_0 : i32, i32
  }
  func.func @transform_15(%arg0: i32) -> (i32, i32) {
    %c0_i32 = arith.constant 0 : i32
    %c0_i32_0 = arith.constant 0 : i32
    %c0_i32_1 = arith.constant 0 : i32
    return %c0_i32, %c0_i32_0 : i32, i32
  }
  func.func @transform_16(%arg0: i32) -> (i32, i32) {
    %c0_i32 = arith.constant 0 : i32
    %c0_i32_0 = arith.constant 0 : i32
    %c0_i32_1 = arith.constant 0 : i32
    return %c0_i32, %c0_i32_0 : i32, i32
  }
  func.func @transform_17(%arg0: i32) -> (i32, i32) {
    %c0_i32 = arith.constant 0 : i32
    %c0_i32_0 = arith.constant 0 : i32
    %c0_i32_1 = arith.constant 0 : i32
    return %c0_i32, %c0_i32_0 : i32, i32
  }
  func.func @transform_18(%arg0: i32) -> (i32, i32) {
    %c0_i32 = arith.constant 0 : i32
    %c0_i32_0 = arith.constant 0 : i32
    %c0_i32_1 = arith.constant 0 : i32
    return %c0_i32, %c0_i32_0 : i32, i32
  }
  func.func @transform_19(%arg0: i32) -> (i32, i32) {
    %c0_i32 = arith.constant 0 : i32
    %c0_i32_0 = arith.constant 0 : i32
    %c0_i32_1 = arith.constant 0 : i32
    return %c0_i32, %c0_i32_0 : i32, i32
  }
  func.func @transform_20(%arg0: i32) -> (i32, i32) {
    %c0_i32 = arith.constant 0 : i32
    %c0_i32_0 = arith.constant 0 : i32
    %c0_i32_1 = arith.constant 0 : i32
    return %c0_i32, %c0_i32_0 : i32, i32
  }
  func.func @transform_21(%arg0: i32) -> (i32, i32) {
    %c0_i32 = arith.constant 0 : i32
    %c0_i32_0 = arith.constant 0 : i32
    %c0_i32_1 = arith.constant 0 : i32
    return %c0_i32, %c0_i32_0 : i32, i32
  }
  func.func @transform_22(%arg0: i32) -> (i32, i32) {
    %c0_i32 = arith.constant 0 : i32
    %c0_i32_0 = arith.constant 0 : i32
    %c0_i32_1 = arith.constant 0 : i32
    return %c0_i32, %c0_i32_0 : i32, i32
  }
  func.func @transform_23(%arg0: i32) -> (i32, i32) {
    %c0_i32 = arith.constant 0 : i32
    %c0_i32_0 = arith.constant 0 : i32
    %c0_i32_1 = arith.constant 0 : i32
    return %c0_i32, %c0_i32_0 : i32, i32
  }
  func.func @transform_24(%arg0: i32) -> (i32, i32, i32) {
    %c0_i32 = arith.constant 0 : i32
    %c0_i32_0 = arith.constant 0 : i32
    %c0_i32_1 = arith.constant 0 : i32
    return %arg0, %c0_i32, %c0_i32_0 : i32, i32, i32
  }
  func.func @transform_25(%arg0: i32) -> (i32, i32, i32) {
    %c0_i32 = arith.constant 0 : i32
    %c0_i32_0 = arith.constant 0 : i32
    %c0_i32_1 = arith.constant 0 : i32
    return %arg0, %c0_i32, %c0_i32_0 : i32, i32, i32
  }
  func.func @transform_26(%arg0: i32) -> (i32, i32, i32) {
    %c0_i32 = arith.constant 0 : i32
    %c0_i32_0 = arith.constant 0 : i32
    %c0_i32_1 = arith.constant 0 : i32
    return %arg0, %c0_i32, %c0_i32_0 : i32, i32, i32
  }
}

</mosaic_0001>

<bundles_post_ra>
// kernel: tpu_custom_call.1
= control target key start
LH: loop header
LB: loop body
LE: loop exit
PB: predicated region body
PF: predicated region fallthrough
CT: control target
= control target key end

     0   :  { %s6072_s0 = inlined_call_operand.hbm [shape: f32[2,8,32], index: 0, kind: input, shape index: {}]   ;;  %s6073_s1 = inlined_call_operand.hbm [shape: f32[2,8,32], index: 1, kind: input, shape index: {}]   ;;  %s6074_s2 = inlined_call_operand.vmem [shape: f32[2,4,8,8], index: 2, kind: input, shape index: {}]   ;;  %s6075_s3 = inlined_call_operand.hbm [shape: f32[2,4,8,8], index: 3, kind: input, shape index: {}]   ;;  %s6076_s4 = inlined_call_operand.vmem [shape: f32[32,96], index: 4, kind: input, shape index: {}]   ;;  %s6077_s5 = inlined_call_operand.hbm [shape: f32[1,96], index: 5, kind: input, shape index: {}]   ;;  %s6078_s6 = inlined_call_operand.hbm [shape: f32[32,32], index: 6, kind: input, shape index: {}]   ;;  %s6079_s7 = inlined_call_operand.hbm [shape: f32[1,32], index: 7, kind: input, shape index: {}]   ;;  %s6080_s8 = inlined_call_operand.hbm [shape: f32[1,32], index: 8, kind: input, shape index: {}]   ;;  %s6081_s9 = inlined_call_operand.hbm [shape: f32[1,32], index: 9, kind: input, shape index: {}]   ;;  %s6082_s10 = inlined_call_operand.vmem [shape: f32[32,32], index: 10, kind: input, shape index: {}]   ;;  %s6083_s11 = inlined_call_operand.hbm [shape: f32[1,32], index: 11, kind: input, shape index: {}]   ;;  %s6084_s12 = inlined_call_operand.hbm [shape: f32[32,64], index: 12, kind: input, shape index: {}]   ;;  %s6085_s13 = inlined_call_operand.hbm [shape: f32[1,64], index: 13, kind: input, shape index: {}]   ;;  %s6086_s14 = inlined_call_operand.hbm [shape: f32[32,32], index: 14, kind: input, shape index: {}]   ;;  %s6087_s15 = inlined_call_operand.hbm [shape: f32[1,32], index: 15, kind: input, shape index: {}]   ;;  %s6088_s16 = inlined_call_operand.hbm [shape: f32[1,32], index: 16, kind: input, shape index: {}]   ;;  %s6089_s17 = inlined_call_operand.hbm [shape: f32[1,32], index: 17, kind: input, shape index: {}]   ;;  %s6090_s18 = inlined_call_operand.hbm [shape: f32[32,64], index: 18, kind: input, shape index: {}]   ;;  %s6091_s19 = inlined_call_operand.vmem [shape: f32[1,64], index: 19, kind: input, shape index: {}]   ;;  %s6092_s20 = inlined_call_operand.vmem [shape: f32[64,32], index: 20, kind: input, shape index: {}]   ;;  %s6093_s21 = inlined_call_operand.vmem [shape: f32[1,32], index: 21, kind: input, shape index: {}]   ;;  %s6094_s22 = inlined_call_operand.vmem [shape: f32[1,32], index: 22, kind: input, shape index: {}]   ;;  %s6095_s23 = inlined_call_operand.vmem [shape: f32[1,32], index: 23, kind: input, shape index: {}]   ;;  %s6096_s24 = inlined_call_operand.hbm [shape: f32[2,8,32], index: 24, kind: output, shape index: {0}]   ;;  %s6097_s25 = inlined_call_operand.hbm [shape: f32[2,8,32], index: 25, kind: output, shape index: {1}]   ;;  %s6098_s26 = inlined_call_operand.hbm [shape: f32[2,8,32], index: 26, kind: output, shape index: {2}]  }
   0x1   :  { %6115 = sst [smem:[#allocation43_spill]] %s6072_s0 }
   0x2   :  { %6116 = sst [smem:[#allocation44_spill]] %s6073_s1 }
   0x3   :  { %6117 = sst [smem:[#allocation45_spill]] %s6074_s2 }
   0x4   :  { %6118 = sst [smem:[#allocation46_spill]] %s6075_s3 }
   0x5   :  { %6119 = sst [smem:[#allocation47_spill]] %s6076_s4 }
   0x6   :  { %6120 = sst [smem:[#allocation48_spill]] %s6077_s5 }
   0x7   :  { %6121 = sst [smem:[#allocation49_spill]] %s6078_s6 }
   0x8   :  { %6122 = sst [smem:[#allocation50_spill]] %s6079_s7 }
   0x9   :  { %6123 = sst [smem:[#allocation51_spill]] %s6080_s8 }
   0xa   :  { %6124 = sst [smem:[#allocation52_spill]] %s6081_s9 }
   0xb   :  { %6125 = sst [smem:[#allocation53_spill]] %s6082_s10 }
   0xc   :  { %6126 = sst [smem:[#allocation54_spill]] %s6096_s24 }
   0xd   :  { %32 = vsyncpa [#allocation3], 0 }
   0xe   :  { %33 = vsyncpa [#allocation6], 0 }
   0xf   :  { %34 = vsyncpa [#allocation9], 0 }
  0x10   :  { %35 = vsyncpa [#allocation12], 0 }
  0x11   :  { %36 = vsyncpa [#allocation15], 0 }
  0x12   :  { %37 = vsyncpa [#allocation18], 0 }
  0x13   :  { %38 = vsyncpa [#allocation21], 0 }
  0x14   :  { %39 = vsyncpa [#allocation24], 0 }
  0x15   :  { %40 = vsyncpa [#allocation27], 0 }
  0x16   :  { %41 = vsyncpa [#allocation4], 0 }
  0x17   :  { %42 = vsyncpa [#allocation30], 0  ;;  %s5038_s27 = smov [#allocation5]   ;;  %s5039_s7 = smov [#allocation8]  }
  0x18   :  { %s60_s3 = sshll.u32 %s5038_s27, 4  ;;  %s89_s28 = sshll.u32 %s5039_s7, 4  ;;  %s61_s3 = int_to_ptr.vmem [resolvable:$true] %s60_s3  ;;  %s5203_s28 = int_to_ptr.vmem [resolvable:$true] %s89_s28 }
  0x19   :  { %s6127_s29 = sld [smem:[#allocation44_spill]] }
  0x1f   :  { %s4598_s0 = scalar_lea.hbm %s6127_s29, 256 }
  0x20   :  { %p4599_p0 = scmp.ne.s32.totalorder %s6127_s29, %s4598_s0  ;;  %p4602_p1 = scmp.lt.u32.totalorder %s4598_s0, %s6127_s29 }
  0x22   :  { %p4604_p2 = pnand %p4602_p1, %p4599_p0 }
  0x24   :  { %4607 = shalt.err (!%p4604_p2)
}
  0x25   :  { %s4608_s10 = scalar_lea.vmem %s61_s3, 256  ;;  %p4613_p4 = scmp.lt.s32.totalorder %s61_s3, %s61_s3 }
  0x26   :  { %p4609_p3 = scmp.ne.s32.totalorder %s61_s3, %s4608_s10  ;;  %p4614_p5 = scmp.lt.s32.totalorder %s4608_s10, %s4608_s10 }
  0x28   :  { %p4615_p6 = por %p4614_p5, %p4613_p4 }
  0x2a   :  { %p4616_p7 = pnand %p4615_p6, %p4609_p3 }
  0x2c   :  { %4619 = shalt.err (!%p4616_p7)
}
  0x2d   :  { %s6110_s6 = smov 128   ;;  %s6112_s1 = smov 8  }
  0x2e   :  { %66 = dma.hbm_to_vmem [thread:$0]  %s6127_s29, 256, %s61_s3, [#allocation6], %s6110_s6, %s6110_s6, %s6112_s1  }
  0x2f   :  { %s6128_s0 = sld [smem:[#allocation48_spill]] }
  0x35   :  { %s4620_s9 = scalar_lea.hbm %s6128_s0, 16 }
  0x36   :  { %p4621_p8 = scmp.ne.s32.totalorder %s6128_s0, %s4620_s9  ;;  %p4624_p9 = scmp.lt.u32.totalorder %s4620_s9, %s6128_s0 }
  0x38   :  { %p4626_p10 = pnand %p4624_p9, %p4621_p8 }
  0x3a   :  { %4629 = shalt.err (!%p4626_p10)
}
  0x3b   :  { %s4630_s27 = scalar_lea.vmem %s5203_s28, 16  ;;  %s4634_s3 = scalar_lea.vmem %s5203_s28, 32 }
  0x3c   :  { %p4631_p11 = scmp.ne.s32.totalorder %s5203_s28, %s4630_s27  ;;  %p4635_p12 = scmp.lt.s32.totalorder %s5203_s28, %s5203_s28 }
  0x3d   :  { %p4636_p13 = scmp.lt.s32.totalorder %s4634_s3, %s4630_s27 }
  0x3f   :  { %p4637_p0 = por %p4636_p13, %p4635_p12 }
  0x41   :  { %p4638_p1 = pnand %p4637_p0, %p4631_p11 }
  0x43   :  { %4641 = shalt.err (!%p4638_p1)
}
  0x44   :  { %92 = dma.hbm_to_vmem [thread:$0]  %s6128_s0, 16, %s5203_s28, [#allocation9]  }
  0x45   :  { %s5042_s8 = smov [#allocation11]   ;;  %s5043_s9 = smov [#allocation14]  }
  0x46   :  { %s111_s4 = sshll.u32 %s5042_s8, 4  ;;  %s131_s30 = sshll.u32 %s5043_s9, 4  ;;  %s112_s4 = int_to_ptr.vmem [resolvable:$true] %s111_s4  ;;  %s132_s30 = int_to_ptr.vmem [resolvable:$true] %s131_s30 }
  0x47   :  { %s6129_s10 = sld [smem:[#allocation50_spill]] }
  0x4d   :  { %s4642_s6 = scalar_lea.hbm %s6129_s10, 16 }
  0x4e   :  { %p4643_p2 = scmp.ne.s32.totalorder %s6129_s10, %s4642_s6  ;;  %p4646_p3 = scmp.lt.u32.totalorder %s4642_s6, %s6129_s10 }
  0x50   :  { %p4648_p4 = pnand %p4646_p3, %p4643_p2 }
  0x52   :  { %4651 = shalt.err (!%p4648_p4)
}
  0x53   :  { %s4652_s28 = scalar_lea.vmem %s112_s4, 16  ;;  %s4656_s0 = scalar_lea.vmem %s112_s4, 32 }
  0x54   :  { %p4653_p5 = scmp.ne.s32.totalorder %s112_s4, %s4652_s28  ;;  %p4657_p6 = scmp.lt.s32.totalorder %s112_s4, %s112_s4 }
  0x55   :  { %p4658_p7 = scmp.lt.s32.totalorder %s4656_s0, %s4652_s28 }
  0x57   :  { %p4659_p8 = por %p4658_p7, %p4657_p6 }
  0x59   :  { %p4660_p9 = pnand %p4659_p8, %p4653_p5 }
  0x5b   :  { %4663 = shalt.err (!%p4660_p9)
}
  0x5c   :  { %114 = dma.hbm_to_vmem [thread:$0]  %s6129_s10, 16, %s112_s4, [#allocation12]  }
  0x5d   :  { %s6130_s9 = sld [smem:[#allocation52_spill]] }
  0x63   :  { %s4664_s2 = scalar_lea.hbm %s6130_s9, 16 }
  0x64   :  { %p4665_p10 = scmp.ne.s32.totalorder %s6130_s9, %s4664_s2  ;;  %p4668_p11 = scmp.lt.u32.totalorder %s4664_s2, %s6130_s9 }
  0x66   :  { %p4670_p12 = pnand %p4668_p11, %p4665_p10 }
  0x68   :  { %4673 = shalt.err (!%p4670_p12)
}
  0x69   :  { %s4674_s3 = scalar_lea.vmem %s132_s30, 16  ;;  %s4678_s28 = scalar_lea.vmem %s132_s30, 32 }
  0x6a   :  { %p4675_p13 = scmp.ne.s32.totalorder %s132_s30, %s4674_s3  ;;  %p4679_p0 = scmp.lt.s32.totalorder %s132_s30, %s132_s30 }
  0x6b   :  { %p4680_p1 = scmp.lt.s32.totalorder %s4678_s28, %s4674_s3 }
  0x6d   :  { %p4681_p2 = por %p4680_p1, %p4679_p0 }
  0x6f   :  { %p4682_p3 = pnand %p4681_p2, %p4675_p13 }
  0x71   :  { %4685 = shalt.err (!%p4682_p3)
}
  0x72   :  { %134 = dma.hbm_to_vmem [thread:$0]  %s6130_s9, 16, %s132_s30, [#allocation15]  }
  0x73   :  { %s5044_s0 = smov [#allocation17]   ;;  %s5045_s7 = smov [#allocation20]  }
  0x74   :  { %s152_s29 = sshll.u32 %s5044_s0, 4  ;;  %s174_s1 = sshll.u32 %s5045_s7, 4  ;;  %s153_s29 = int_to_ptr.vmem [resolvable:$true] %s152_s29  ;;  %s5262_s1 = int_to_ptr.vmem [resolvable:$true] %s174_s1 }
  0x75   :  { %s4686_s24 = scalar_lea.hbm %s6084_s12, 512 }
  0x76   :  { %p4687_p4 = scmp.ne.s32.totalorder %s6084_s12, %s4686_s24  ;;  %p4690_p5 = scmp.lt.u32.totalorder %s4686_s24, %s6084_s12 }
  0x78   :  { %p4692_p6 = pnand %p4690_p5, %p4687_p4 }
  0x7a   :  { %4695 = shalt.err (!%p4692_p6)
}
  0x7b   :  { %s4696_s30 = scalar_lea.vmem %s153_s29, 512  ;;  %p4701_p8 = scmp.lt.s32.totalorder %s153_s29, %s153_s29 }
  0x7c   :  { %p4697_p7 = scmp.ne.s32.totalorder %s153_s29, %s4696_s30  ;;  %p4702_p9 = scmp.lt.s32.totalorder %s4696_s30, %s4696_s30 }
  0x7e   :  { %p4703_p10 = por %p4702_p9, %p4701_p8 }
  0x80   :  { %p4704_p11 = pnand %p4703_p10, %p4697_p7 }
  0x82   :  { %4707 = shalt.err (!%p4704_p11)
}
  0x83   :  { %s6131_s9 = smov 8   ;;  %s6132_s28 = smov 128  }
  0x84   :  { %158 = dma.hbm_to_vmem [thread:$0]  %s6084_s12, 512, %s153_s29, [#allocation18], %s6132_s28, %s6132_s28, %s6131_s9  }
  0x85   :  { %s4708_s8 = scalar_lea.hbm %s6086_s14, 512 }
  0x86   :  { %p4709_p12 = scmp.ne.s32.totalorder %s6086_s14, %s4708_s8  ;;  %p4712_p13 = scmp.lt.u32.totalorder %s4708_s8, %s6086_s14 }
  0x88   :  { %p4714_p0 = pnand %p4712_p13, %p4709_p12 }
  0x8a   :  { %4717 = shalt.err (!%p4714_p0)
}
  0x8b   :  { %s4718_s27 = scalar_lea.vmem %s5262_s1, 512  ;;  %p4723_p2 = scmp.lt.s32.totalorder %s5262_s1, %s5262_s1 }
  0x8c   :  { %p4719_p1 = scmp.ne.s32.totalorder %s5262_s1, %s4718_s27  ;;  %p4724_p3 = scmp.lt.s32.totalorder %s4718_s27, %s4718_s27 }
  0x8e   :  { %p4725_p4 = por %p4724_p3, %p4723_p2 }
  0x90   :  { %p4726_p5 = pnand %p4725_p4, %p4719_p1 }
  0x92   :  { %4729 = shalt.err (!%p4726_p5)
}
  0x93   :  { %180 = dma.hbm_to_vmem [thread:$0]  %s6086_s14, 512, %s5262_s1, [#allocation21], %s6132_s28, %s6132_s28, %s6131_s9  }
  0x94   :  { %s5046_s3 = smov [#allocation23]   ;;  %s5047_s4 = smov [#allocation2]  }
  0x95   :  { %s197_s30 = sshll.u32 %s5046_s3, 4  ;;  %s48_s10 = sshll.u32 %s5047_s4, 4  ;;  %s198_s30 = int_to_ptr.vmem [resolvable:$true] %s197_s30  ;;  %s5299_s10 = int_to_ptr.vmem [resolvable:$true] %s48_s10 }
  0x96   :  { %s4730_s8 = scalar_lea.hbm %s6088_s16, 16 }
  0x97   :  { %p4731_p6 = scmp.ne.s32.totalorder %s6088_s16, %s4730_s8  ;;  %p4734_p7 = scmp.lt.u32.totalorder %s4730_s8, %s6088_s16 }
  0x99   :  { %p4736_p8 = pnand %p4734_p7, %p4731_p6 }
  0x9b   :  { %4739 = shalt.err (!%p4736_p8)
}
  0x9c   :  { %s4740_s14 = scalar_lea.vmem %s198_s30, 16  ;;  %s4744_s1 = scalar_lea.vmem %s198_s30, 32 }
  0x9d   :  { %p4741_p9 = scmp.ne.s32.totalorder %s198_s30, %s4740_s14  ;;  %p4745_p10 = scmp.lt.s32.totalorder %s198_s30, %s198_s30 }
  0x9e   :  { %p4746_p11 = scmp.lt.s32.totalorder %s4744_s1, %s4740_s14 }
  0xa0   :  { %p4747_p12 = por %p4746_p11, %p4745_p10 }
  0xa2   :  { %p4748_p13 = pnand %p4747_p12, %p4741_p9 }
  0xa4   :  { %4751 = shalt.err (!%p4748_p13)
}
  0xa5   :  { %200 = dma.hbm_to_vmem [thread:$0]  %s6088_s16, 16, %s198_s30, [#allocation24]  }
  0xa6   :  { %s6133_s4 = sld [smem:[#allocation43_spill]] }
  0xac   :  { %s4752_s0 = scalar_lea.hbm %s6133_s4, 256 }
  0xad   :  { %p4753_p0 = scmp.ne.s32.totalorder %s6133_s4, %s4752_s0  ;;  %p4756_p1 = scmp.lt.u32.totalorder %s4752_s0, %s6133_s4 }
  0xaf   :  { %p4758_p2 = pnand %p4756_p1, %p4753_p0 }
  0xb1   :  { %4761 = shalt.err (!%p4758_p2)
}
  0xb2   :  { %s4762_s6 = scalar_lea.vmem %s5299_s10, 256  ;;  %p4767_p4 = scmp.lt.s32.totalorder %s5299_s10, %s5299_s10 }
  0xb3   :  { %p4763_p3 = scmp.ne.s32.totalorder %s5299_s10, %s4762_s6  ;;  %p4768_p5 = scmp.lt.s32.totalorder %s4762_s6, %s4762_s6 }
  0xb5   :  { %p4769_p6 = por %p4768_p5, %p4767_p4 }
  0xb7   :  { %p4770_p7 = pnand %p4769_p6, %p4763_p3 }
  0xb9   :  { %4773 = shalt.err (!%p4770_p7)
}
  0xba   :  { %54 = dma.hbm_to_vmem [thread:$0]  %s6133_s4, 256, %s5299_s10, [#allocation3], %s6132_s28, %s6132_s28, %s6131_s9  }
  0xbb   :  { %s5048_s5 = smov [#allocation7]   ;;  %s5049_s1 = smov [#allocation10]  }
  0xbc   :  { %s74_s14 = sshll.u32 %s5048_s5, 4  ;;  %s98_s27 = sshll.u32 %s5049_s1, 4  ;;  %s75_s14 = int_to_ptr.vmem [resolvable:$true] %s74_s14  ;;  %s5333_s27 = int_to_ptr.vmem [resolvable:$true] %s98_s27 }
  0xbd   :  { %s6134_s3 = sld [smem:[#allocation46_spill]] }
  0xc3   :  { %s4774_s0 = scalar_lea.hbm %s6134_s3, 1024 }
  0xc4   :  { %p4775_p8 = scmp.ne.s32.totalorder %s6134_s3, %s4774_s0  ;;  %p4778_p9 = scmp.lt.u32.totalorder %s4774_s0, %s6134_s3 }
  0xc6   :  { %p4780_p10 = pnand %p4778_p9, %p4775_p8 }
  0xc8   :  { %4783 = shalt.err (!%p4780_p10)
}
  0xc9   :  { %s4784_s10 = scalar_lea.vmem %s75_s14, 1024  ;;  %p4789_p12 = scmp.lt.s32.totalorder %s75_s14, %s75_s14 }
  0xca   :  { %p4785_p11 = scmp.ne.s32.totalorder %s75_s14, %s4784_s10  ;;  %p4790_p13 = scmp.lt.s32.totalorder %s4784_s10, %s4784_s10 }
  0xcc   :  { %p4791_p0 = por %p4790_p13, %p4789_p12 }
  0xce   :  { %p4792_p1 = pnand %p4791_p0, %p4785_p11 }
  0xd0   :  { %4795 = shalt.err (!%p4792_p1)
}
  0xd1   :  { %80 = dma.hbm_to_vmem [thread:$0]  %s6134_s3, 1024, %s75_s14, [#allocation6], %s6132_s28, %s6132_s28, %s6131_s9  }
  0xd2   :  { %s6135_s5 = sld [smem:[#allocation49_spill]] }
  0xd8   :  { %s4796_s1 = scalar_lea.hbm %s6135_s5, 512 }
  0xd9   :  { %p4797_p2 = scmp.ne.s32.totalorder %s6135_s5, %s4796_s1  ;;  %p4800_p3 = scmp.lt.u32.totalorder %s4796_s1, %s6135_s5 }
  0xdb   :  { %p4802_p4 = pnand %p4800_p3, %p4797_p2 }
  0xdd   :  { %4805 = shalt.err (!%p4802_p4)
}
  0xde   :  { %s4806_s8 = scalar_lea.vmem %s5333_s27, 512  ;;  %p4811_p6 = scmp.lt.s32.totalorder %s5333_s27, %s5333_s27 }
  0xdf   :  { %p4807_p5 = scmp.ne.s32.totalorder %s5333_s27, %s4806_s8  ;;  %p4812_p7 = scmp.lt.s32.totalorder %s4806_s8, %s4806_s8 }
  0xe1   :  { %p4813_p8 = por %p4812_p7, %p4811_p6 }
  0xe3   :  { %p4814_p9 = pnand %p4813_p8, %p4807_p5 }
  0xe5   :  { %4817 = shalt.err (!%p4814_p9)
}
  0xe6   :  { %104 = dma.hbm_to_vmem [thread:$0]  %s6135_s5, 512, %s5333_s27, [#allocation9], %s6132_s28, %s6132_s28, %s6131_s9  }
  0xe7   :  { %s5050_s2 = smov [#allocation13]   ;;  %s5051_s10 = smov [#allocation16]  }
  0xe8   :  { %s121_s24 = sshll.u32 %s5050_s2, 4  ;;  %s143_s4 = sshll.u32 %s5051_s10, 4  ;;  %s122_s24 = int_to_ptr.vmem [resolvable:$true] %s121_s24  ;;  %s144_s4 = int_to_ptr.vmem [resolvable:$true] %s143_s4 }
  0xe9   :  { %s6136_s30 = sld [smem:[#allocation51_spill]] }
  0xef   :  { %s4818_s1 = scalar_lea.hbm %s6136_s30, 16 }
  0xf0   :  { %p4819_p10 = scmp.ne.s32.totalorder %s6136_s30, %s4818_s1  ;;  %p4822_p11 = scmp.lt.u32.totalorder %s4818_s1, %s6136_s30 }
  0xf2   :  { %p4824_p12 = pnand %p4822_p11, %p4819_p10 }
  0xf4   :  { %4827 = shalt.err (!%p4824_p12)
}
  0xf5   :  { %s4828_s27 = scalar_lea.vmem %s122_s24, 16  ;;  %s4832_s5 = scalar_lea.vmem %s122_s24, 32 }
  0xf6   :  { %p4829_p13 = scmp.ne.s32.totalorder %s122_s24, %s4828_s27  ;;  %p4833_p0 = scmp.lt.s32.totalorder %s122_s24, %s122_s24 }
  0xf7   :  { %p4834_p1 = scmp.lt.s32.totalorder %s4832_s5, %s4828_s27 }
  0xf9   :  { %p4835_p2 = por %p4834_p1, %p4833_p0 }
  0xfb   :  { %p4836_p3 = pnand %p4835_p2, %p4829_p13 }
  0xfd   :  { %4839 = shalt.err (!%p4836_p3)
}
  0xfe   :  { %124 = dma.hbm_to_vmem [thread:$0]  %s6136_s30, 16, %s122_s24, [#allocation12]  }
  0xff   :  { %s4840_s10 = scalar_lea.hbm %s6083_s11, 16 }
 0x100   :  { %p4841_p4 = scmp.ne.s32.totalorder %s6083_s11, %s4840_s10  ;;  %p4844_p5 = scmp.lt.u32.totalorder %s4840_s10, %s6083_s11 }
 0x102   :  { %p4846_p6 = pnand %p4844_p5, %p4841_p4 }
 0x104   :  { %4849 = shalt.err (!%p4846_p6)
}
 0x105   :  { %s4850_s29 = scalar_lea.vmem %s144_s4, 16  ;;  %s4854_s0 = scalar_lea.vmem %s144_s4, 32 }
 0x106   :  { %p4851_p7 = scmp.ne.s32.totalorder %s144_s4, %s4850_s29  ;;  %p4855_p8 = scmp.lt.s32.totalorder %s144_s4, %s144_s4 }
 0x107   :  { %p4856_p9 = scmp.lt.s32.totalorder %s4854_s0, %s4850_s29 }
 0x109   :  { %p4857_p10 = por %p4856_p9, %p4855_p8 }
 0x10b   :  { %p4858_p11 = pnand %p4857_p10, %p4851_p7 }
 0x10d   :  { %4861 = shalt.err (!%p4858_p11)
}
 0x10e   :  { %146 = dma.hbm_to_vmem [thread:$0]  %s6083_s11, 16, %s144_s4, [#allocation15]  }
 0x10f   :  { %s5052_s7 = smov [#allocation19]   ;;  %s5053_s5 = smov [#allocation22]  }
 0x110   :  { %s165_s27 = sshll.u32 %s5052_s7, 4  ;;  %s187_s8 = sshll.u32 %s5053_s5, 4  ;;  %s166_s27 = int_to_ptr.vmem [resolvable:$true] %s165_s27  ;;  %s188_s8 = int_to_ptr.vmem [resolvable:$true] %s187_s8 }
 0x111   :  { %s4862_s2 = scalar_lea.hbm %s6085_s13, 16 }
 0x112   :  { %p4863_p12 = scmp.ne.s32.totalorder %s6085_s13, %s4862_s2  ;;  %p4866_p13 = scmp.lt.u32.totalorder %s4862_s2, %s6085_s13 }
 0x114   :  { %p4868_p0 = pnand %p4866_p13, %p4863_p12 }
 0x116   :  { %4871 = shalt.err (!%p4868_p0)
}
 0x117   :  { %s4872_s11 = scalar_lea.vmem %s166_s27, 16  ;;  %s4876_s4 = scalar_lea.vmem %s166_s27, 32 }
 0x118   :  { %p4873_p1 = scmp.ne.s32.totalorder %s166_s27, %s4872_s11  ;;  %p4877_p2 = scmp.lt.s32.totalorder %s166_s27, %s166_s27 }
 0x119   :  { %p4878_p3 = scmp.lt.s32.totalorder %s4876_s4, %s4872_s11 }
 0x11b   :  { %p4879_p4 = por %p4878_p3, %p4877_p2 }
 0x11d   :  { %p4880_p5 = pnand %p4879_p4, %p4873_p1 }
 0x11f   :  { %4883 = shalt.err (!%p4880_p5)
}
 0x120   :  { %168 = dma.hbm_to_vmem [thread:$0]  %s6085_s13, 16, %s166_s27, [#allocation18]  }
 0x121   :  { %s4884_s30 = scalar_lea.hbm %s6087_s15, 16 }
 0x122   :  { %p4885_p6 = scmp.ne.s32.totalorder %s6087_s15, %s4884_s30  ;;  %p4888_p7 = scmp.lt.u32.totalorder %s4884_s30, %s6087_s15 }
 0x124   :  { %p4890_p8 = pnand %p4888_p7, %p4885_p6 }
 0x126   :  { %4893 = shalt.err (!%p4890_p8)
}
 0x127   :  { %s4894_s2 = scalar_lea.vmem %s188_s8, 16  ;;  %s4898_s10 = scalar_lea.vmem %s188_s8, 32 }
 0x128   :  { %p4895_p9 = scmp.ne.s32.totalorder %s188_s8, %s4894_s2  ;;  %p4899_p10 = scmp.lt.s32.totalorder %s188_s8, %s188_s8 }
 0x129   :  { %p4900_p11 = scmp.lt.s32.totalorder %s4898_s10, %s4894_s2 }
 0x12b   :  { %p4901_p12 = por %p4900_p11, %p4899_p10 }
 0x12d   :  { %p4902_p13 = pnand %p4901_p12, %p4895_p9 }
 0x12f   :  { %4905 = shalt.err (!%p4902_p13)
}
 0x130   :  { %190 = dma.hbm_to_vmem [thread:$0]  %s6087_s15, 16, %s188_s8, [#allocation21]  }
 0x131   :  { %s5054_s6 = smov [#allocation25]   ;;  %s5055_s1 = smov [#allocation26]  }
 0x132   :  { %s207_s16 = sshll.u32 %s5054_s6, 4  ;;  %s216_s11 = sshll.u32 %s5055_s1, 4  ;;  %s208_s16 = int_to_ptr.vmem [resolvable:$true] %s207_s16  ;;  %s5418_s11 = int_to_ptr.vmem [resolvable:$true] %s216_s11 }
 0x133   :  { %s4906_s29 = scalar_lea.hbm %s6089_s17, 16 }
 0x134   :  { %p4907_p0 = scmp.ne.s32.totalorder %s6089_s17, %s4906_s29  ;;  %p4910_p1 = scmp.lt.u32.totalorder %s4906_s29, %s6089_s17 }
 0x136   :  { %p4912_p2 = pnand %p4910_p1, %p4907_p0 }
 0x138   :  { %4915 = shalt.err (!%p4912_p2)
}
 0x139   :  { %s4916_s15 = scalar_lea.vmem %s208_s16, 16  ;;  %s4920_s8 = scalar_lea.vmem %s208_s16, 32 }
 0x13a   :  { %p4917_p3 = scmp.ne.s32.totalorder %s208_s16, %s4916_s15  ;;  %p4921_p4 = scmp.lt.s32.totalorder %s208_s16, %s208_s16 }
 0x13b   :  { %p4922_p5 = scmp.lt.s32.totalorder %s4920_s8, %s4916_s15 }
 0x13d   :  { %p4923_p6 = por %p4922_p5, %p4921_p4 }
 0x13f   :  { %p4924_p7 = pnand %p4923_p6, %p4917_p3 }
 0x141   :  { %4927 = shalt.err (!%p4924_p7)
}
 0x142   :  { %210 = dma.hbm_to_vmem [thread:$0]  %s6089_s17, 16, %s208_s16, [#allocation24]  }
 0x143   :  { %s4928_s10 = scalar_lea.hbm %s6090_s18, 512 }
 0x144   :  { %p4929_p8 = scmp.ne.s32.totalorder %s6090_s18, %s4928_s10  ;;  %p4932_p9 = scmp.lt.u32.totalorder %s4928_s10, %s6090_s18 }
 0x146   :  { %p4934_p10 = pnand %p4932_p9, %p4929_p8 }
 0x148   :  { %4937 = shalt.err (!%p4934_p10)
}
 0x149   :  { %s4938_s4 = scalar_lea.vmem %s5418_s11, 512  ;;  %p4943_p12 = scmp.lt.s32.totalorder %s5418_s11, %s5418_s11 }
 0x14a   :  { %p4939_p11 = scmp.ne.s32.totalorder %s5418_s11, %s4938_s4  ;;  %p4944_p13 = scmp.lt.s32.totalorder %s4938_s4, %s4938_s4 }
 0x14c   :  { %p4945_p0 = por %p4944_p13, %p4943_p12 }
 0x14e   :  { %p4946_p1 = pnand %p4945_p0, %p4939_p11 }
 0x150   :  { %4949 = shalt.err (!%p4946_p1)
}
 0x151   :  { %222 = dma.hbm_to_vmem [thread:$0]  %s6090_s18, 512, %s5418_s11, [#allocation27], %s6132_s28, %s6132_s28, %s6131_s9  }
 0x152   :  { %5016 = dma.done.wait [#allocation3], 256  }
 0x153   :  { %5017 = vsyncadd [#allocation3], 4294967040 }
 0x154   :  { %5018 = dma.done.wait [#allocation6], 1280  }
 0x155   :  { %5019 = vsyncadd [#allocation6], 4294966016 }
 0x156   :  { %5020 = dma.done.wait [#allocation9], 528  }
 0x157   :  { %5021 = vsyncadd [#allocation9], 4294966768 }
 0x158   :  { %5022 = dma.done.wait [#allocation12], 32  }
 0x159   :  { %5023 = vsyncadd [#allocation12], 4294967264 }
 0x15a   :  { %5024 = dma.done.wait [#allocation15], 32  }
 0x15b   :  { %5025 = vsyncadd [#allocation15], 4294967264 }
 0x15c   :  { %5026 = dma.done.wait [#allocation18], 528  }
 0x15d   :  { %5027 = vsyncadd [#allocation18], 4294966768 }
 0x15e   :  { %5028 = dma.done.wait [#allocation21], 528  }
 0x15f   :  { %5029 = vsyncadd [#allocation21], 4294966768 }
 0x160   :  { %5030 = dma.done.wait [#allocation24], 32  }
 0x161   :  { %5031 = vsyncadd [#allocation24], 4294967264 }
 0x162   :  { %5032 = dma.done.wait [#allocation27], 512  }
 0x163   :  { %5033 = vsyncadd [#allocation27], 4294966784  ;;  %vm296_vm0 = vcmask 261120   ;;  %s6137_s12 = sld [smem:[#allocation47_spill]]  ;;  %v5464_v5 = vld [vmem:[#allocation2] sm:$0xff]  ;;  %v5468_v7 = vld [vmem:[#allocation2 + $0x8] sm:$0xff] }
 0x164   :  { %4175 = vmatprep.mubr.msk.f32.mxu1 %vm296_vm0, %v5464_v5  ;;  %v3982_v8 = vld [vmem:[#allocation8] ss:$0 sm:$0xff]  ;;  %v5056_v10 = vmov 0.0   ;;  %s5057_s8 = smov 104   ;;  %s5058_s5 = smov 120   ;;  %vm5059_vm1 = vmmov 0  }
 0x165   :  { %4188 = vmatprep.subr.mxu0 %v5056_v10  ;;  %4190 = vmatprep.mubr.msk.f32.mxu0 %vm5059_vm1, %v5056_v10  ;;  %s5060_s14 = smov 112   ;;  %s5061_s3 = smov 96   ;;  %vm402_vm2 = vcmask 64512   ;;  %vm1731_vm3 = vcmask 130048   ;;  %vm1733_vm4 = vcmask 195584   ;;  %vm3782_vm13 = vcmask 523264  }
 0x166   :  { %s6138_s13 = sld [smem:[#allocation45_spill]]  ;;  %s5062_s15 = smov 64  }
 0x167   :  { %s5063_s2 = smov 16   ;;  %s5064_s10 = smov 24  }
 0x168   :  { %s6139_s6 = sld [smem:[#allocation53_spill]] }
 0x169   :  { %v285_v0 = vld [vmem:[%s6137_s12] sm:$0xff]  ;;  %v286_v1 = vld [vmem:[%s6137_s12 + $0x8] sm:$0xff]  ;;  %v287_v2 = vld [vmem:[%s6137_s12 + $0x10] sm:$0xff] }
 0x16a   :  { %v4412_v3 = vpack.c.bf16 %v286_v1, %v285_v0  ;;  %v288_v4 = vld [vmem:[%s6137_s12 + $0x18] sm:$0xff] }
 0x16b   :  { %v4416_v6 = vpack.c.bf16 %v288_v4, %v287_v2 }
 0x16c   :  { %4413 = vmatprep.subr.bf16.mxu1 %v4412_v3  ;;  %v392_v29 = vld [vmem:[%s6138_s13] sm:$0xff]  ;;  %v393_v35 = vld [vmem:[%s6138_s13 + $0x8] sm:$0xff]  ;;  %v394_v41 = vld [vmem:[%s6138_s13 + $0x10] sm:$0xff] }
 0x16d   :  { %4415 = vmatpush3.bf16.msra.mxu1 %v4412_v3  ;;  %v395_v48 = vld [vmem:[%s6138_s13 + $0x18] sm:$0xff]  ;;  %v396_v51 = vld [vmem:[%s6138_s13 + $0x20] sm:$0xff]  ;;  %v397_v59 = vld [vmem:[%s6138_s13 + $0x28] sm:$0xff] }
 0x16e   :  { %4417 = vmatprep.subr.bf16.mxu1 %v4416_v6  ;;  %v398_v62 = vld [vmem:[%s6138_s13 + $0x30] sm:$0xff] }
 0x171   :  { %4419 = vmatpush3.bf16.msra.mxu1 %v4416_v6 }
 0x172   :  { %4178 = vmatprep.subr.mxu1 %v5056_v10 }
 0x174   :  { %4176 = vmatmul.mubr.msk.f32.vlgmr.msra.gmra.mrb[0].mxu1 %vm296_vm0, %v5468_v7 }
 0x175   :  { %4180 = vmatprep.mubr.msk.f32.mxu1 %vm5059_vm1, %v5056_v10 }
 0x247   :  { %v4177_v9 = vpop.f32.mrb[0].mxu1 }
 0x248   :  { %v369_v11 = vpop.f32.mrb[1].mxu1  ;;  %v5484_v13 = vadd.f32 %v4177_v9, %v3982_v8  ;;  %v399_v9 = vld [vmem:[%s6138_s13 + $0x38] sm:$0xff] }
 0x249   :  { %v5474_v12 = vadd.f32 %v3982_v8, %v369_v11 }
 0x24b   :  { %383 = vrot.lane.b32.xlu1 %v5474_v12, %s5057_s8  ;;  %379 = vrot.lane.b32.xlu0 %v5474_v12, %s5058_s5 }
 0x24f   :  { %386 = vrot.lane.b32.xlu1 %v5484_v13, %s5058_s5  ;;  %381 = vrot.lane.b32.xlu0 %v5474_v12, %s5060_s14 }
 0x253   :  { %390 = vrot.lane.b32.xlu1 %v5484_v13, %s5057_s8  ;;  %388 = vrot.lane.b32.xlu0 %v5484_v13, %s5060_s14 }
 0x257   :  { %400 = vrot.lane.b32.xlu0 %v5474_v12, %s5061_s3 }
 0x2bd   :  { %v5496_v14 = vpop.permute.xlu1 %383  ;;  %v5498_v15 = vpop.permute.xlu0 %379 }
 0x2be   :  { %477 = vrot.lane.b32.xlu1 %v5498_v15, %s5061_s3 }
 0x2c1   :  { %v5502_v16 = vpop.permute.xlu0 %381  ;;  %v5508_v17 = vpop.permute.xlu1 %386 }
 0x2c2   :  { %629 = vrot.lane.b32.xlu1 %v5496_v14, %s5061_s3  ;;  %553 = vrot.lane.b32.xlu0 %v5502_v16, %s5061_s3 }
 0x2c5   :  { %v5510_v18 = vpop.permute.xlu0 %388  ;;  %v5516_v19 = vpop.permute.xlu1 %390 }
 0x2c6   :  { %781 = vrot.lane.b32.xlu1 %v5508_v17, %s5061_s3  ;;  %705 = vrot.lane.b32.xlu0 %v5484_v13, %s5061_s3 }
 0x2c9   :  { %v401_v20 = vpop.permute.xlu0 %400 }
 0x2ca   :  { %933 = vrot.lane.b32.xlu1 %v5516_v19, %s5061_s3  ;;  %857 = vrot.lane.b32.xlu0 %v5510_v18, %s5061_s3 }
 0x2cb   :  { %4179 = vmatpush3.xpose.msk.msra.mxu1 %vm402_vm2, %v401_v20 }
 0x2cc   :  { %4183 = vmatprep.subr.mxu1 %v5056_v10 }
 0x2ce   :  { %4181 = vmatmul.mubr.msk.f32.vlgmr.msra.gmra.mrb[2].mxu1 %vm402_vm2, %v5474_v12 }
 0x2cf   :  { %4185 = vmatprep.mubr.msk.f32.mxu1 %vm5059_vm1, %v5056_v10 }
 0x330   :  { %v478_v21 = vpop.permute.xlu1 %477 }
 0x331   :  { %4184 = vmatpush3.xpose.msk.msra.mxu1 %vm402_vm2, %v478_v21 }
 0x332   :  { %4193 = vmatprep.subr.mxu1 %v5056_v10 }
 0x334   :  { %v630_v22 = vpop.permute.xlu1 %629  ;;  %4186 = vmatmul.mubr.msk.f32.vlgmr.msra.gmra.mrb[4].mxu1 %vm402_vm2, %v5498_v15  ;;  %v554_v23 = vpop.permute.xlu0 %553 }
 0x335   :  { %4189 = vmatpush3.xpose.msk.msra.mxu0 %vm402_vm2, %v554_v23  ;;  %4194 = vmatpush3.xpose.msk.msra.mxu1 %vm402_vm2, %v630_v22 }
 0x336   :  { %4195 = vmatprep.mubr.msk.f32.mxu1 %vm5059_vm1, %v5056_v10  ;;  %4198 = vmatprep.subr.mxu0 %v5056_v10 }
 0x337   :  { %4203 = vmatprep.subr.mxu1 %v5056_v10 }
 0x338   :  { %v782_v24 = vpop.permute.xlu1 %781  ;;  %4191 = vmatmul.mubr.msk.f32.vlgmr.msra.gmra.mrb[0].mxu0 %vm402_vm2, %v5502_v16  ;;  %4196 = vmatmul.mubr.msk.f32.vlgmr.msra.gmra.mrb[6].mxu1 %vm402_vm2, %v5496_v14  ;;  %v706_v25 = vpop.permute.xlu0 %705 }
 0x339   :  { %4199 = vmatpush3.xpose.msk.msra.mxu0 %vm402_vm2, %v706_v25  ;;  %4204 = vmatpush3.xpose.msk.msra.mxu1 %vm402_vm2, %v782_v24 }
 0x33a   :  { %4200 = vmatprep.mubr.msk.f32.mxu0 %vm5059_vm1, %v5056_v10  ;;  %4205 = vmatprep.mubr.msk.f32.mxu1 %vm5059_vm1, %v5056_v10 }
 0x33b   :  { %4208 = vmatprep.subr.mxu0 %v5056_v10  ;;  %4213 = vmatprep.subr.mxu1 %v5056_v10 }
 0x33c   :  { %v934_v26 = vpop.permute.xlu1 %933  ;;  %4201 = vmatmul.mubr.msk.f32.vlgmr.msra.gmra.mrb[2].mxu0 %vm402_vm2, %v5484_v13  ;;  %4206 = vmatmul.mubr.msk.f32.vlgmr.msra.gmra.mrb[8].mxu1 %vm402_vm2, %v5508_v17  ;;  %v858_v27 = vpop.permute.xlu0 %857 }
 0x33d   :  { %4209 = vmatpush3.xpose.msk.msra.mxu0 %vm402_vm2, %v858_v27  ;;  %4214 = vmatpush3.xpose.msk.msra.mxu1 %vm402_vm2, %v934_v26 }
 0x33e   :  { %4210 = vmatprep.mubr.msk.f32.mxu0 %vm5059_vm1, %v5056_v10  ;;  %4215 = vmatprep.mubr.msk.f32.mxu1 %vm5059_vm1, %v5056_v10 }
 0x33f   :  { %4218 = vmatprep.subr.mxu0 %v5056_v10  ;;  %4223 = vmatprep.subr.mxu1 %v5056_v10 }
 0x340   :  { %4211 = vmatmul.mubr.msk.f32.vlgmr.msra.gmra.mrb[4].mxu0 %vm402_vm2, %v5510_v18  ;;  %4216 = vmatmul.mubr.msk.f32.vlgmr.msra.gmra.mrb[10].mxu1 %vm402_vm2, %v5516_v19 }
 0x341   :  { %4220 = vmatprep.mubr.msk.f32.mxu0 %vm5059_vm1, %v5056_v10  ;;  %4225 = vmatprep.mubr.msk.f32.mxu1 %vm5059_vm1, %v5056_v10 }
 0x3a1   :  { %v473_v28 = vpop.f32.mrb[2].mxu1 }
 0x3a2   :  { %v1009_v30 = vmul.f32 0.35355338, %v473_v28  ;;  %v4182_v31 = vpop.f32.mrb[3].mxu1 }
 0x3a4   :  { %v1017_v32 = vadd.f32 %v1009_v30, %v392_v29 }
 0x3a6   :  { %v1025_v33 = vsel %vm402_vm2, %v1017_v32, -inf }
 0x3a7   :  { %1026 = vmax.xlane.f32.xlu0 %v1025_v33 }
 0x407   :  { %v549_v34 = vpop.f32.mrb[4].mxu1 }
 0x408   :  { %v1010_v36 = vmul.f32 0.35355338, %v549_v34  ;;  %v4187_v37 = vpop.f32.mrb[5].mxu1 }
 0x40a   :  { %v1018_v38 = vadd.f32 %v1010_v36, %v393_v35 }
 0x40b   :  { %v625_v39 = vpop.f32.mrb[0].mxu0  ;;  %v701_v40 = vpop.f32.mrb[6].mxu1 }
 0x40c   :  { %v1011_v42 = vmul.f32 0.35355338, %v625_v39  ;;  %v4192_v43 = vpop.f32.mrb[1].mxu0  ;;  %v4197_v44 = vpop.f32.mrb[7].mxu1  ;;  %v1012_v45 = vmul.f32 0.35355338, %v701_v40 }
 0x40d   :  { %v1028_v46 = vsel %vm402_vm2, %v1018_v38, -inf }
 0x40e   :  { %1029 = vmax.xlane.f32.xlu1 %v1028_v46  ;;  %v1019_v47 = vadd.f32 %v1011_v42, %v394_v41  ;;  %v1020_v57 = vadd.f32 %v1012_v45, %v395_v48 }
 0x40f   :  { %v777_v49 = vpop.f32.mrb[2].mxu0  ;;  %v853_v50 = vpop.f32.mrb[8].mxu1 }
 0x410   :  { %v1013_v52 = vmul.f32 0.35355338, %v777_v49  ;;  %v4202_v53 = vpop.f32.mrb[3].mxu0  ;;  %v4207_v54 = vpop.f32.mrb[9].mxu1  ;;  %v1014_v55 = vmul.f32 0.35355338, %v853_v50 }
 0x411   :  { %v1031_v56 = vsel %vm402_vm2, %v1019_v47, -inf  ;;  %v1034_v3 = vsel %vm402_vm2, %v1020_v57, -inf }
 0x412   :  { %1032 = vmax.xlane.f32.xlu0 %v1031_v56  ;;  %v1021_v58 = vadd.f32 %v1013_v52, %v396_v51  ;;  %v1022_v6 = vadd.f32 %v1014_v55, %v397_v59 }
 0x413   :  { %v929_v60 = vpop.f32.mrb[4].mxu0  ;;  %v1005_v61 = vpop.f32.mrb[10].mxu1 }
 0x414   :  { %v1015_v63 = vmul.f32 0.35355338, %v929_v60  ;;  %v4212_v0 = vpop.f32.mrb[5].mxu0  ;;  %v4217_v1 = vpop.f32.mrb[11].mxu1  ;;  %v1016_v2 = vmul.f32 0.35355338, %v1005_v61 }
 0x415   :  { %v1037_v4 = vsel %vm402_vm2, %v1021_v58, -inf  ;;  %v1040_v20 = vsel %vm402_vm2, %v1022_v6, -inf }
 0x416   :  { %1035 = vmax.xlane.f32.xlu0 %v1034_v3  ;;  %1038 = vmax.xlane.f32.xlu1 %v1037_v4  ;;  %v1023_v8 = vadd.f32 %v1015_v63, %v398_v62  ;;  %v1024_v21 = vadd.f32 %v1016_v2, %v399_v9 }
 0x418   :  { %v1043_v11 = vsel %vm402_vm2, %v1023_v8, -inf  ;;  %v1046_v22 = vsel %vm402_vm2, %v1024_v21, -inf }
 0x41a   :  { %1041 = vmax.xlane.f32.xlu0 %v1040_v20  ;;  %1044 = vmax.xlane.f32.xlu1 %v1043_v11 }
 0x41e   :  { %1047 = vmax.xlane.f32.xlu0 %v1046_v22 }
 0x42b   :  { %1113 = vrot.lane.b32.xlu1 %v5474_v12, %s5062_s15 }
 0x42f   :  { %1265 = vrot.lane.b32.xlu1 %v5502_v16, %s5062_s15 }
 0x433   :  { %1341 = vrot.lane.b32.xlu1 %v5496_v14, %s5062_s15 }
 0x434   :  { %1189 = vrot.lane.b32.xlu0 %v5498_v15, %s5062_s15  ;;  %v1027_v23 = vpop.xlane.xlu0 %1026 }
 0x435   :  { %v1049_v24 = vsub.f32 %v1017_v32, %v1027_v23 }
 0x437   :  { %1493 = vrot.lane.b32.xlu1 %v5508_v17, %s5062_s15  ;;  %v1057_v25 = vmul.f32 1.442695, %v1049_v24 }
 0x438   :  { %1417 = vrot.lane.b32.xlu0 %v5484_v13, %s5062_s15 }
 0x439   :  { %4506 = vpow2.f32 %v1057_v25 }
 0x443   :  { %v5614_v12 = vpop.eup %4506 }
 0x444   :  { %v1073_v16 = vsel %vm402_vm2, %v5614_v12, 0.0 }
 0x45b   :  { %1074 = vadd.xlane.f32.xlu1 %v1073_v16 }
 0x49b   :  { %v1030_v14 = vpop.xlane.xlu1 %1029 }
 0x49c   :  { %v1050_v26 = vsub.f32 %v1018_v38, %v1030_v14 }
 0x49e   :  { %v1059_v27 = vmul.f32 1.442695, %v1050_v26 }
 0x49f   :  { %v1033_v15 = vpop.xlane.xlu0 %1032 }
 0x4a0   :  { %4508 = vpow2.f32 %v1059_v27  ;;  %v1051_v28 = vsub.f32 %v1019_v47, %v1033_v15 }
 0x4a2   :  { %v1061_v17 = vmul.f32 1.442695, %v1051_v28 }
 0x4a3   :  { %v1039_v29 = vpop.xlane.xlu1 %1038  ;;  %v1036_v30 = vpop.xlane.xlu0 %1035 }
 0x4a4   :  { %4510 = vpow2.f32 %v1061_v17  ;;  %v1053_v13 = vsub.f32 %v1021_v58, %v1039_v29  ;;  %v1052_v31 = vsub.f32 %v1020_v57, %v1036_v30 }
 0x4a6   :  { %v1065_v32 = vmul.f32 1.442695, %v1053_v13  ;;  %v1063_v33 = vmul.f32 1.442695, %v1052_v31  ;;  %v1779_v13 = vld [vmem:[#allocation10] sm:$0xff]  ;;  %v1780_v31 = vld [vmem:[#allocation10 + $0x8] sm:$0xff] }
 0x4a7   :  { %v1045_v34 = vpop.xlane.xlu1 %1044  ;;  %v1042_v35 = vpop.xlane.xlu0 %1041 }
 0x4a8   :  { %4512 = vpow2.f32 %v1065_v32  ;;  %v1055_v36 = vsub.f32 %v1023_v8, %v1045_v34  ;;  %v1054_v37 = vsub.f32 %v1022_v6, %v1042_v35  ;;  %v4420_v32 = vpack.c.bf16 %v1780_v31, %v1779_v13  ;;  %v1781_v35 = vld [vmem:[#allocation10 + $0x10] sm:$0xff]  ;;  %v2027_v13 = vld [vmem:[#allocation17 + $0x18] sm:$0xff] }
 0x4a9   :  { %4514 = vpow2.f32 %v1063_v33 }
 0x4aa   :  { %v4509_v39 = vpop.eup %4508  ;;  %v1069_v38 = vmul.f32 1.442695, %v1055_v36  ;;  %v1067_v40 = vmul.f32 1.442695, %v1054_v37  ;;  %v1782_v36 = vld [vmem:[#allocation10 + $0x18] sm:$0xff] }
 0x4ab   :  { %v1114_v41 = vpop.permute.xlu1 %1113  ;;  %v1048_v42 = vpop.xlane.xlu0 %1047  ;;  %v1076_v43 = vsel %vm402_vm2, %v4509_v39, 0.0  ;;  %v4424_v37 = vpack.c.bf16 %v1782_v36, %v1781_v35  ;;  %v1933_v35 = vld [vmem:[%s6139_s6 + $0x8] sm:$0xff]  ;;  %v1934_v36 = vld [vmem:[%s6139_s6 + $0x10] sm:$0xff] }
 0x4ac   :  { %4516 = vpow2.f32 %v1069_v38  ;;  %v1056_v44 = vsub.f32 %v1024_v21, %v1048_v42  ;;  %1077 = vadd.xlane.f32.xlu0 %v1076_v43  ;;  %4219 = vmatpush3.msra.mxu0 %v1114_v41 }
 0x4ad   :  { %4518 = vpow2.f32 %v1067_v40  ;;  %4228 = vmatprep.subr.mxu0 %v5056_v10 }
 0x4ae   :  { %v4511_v45 = vpop.eup %4510  ;;  %v1071_v46 = vmul.f32 1.442695, %v1056_v44 }
 0x4af   :  { %v1190_v47 = vpop.permute.xlu0 %1189  ;;  %v1079_v48 = vsel %vm402_vm2, %v4511_v45, 0.0  ;;  %v1266_v59 = vpop.permute.xlu1 %1265 }
 0x4b0   :  { %4520 = vpow2.f32 %v1071_v46  ;;  %1080 = vadd.xlane.f32.xlu1 %v1079_v48  ;;  %4224 = vmatpush3.msra.mxu1 %v1190_v47 }
 0x4b1   :  { %4233 = vmatprep.subr.mxu1 %v5056_v10 }
 0x4b2   :  { %v4513_v49 = vpop.eup %4512 }
 0x4b3   :  { %v4515_v50 = vpop.eup %4514  ;;  %v1085_v51 = vsel %vm402_vm2, %v4513_v49, 0.0  ;;  %v1342_v60 = vpop.permute.xlu1 %1341 }
 0x4b4   :  { %1086 = vadd.xlane.f32.xlu1 %v1085_v51  ;;  %v1082_v52 = vsel %vm402_vm2, %v4515_v50, 0.0 }
 0x4b5   :  { %1083 = vadd.xlane.f32.xlu0 %v1082_v52 }
 0x4b6   :  { %v4517_v53 = vpop.eup %4516 }
 0x4b7   :  { %v4519_v54 = vpop.eup %4518  ;;  %v1091_v55 = vsel %vm402_vm2, %v4517_v53, 0.0  ;;  %v1494_v61 = vpop.permute.xlu1 %1493 }
 0x4b8   :  { %1092 = vadd.xlane.f32.xlu1 %v1091_v55  ;;  %v1088_v56 = vsel %vm402_vm2, %v4519_v54, 0.0 }
 0x4b9   :  { %1089 = vadd.xlane.f32.xlu0 %v1088_v56 }
 0x4ba   :  { %v5626_v57 = vpop.eup %4520 }
 0x4bb   :  { %v1094_v58 = vsel %vm402_vm2, %v5626_v57, 0.0 }
 0x4bd   :  { %1095 = vadd.xlane.f32.xlu0 %v1094_v58 }
 0x4c9   :  { %1645 = vrot.lane.b32.xlu1 %v5516_v19, %s5062_s15  ;;  %v1418_v19 = vpop.permute.xlu0 %1417 }
 0x4d3   :  { %1569 = vrot.lane.b32.xlu0 %v5510_v18, %s5062_s15 }
 0x4e8   :  { %v1075_v62 = vpop.xlane.xlu1 %1074 }
 0x4e9   :  { %4522 = vrcp.f32 %v1075_v62  ;;  %v4009_v62 = vld [vmem:[#allocation11] ss:$0 sm:$0xff] }
 0x4f3   :  { %v4523_v63 = vpop.eup %4522 }
 0x4f4   :  { %v5635_v0 = vmul.f32 %v4523_v63, %v5614_v12 }
 0x4f6   :  { %4221 = vmatmul.mubr.msk.f32.vlgmr.msra.gmra.mrb[6].mxu0 %vm402_vm2, %v5635_v0 }
 0x4f7   :  { %4229 = vmatpush3.msra.mxu0 %v1266_v59  ;;  %4230 = vmatprep.mubr.msk.f32.mxu0 %vm5059_vm1, %v5056_v10 }
 0x4f8   :  { %4238 = vmatprep.subr.mxu0 %v5056_v10 }
 0x539   :  { %v1078_v18 = vpop.xlane.xlu0 %1077 }
 0x53a   :  { %4524 = vrcp.f32 %v1078_v18 }
 0x53d   :  { %v1081_v1 = vpop.xlane.xlu1 %1080 }
 0x53e   :  { %4526 = vrcp.f32 %v1081_v1 }
 0x541   :  { %v1087_v2 = vpop.xlane.xlu1 %1086 }
 0x542   :  { %4528 = vrcp.f32 %v1087_v2  ;;  %v1084_v3 = vpop.xlane.xlu0 %1083 }
 0x543   :  { %4530 = vrcp.f32 %v1084_v3 }
 0x544   :  { %v4525_v4 = vpop.eup %4524 }
 0x545   :  { %v5642_v6 = vmul.f32 %v4525_v4, %v4509_v39  ;;  %v1093_v8 = vpop.xlane.xlu1 %1092 }
 0x546   :  { %4532 = vrcp.f32 %v1093_v8  ;;  %v1090_v9 = vpop.xlane.xlu0 %1089 }
 0x547   :  { %4534 = vrcp.f32 %v1090_v9  ;;  %4226 = vmatmul.mubr.msk.f32.vlgmr.msra.gmra.mrb[12].mxu1 %vm402_vm2, %v5642_v6 }
 0x548   :  { %v4527_v11 = vpop.eup %4526  ;;  %4234 = vmatpush3.msra.mxu1 %v1342_v60  ;;  %4235 = vmatprep.mubr.msk.f32.mxu1 %vm5059_vm1, %v5056_v10 }
 0x549   :  { %v5648_v20 = vmul.f32 %v4527_v11, %v4511_v45  ;;  %4243 = vmatprep.subr.mxu1 %v5056_v10  ;;  %v1646_v15 = vpop.permute.xlu1 %1645 }
 0x54a   :  { %v1096_v21 = vpop.xlane.xlu0 %1095 }
 0x54b   :  { %4536 = vrcp.f32 %v1096_v21  ;;  %4231 = vmatmul.mubr.msk.f32.vlgmr.msra.gmra.mrb[8].mxu0 %vm402_vm2, %v5648_v20 }
 0x54c   :  { %v4529_v22 = vpop.eup %4528  ;;  %4239 = vmatpush3.msra.mxu0 %v1418_v19  ;;  %4240 = vmatprep.mubr.msk.f32.mxu0 %vm5059_vm1, %v5056_v10 }
 0x54d   :  { %v4531_v23 = vpop.eup %4530  ;;  %v5655_v24 = vmul.f32 %v4529_v22, %v4513_v49  ;;  %4248 = vmatprep.subr.mxu0 %v5056_v10 }
 0x54e   :  { %v5658_v25 = vmul.f32 %v4531_v23, %v4515_v50  ;;  %v1570_v12 = vpop.permute.xlu0 %1569 }
 0x54f   :  { %4241 = vmatmul.mubr.msk.f32.vlgmr.msra.gmra.mrb[10].mxu0 %vm402_vm2, %v5655_v24 }
 0x550   :  { %v4533_v16 = vpop.eup %4532  ;;  %4236 = vmatmul.mubr.msk.f32.vlgmr.msra.gmra.mrb[14].mxu1 %vm402_vm2, %v5658_v25  ;;  %4249 = vmatpush3.msra.mxu0 %v1570_v12 }
 0x551   :  { %v4535_v14 = vpop.eup %4534  ;;  %v5664_v26 = vmul.f32 %v4533_v16, %v4517_v53  ;;  %4244 = vmatpush3.msra.mxu1 %v1494_v61  ;;  %4245 = vmatprep.mubr.msk.f32.mxu1 %vm5059_vm1, %v5056_v10 }
 0x552   :  { %v5668_v27 = vmul.f32 %v4535_v14, %v4519_v54  ;;  %4250 = vmatprep.mubr.msk.f32.mxu0 %vm5059_vm1, %v5056_v10  ;;  %4253 = vmatprep.subr.mxu1 %v5056_v10 }
 0x553   :  { %4251 = vmatmul.mubr.msk.f32.vlgmr.msra.gmra.mrb[12].mxu0 %vm402_vm2, %v5664_v26  ;;  %4421 = vmatprep.subr.bf16.mxu0 %v4420_v32 }
 0x554   :  { %4246 = vmatmul.mubr.msk.f32.vlgmr.msra.gmra.mrb[16].mxu1 %vm402_vm2, %v5668_v27  ;;  %4423 = vmatpush3.bf16.msra.mxu0 %v4420_v32  ;;  %v283_v32 = vld [vmem:[#allocation5] sm:$0xff] }
 0x555   :  { %v4537_v28 = vpop.eup %4536  ;;  %4254 = vmatpush3.msra.mxu1 %v1646_v15  ;;  %4255 = vmatprep.mubr.msk.f32.mxu1 %vm5059_vm1, %v5056_v10  ;;  %v2024_v15 = vld [vmem:[#allocation17] sm:$0xff] }
 0x556   :  { %v5680_v17 = vmul.f32 %v4537_v28, %v5626_v57  ;;  %4425 = vmatprep.subr.bf16.mxu0 %v4424_v37  ;;  %v2025_v28 = vld [vmem:[#allocation17 + $0x8] sm:$0xff] }
 0x558   :  { %4256 = vmatmul.mubr.msk.f32.vlgmr.msra.gmra.mrb[18].mxu1 %vm402_vm2, %v5680_v17  ;;  %4427 = vmatpush3.bf16.msra.mxu0 %v4424_v37 }
 0x5c9   :  { %v1185_v29 = vpop.f32.mrb[6].mxu0 }
 0x5ca   :  { %v4222_v30 = vpop.f32.mrb[7].mxu0 }
 0x5cb   :  { %v2026_v30 = vld [vmem:[#allocation17 + $0x10] sm:$0xff] }
 0x5cc   :  { %v4440_v31 = vpack.c.bf16 %v2027_v13, %v2026_v30 }
 0x61a   :  { %v1261_v33 = vpop.f32.mrb[12].mxu1 }
 0x61b   :  { %1750 = vrot.lane.b32.xlu0 %v1261_v33, %s6131_s9  ;;  %v4227_v34 = vpop.f32.mrb[13].mxu1  ;;  %v284_v33 = vld [vmem:[#allocation5 + $0x8] sm:$0xff] }
 0x61c   :  { %v1932_v34 = vld [vmem:[%s6139_s6] sm:$0xff] }
 0x61d   :  { %v4428_v37 = vpack.c.bf16 %v1933_v35, %v1932_v34  ;;  %v2144_v34 = vld [vmem:[#allocation7] sm:$0xff] }
 0x61e   :  { %v1337_v39 = vpop.f32.mrb[8].mxu0 }
 0x61f   :  { %1754 = vrot.lane.b32.xlu1 %v1337_v39, %s5063_s2  ;;  %v4232_v38 = vpop.f32.mrb[9].mxu0  ;;  %v1935_v39 = vld [vmem:[%s6139_s6 + $0x18] sm:$0xff]  ;;  %4429 = vmatprep.subr.bf16.mxu1 %v4428_v37 }
 0x620   :  { %v4432_v38 = vpack.c.bf16 %v1935_v39, %v1934_v36  ;;  %4431 = vmatpush3.bf16.msra.mxu1 %v4428_v37 }
 0x622   :  { %v1489_v40 = vpop.f32.mrb[10].mxu0  ;;  %4433 = vmatprep.subr.bf16.mxu1 %v4432_v38 }
 0x623   :  { %v1413_v41 = vpop.f32.mrb[14].mxu1  ;;  %v4242_v42 = vpop.f32.mrb[11].mxu0 }
 0x624   :  { %1758 = vrot.lane.b32.xlu1 %v1413_v41, %s5064_s10  ;;  %v4237_v43 = vpop.f32.mrb[15].mxu1  ;;  %4435 = vmatpush3.bf16.msra.mxu1 %v4432_v38 }
 0x625   :  { %4291 = vmatprep.subr.mxu1 %v5056_v10 }
 0x626   :  { %v1641_v44 = vpop.f32.mrb[12].mxu0 }
 0x627   :  { %v1565_v45 = vpop.f32.mrb[16].mxu1  ;;  %v4252_v46 = vpop.f32.mrb[13].mxu0 }
 0x628   :  { %1765 = vrot.lane.b32.xlu0 %v1565_v45, %s6131_s9  ;;  %v4247_v47 = vpop.f32.mrb[17].mxu1 }
 0x62b   :  { %v1717_v48 = vpop.f32.mrb[18].mxu1 }
 0x62c   :  { %1773 = vrot.lane.b32.xlu1 %v1717_v48, %s5064_s10  ;;  %v4257_v49 = vpop.f32.mrb[19].mxu1  ;;  %1769 = vrot.lane.b32.xlu0 %v1641_v44, %s5063_s2 }
 0x68d   :  { %v1751_v51 = vpop.permute.xlu0 %1750 }
 0x68e   :  { %v1761_v52 = vsel %vm402_vm2, %v1185_v29, %v1751_v51  ;;  %v4436_v29 = vpack.c.bf16 %v2025_v28, %v2024_v15 }
 0x690   :  { %4437 = vmatprep.subr.bf16.mxu0 %v4436_v29 }
 0x691   :  { %v1755_v50 = vpop.permute.xlu1 %1754 }
 0x692   :  { %v1762_v53 = vsel %vm1731_vm3, %v1761_v52, %v1755_v50 }
 0x696   :  { %v1759_v54 = vpop.permute.xlu1 %1758 }
 0x697   :  { %v1763_v55 = vsel %vm1733_vm4, %v1762_v53, %v1759_v54 }
 0x698   :  { %4266 = vmatprep.mubr.msk.f32.mxu0 %vm296_vm0, %v1763_v55 }
 0x69a   :  { %v1766_v56 = vpop.permute.xlu0 %1765 }
 0x69b   :  { %v1776_v57 = vsel %vm402_vm2, %v1489_v40, %v1766_v56 }
 0x69e   :  { %v1774_v58 = vpop.permute.xlu1 %1773  ;;  %v1770_v59 = vpop.permute.xlu0 %1769 }
 0x69f   :  { %v1777_v60 = vsel %vm1731_vm3, %v1776_v57, %v1770_v59  ;;  %v4012_v57 = vld [vmem:[#allocation13] ss:$0 sm:$0xff]  ;;  %v4013_v59 = vld [vmem:[#allocation14] ss:$0 sm:$0xff] }
 0x6a0   :  { %v1778_v61 = vsel %vm1733_vm4, %v1777_v60, %v1774_v58 }
 0x6a1   :  { %4267 = vmatmul.mubr.msk.f32.vlgmr.msra.gmra.mrb[14].mxu0 %vm296_vm0, %v1778_v61 }
 0x6a2   :  { %4439 = vmatpush3.bf16.msra.mxu0 %v4436_v29  ;;  %4288 = vmatprep.mubr.msk.f32.mxu0 %vm296_vm0, %v283_v32 }
 0x6a3   :  { %4441 = vmatprep.subr.bf16.mxu0 %v4440_v31 }
 0x6a6   :  { %4443 = vmatpush3.bf16.msra.mxu0 %v4440_v31 }
 0x6a7   :  { %4301 = vmatprep.subr.mxu0 %v5056_v10 }
 0x6a9   :  { %4289 = vmatmul.mubr.msk.f32.vlgmr.msra.gmra.mrb[16].mxu0 %vm296_vm0, %v284_v33 }
 0x6aa   :  { %4303 = vmatprep.mubr.msk.f32.mxu0 %vm5059_vm1, %v5056_v10 }
 0x774   :  { %v4268_v63 = vpop.f32.mrb[14].mxu0 }
 0x775   :  { %v1868_v19 = vadd.f32 %v4268_v63, %v4009_v62  ;;  %v1862_v18 = vpop.f32.mrb[15].mxu0 }
 0x776   :  { %v1863_v1 = vadd.f32 %v4009_v62, %v1862_v18 }
 0x777   :  { %v1872_v2 = vadd.f32 %v1868_v19, %v5468_v7 }
 0x778   :  { %v1871_v3 = vadd.f32 %v1863_v1, %v5464_v5  ;;  %v4017_v1 = vld [vmem:[#allocation19] ss:$0 sm:$0xff] }
 0x779   :  { %v1878_v4 = vsel %vm296_vm0, %v1872_v2, 0.0 }
 0x77a   :  { %1879 = vadd.xlane.f32.xlu1 %v1878_v4  ;;  %v1875_v8 = vsel %vm296_vm0, %v1871_v3, 0.0 }
 0x77b   :  { %1876 = vadd.xlane.f32.xlu0 %v1875_v8 }
 0x807   :  { %v1880_v9 = vpop.xlane.xlu1 %1879 }
 0x808   :  { %v1883_v11 = vmul.f32 0.03125, %v1880_v9  ;;  %v1877_v21 = vpop.xlane.xlu0 %1876 }
 0x809   :  { %v1882_v22 = vmul.f32 0.03125, %v1877_v21  ;;  %v4014_v21 = vld [vmem:[#allocation16] ss:$0 sm:$0xff] }
 0x80a   :  { %v5702_v23 = vsub.f32 %v1872_v2, %v1883_v11  ;;  %v4290_v2 = vpop.f32.mrb[16].mxu0 }
 0x80b   :  { %v1884_v12 = vsub.f32 %v1871_v3, %v1882_v22  ;;  %v5737_v3 = vadd.f32 %v4290_v2, %v4017_v1  ;;  %v2107_v4 = vpop.f32.mrb[17].mxu0 }
 0x80c   :  { %v1887_v7 = vmul.f32 %v5702_v23, %v5702_v23  ;;  %v5739_v8 = vadd.f32 %v4017_v1, %v2107_v4  ;;  %v2149_v1 = vld [vmem:[#allocation7 + $0x28] sm:$0xff] }
 0x80d   :  { %v1886_v16 = vmul.f32 %v1884_v12, %v1884_v12 }
 0x80e   :  { %v1891_v5 = vsel %vm296_vm0, %v1887_v7, 0.0  ;;  %2131 = vrot.lane.b32.xlu1 %v5739_v8, %s5058_s5 }
 0x80f   :  { %v1888_v14 = vsel %vm296_vm0, %v1886_v16, 0.0 }
 0x810   :  { %1889 = vadd.xlane.f32.xlu0 %v1888_v14 }
 0x812   :  { %2133 = vrot.lane.b32.xlu1 %v5739_v8, %s5060_s14 }
 0x814   :  { %1892 = vadd.xlane.f32.xlu0 %v1891_v5 }
 0x816   :  { %2135 = vrot.lane.b32.xlu1 %v5739_v8, %s5057_s8 }
 0x82a   :  { %2138 = vrot.lane.b32.xlu0 %v5737_v3, %s5058_s5 }
 0x880   :  { %v5752_v9 = vpop.permute.xlu1 %2131 }
 0x884   :  { %v5754_v11 = vpop.permute.xlu1 %2133 }
 0x885   :  { %4302 = vmatpush3.xpose.msk.msra.mxu0 %vm402_vm2, %v5754_v11 }
 0x886   :  { %4311 = vmatprep.subr.mxu0 %v5056_v10 }
 0x888   :  { %v5775_v14 = vpop.permute.xlu1 %2135 }
 0x89d   :  { %v1890_v40 = vpop.xlane.xlu0 %1889 }
 0x89e   :  { %v1894_v41 = vmul.f32 0.03125, %v1890_v40  ;;  %v2145_v40 = vld [vmem:[#allocation7 + $0x8] sm:$0xff] }
 0x8a0   :  { %v1896_v42 = vadd.f32 1e-05, %v1894_v41 }
 0x8a1   :  { %v1893_v43 = vpop.xlane.xlu0 %1892 }
 0x8a2   :  { %4538 = vrsqrt.f32 %v1896_v42  ;;  %v1895_v44 = vmul.f32 0.03125, %v1893_v43  ;;  %vm1900_vm5 = vcmp.eq.f32.partialorder %v1896_v42, inf  ;;  %v1903_v48 = vand.u32 2147483648, %v1896_v42 }
 0x8a3   :  { %vm1902_vm6 = vcmp.eq.f32.partialorder %v1896_v42, 0.0 }
 0x8a4   :  { %v1897_v45 = vadd.f32 1e-05, %v1895_v44 }
 0x8a5   :  { %v5777_v7 = vpop.permute.xlu0 %2138 }
 0x8a6   :  { %4540 = vrsqrt.f32 %v1897_v45  ;;  %vm1907_vm7 = vcmp.eq.f32.partialorder %v1897_v45, inf  ;;  %v1910_v53 = vand.u32 2147483648, %v1897_v45  ;;  %vm1909_vm8 = vcmp.eq.f32.partialorder %v1897_v45, 0.0 }
 0x8ac   :  { %v4539_v46 = vpop.eup %4538 }
 0x8ad   :  { %v1899_v47 = vmul.f32 %v4539_v46, %v1896_v42  ;;  %v2146_v46 = vld [vmem:[#allocation7 + $0x10] sm:$0xff] }
 0x8af   :  { %v1901_v49 = vsel %vm1900_vm5, %v1896_v42, %v1899_v47 }
 0x8b0   :  { %v1904_v50 = vsel %vm1902_vm6, %v1903_v48, %v1901_v49  ;;  %v4541_v51 = vpop.eup %4540 }
 0x8b1   :  { %4542 = vrcp.f32 %v1904_v50  ;;  %v1906_v52 = vmul.f32 %v4541_v51, %v1897_v45 }
 0x8b3   :  { %v1908_v54 = vsel %vm1907_vm7, %v1897_v45, %v1906_v52 }
 0x8b4   :  { %v1911_v55 = vsel %vm1909_vm8, %v1910_v53, %v1908_v54  ;;  %v2147_v53 = vld [vmem:[#allocation7 + $0x18] sm:$0xff] }
 0x8b5   :  { %4544 = vrcp.f32 %v1911_v55 }
 0x8bb   :  { %v4543_v56 = vpop.eup %4542 }
 0x8bc   :  { %v1913_v58 = vmul.f32 %v4543_v56, %v1884_v12  ;;  %v2148_v56 = vld [vmem:[#allocation7 + $0x20] sm:$0xff] }
 0x8be   :  { %v1922_v60 = vmul.f32 %v4012_v57, %v1913_v58 }
 0x8bf   :  { %v4545_v61 = vpop.eup %4544 }
 0x8c0   :  { %v5726_v62 = vadd.f32 %v4013_v59, %v1922_v60  ;;  %v1915_v63 = vmul.f32 %v4545_v61, %v5702_v23 }
 0x8c2   :  { %4277 = vmatprep.mubr.msk.f32.mxu1 %vm296_vm0, %v5726_v62  ;;  %v1923_v19 = vmul.f32 %v4012_v57, %v1915_v63 }
 0x8c4   :  { %v5731_v18 = vadd.f32 %v4013_v59, %v1923_v19 }
 0x8c6   :  { %4278 = vmatmul.mubr.msk.f32.vlgmr.msra.gmra.mrb[20].mxu1 %vm296_vm0, %v5731_v18 }
 0x8c7   :  { %4293 = vmatprep.mubr.msk.f32.mxu1 %vm5059_vm1, %v5056_v10  ;;  %4292 = vmatpush3.xpose.msk.msra.mxu1 %vm402_vm2, %v5739_v8 }
 0x8c8   :  { %4296 = vmatprep.subr.mxu1 %v5056_v10 }
 0x999   :  { %v4279_v22 = vpop.f32.mrb[20].mxu1 }
 0x99a   :  { %v2021_v23 = vadd.f32 %v4279_v22, %v4014_v21  ;;  %v2015_v12 = vpop.f32.mrb[21].mxu1 }
 0x99b   :  { %v2016_v16 = vadd.f32 %v4014_v21, %v2015_v12  ;;  %v2150_v21 = vld [vmem:[#allocation7 + $0x30] sm:$0xff] }
 0x99c   :  { %2124 = vrot.lane.b32.xlu1 %v2021_v23, %s5058_s5 }
 0x99d   :  { %2117 = vrot.lane.b32.xlu0 %v2016_v16, %s5058_s5  ;;  %4294 = vmatmul.mubr.msk.f32.vlgmr.msra.gmra.mrb[22].mxu1 %vm402_vm2, %v2016_v16 }
 0x99e   :  { %4297 = vmatpush3.xpose.msk.msra.mxu1 %vm402_vm2, %v5752_v9  ;;  %4298 = vmatprep.mubr.msk.f32.mxu1 %vm5059_vm1, %v5056_v10 }
 0x99f   :  { %4306 = vmatprep.subr.mxu1 %v5056_v10 }
 0x9a0   :  { %2121 = vrot.lane.b32.xlu1 %v2016_v16, %s5057_s8 }
 0x9a1   :  { %2119 = vrot.lane.b32.xlu0 %v2016_v16, %s5060_s14 }
 0x9a4   :  { %2142 = vrot.lane.b32.xlu1 %v5737_v3, %s5057_s8 }
 0x9a5   :  { %2140 = vrot.lane.b32.xlu0 %v5737_v3, %s5060_s14 }
 0x9a8   :  { %2128 = vrot.lane.b32.xlu1 %v2021_v23, %s5057_s8 }
 0x9a9   :  { %2126 = vrot.lane.b32.xlu0 %v2021_v23, %s5060_s14 }
 0xa0e   :  { %v2125_v5 = vpop.permute.xlu1 %2124 }
 0xa0f   :  { %v2118_v15 = vpop.permute.xlu0 %2117 }
 0xa10   :  { %4299 = vmatmul.mubr.msk.f32.vlgmr.msra.gmra.mrb[24].mxu1 %vm402_vm2, %v2118_v15 }
 0xa11   :  { %4307 = vmatpush3.xpose.msk.msra.mxu1 %vm402_vm2, %v5775_v14  ;;  %4308 = vmatprep.mubr.msk.f32.mxu1 %vm5059_vm1, %v5056_v10 }
 0xa12   :  { %v2122_v28 = vpop.permute.xlu1 %2121  ;;  %4316 = vmatprep.subr.mxu1 %v5056_v10 }
 0xa13   :  { %v2120_v29 = vpop.permute.xlu0 %2119 }
 0xa14   :  { %4304 = vmatmul.mubr.msk.f32.vlgmr.msra.gmra.mrb[18].mxu0 %vm402_vm2, %v2120_v29  ;;  %4309 = vmatmul.mubr.msk.f32.vlgmr.msra.gmra.mrb[26].mxu1 %vm402_vm2, %v2122_v28 }
 0xa15   :  { %4312 = vmatpush3.xpose.msk.msra.mxu0 %vm402_vm2, %v5737_v3  ;;  %4317 = vmatpush3.xpose.msk.msra.mxu1 %vm402_vm2, %v5777_v7 }
 0xa16   :  { %v5791_v30 = vpop.permute.xlu1 %2142  ;;  %4313 = vmatprep.mubr.msk.f32.mxu0 %vm5059_vm1, %v5056_v10  ;;  %4318 = vmatprep.mubr.msk.f32.mxu1 %vm5059_vm1, %v5056_v10 }
 0xa17   :  { %4321 = vmatprep.subr.mxu0 %v5056_v10  ;;  %4326 = vmatprep.subr.mxu1 %v5056_v10  ;;  %v5799_v13 = vpop.permute.xlu0 %2140 }
 0xa18   :  { %4314 = vmatmul.mubr.msk.f32.vlgmr.msra.gmra.mrb[20].mxu0 %vm402_vm2, %v2021_v23  ;;  %4319 = vmatmul.mubr.msk.f32.vlgmr.msra.gmra.mrb[28].mxu1 %vm402_vm2, %v2125_v5 }
 0xa19   :  { %4322 = vmatpush3.xpose.msk.msra.mxu0 %vm402_vm2, %v5799_v13  ;;  %4327 = vmatpush3.xpose.msk.msra.mxu1 %vm402_vm2, %v5791_v30 }
 0xa1a   :  { %v2129_v31 = vpop.permute.xlu1 %2128  ;;  %4323 = vmatprep.mubr.msk.f32.mxu0 %vm5059_vm1, %v5056_v10  ;;  %4328 = vmatprep.mubr.msk.f32.mxu1 %vm5059_vm1, %v5056_v10 }
 0xa1b   :  { %v2127_v32 = vpop.permute.xlu0 %2126  ;;  %4331 = vmatprep.subr.mxu0 %v5056_v10  ;;  %4336 = vmatprep.subr.mxu1 %v5056_v10 }
 0xa1c   :  { %4324 = vmatmul.mubr.msk.f32.vlgmr.msra.gmra.mrb[22].mxu0 %vm402_vm2, %v2127_v32  ;;  %4329 = vmatmul.mubr.msk.f32.vlgmr.msra.gmra.mrb[30].mxu1 %vm402_vm2, %v2129_v31  ;;  %v2151_v31 = vld [vmem:[#allocation7 + $0x38] sm:$0xff] }
 0xa1d   :  { %4333 = vmatprep.mubr.msk.f32.mxu0 %vm5059_vm1, %v5056_v10  ;;  %4338 = vmatprep.mubr.msk.f32.mxu1 %vm5059_vm1, %v5056_v10 }
 0xa70   :  { %v2222_v33 = vpop.f32.mrb[22].mxu1 }
 0xa71   :  { %v2744_v35 = vmul.f32 0.35355338, %v2222_v33  ;;  %v4295_v36 = vpop.f32.mrb[23].mxu1 }
 0xa73   :  { %v2752_v37 = vadd.f32 %v2744_v35, %v2144_v34 }
 0xa75   :  { %v2760_v39 = vsel %vm402_vm2, %v2752_v37, -inf }
 0xa76   :  { %2761 = vmax.xlane.f32.xlu0 %v2760_v39 }
 0xae3   :  { %v2296_v38 = vpop.f32.mrb[24].mxu1 }
 0xae4   :  { %v2745_v41 = vmul.f32 0.35355338, %v2296_v38  ;;  %v4300_v42 = vpop.f32.mrb[25].mxu1 }
 0xae6   :  { %v2753_v43 = vadd.f32 %v2745_v41, %v2145_v40 }
 0xae7   :  { %v2370_v44 = vpop.f32.mrb[18].mxu0  ;;  %v2444_v45 = vpop.f32.mrb[26].mxu1 }
 0xae8   :  { %v2746_v47 = vmul.f32 0.35355338, %v2370_v44  ;;  %v4305_v48 = vpop.f32.mrb[19].mxu0  ;;  %v4310_v49 = vpop.f32.mrb[27].mxu1  ;;  %v2747_v50 = vmul.f32 0.35355338, %v2444_v45 }
 0xae9   :  { %v2763_v51 = vsel %vm402_vm2, %v2753_v43, -inf }
 0xaea   :  { %2764 = vmax.xlane.f32.xlu1 %v2763_v51  ;;  %v2754_v52 = vadd.f32 %v2746_v47, %v2146_v46  ;;  %v2755_v63 = vadd.f32 %v2747_v50, %v2147_v53 }
 0xaeb   :  { %v2518_v54 = vpop.f32.mrb[20].mxu0  ;;  %v2592_v55 = vpop.f32.mrb[28].mxu1 }
 0xaec   :  { %v2748_v57 = vmul.f32 0.35355338, %v2518_v54  ;;  %v4315_v58 = vpop.f32.mrb[21].mxu0  ;;  %v4320_v59 = vpop.f32.mrb[29].mxu1  ;;  %v2749_v60 = vmul.f32 0.35355338, %v2592_v55 }
 0xaed   :  { %v2766_v61 = vsel %vm402_vm2, %v2754_v52, -inf  ;;  %v2769_v5 = vsel %vm402_vm2, %v2755_v63, -inf }
 0xaee   :  { %2767 = vmax.xlane.f32.xlu0 %v2766_v61  ;;  %v2756_v19 = vadd.f32 %v2748_v57, %v2148_v56  ;;  %v2757_v28 = vadd.f32 %v2749_v60, %v2149_v1 }
 0xaef   :  { %v2666_v2 = vpop.f32.mrb[22].mxu0  ;;  %v2740_v4 = vpop.f32.mrb[30].mxu1 }
 0xaf0   :  { %v2750_v22 = vmul.f32 0.35355338, %v2666_v2  ;;  %v4325_v23 = vpop.f32.mrb[23].mxu0  ;;  %v4330_v12 = vpop.f32.mrb[31].mxu1  ;;  %v2751_v16 = vmul.f32 0.35355338, %v2740_v4 }
 0xaf1   :  { %v2772_v15 = vsel %vm402_vm2, %v2756_v19, -inf  ;;  %v2775_v33 = vsel %vm402_vm2, %v2757_v28, -inf }
 0xaf2   :  { %2770 = vmax.xlane.f32.xlu0 %v2769_v5  ;;  %2773 = vmax.xlane.f32.xlu1 %v2772_v15  ;;  %v2758_v29 = vadd.f32 %v2750_v22, %v2150_v21  ;;  %v2759_v34 = vadd.f32 %v2751_v16, %v2151_v31 }
 0xaf4   :  { %v2778_v32 = vsel %vm402_vm2, %v2758_v29, -inf  ;;  %v2781_v35 = vsel %vm402_vm2, %v2759_v34, -inf }
 0xaf6   :  { %2776 = vmax.xlane.f32.xlu0 %v2775_v33  ;;  %2779 = vmax.xlane.f32.xlu1 %v2778_v32 }
 0xafa   :  { %2782 = vmax.xlane.f32.xlu0 %v2781_v35 }
 0xb03   :  { %v2762_v36 = vpop.xlane.xlu0 %2761 }
 0xb04   :  { %v2784_v39 = vsub.f32 %v2752_v37, %v2762_v36 }
 0xb06   :  { %v2792_v38 = vmul.f32 1.442695, %v2784_v39 }
 0xb07   :  { %2848 = vrot.lane.b32.xlu1 %v5739_v8, %s5061_s3 }
 0xb08   :  { %4546 = vpow2.f32 %v2792_v38 }
 0xb0b   :  { %3000 = vrot.lane.b32.xlu1 %v5754_v11, %s5061_s3 }
 0xb0f   :  { %3076 = vrot.lane.b32.xlu1 %v5775_v14, %s5061_s3 }
 0xb10   :  { %2924 = vrot.lane.b32.xlu0 %v5752_v9, %s5061_s3 }
 0xb12   :  { %v5839_v8 = vpop.eup %4546 }
 0xb13   :  { %3228 = vrot.lane.b32.xlu1 %v5777_v7, %s5061_s3  ;;  %v2808_v11 = vsel %vm402_vm2, %v5839_v8, 0.0 }
 0xb14   :  { %3152 = vrot.lane.b32.xlu0 %v5737_v3, %s5061_s3 }
 0xb37   :  { %2809 = vadd.xlane.f32.xlu1 %v2808_v11 }
 0xb77   :  { %v2765_v14 = vpop.xlane.xlu1 %2764 }
 0xb78   :  { %v2785_v40 = vsub.f32 %v2753_v43, %v2765_v14 }
 0xb7a   :  { %v2794_v41 = vmul.f32 1.442695, %v2785_v40 }
 0xb7b   :  { %v2768_v9 = vpop.xlane.xlu0 %2767 }
 0xb7c   :  { %4548 = vpow2.f32 %v2794_v41  ;;  %v2786_v42 = vsub.f32 %v2754_v52, %v2768_v9 }
 0xb7e   :  { %v2796_v7 = vmul.f32 1.442695, %v2786_v42 }
 0xb7f   :  { %v2774_v44 = vpop.xlane.xlu1 %2773  ;;  %v2771_v45 = vpop.xlane.xlu0 %2770 }
 0xb80   :  { %4550 = vpow2.f32 %v2796_v7  ;;  %v2788_v3 = vsub.f32 %v2756_v19, %v2774_v44  ;;  %v2787_v37 = vsub.f32 %v2755_v63, %v2771_v45 }
 0xb82   :  { %v2800_v46 = vmul.f32 1.442695, %v2788_v3  ;;  %v2798_v47 = vmul.f32 1.442695, %v2787_v37 }
 0xb83   :  { %v2780_v48 = vpop.xlane.xlu1 %2779  ;;  %v2777_v49 = vpop.xlane.xlu0 %2776 }
 0xb84   :  { %4552 = vpow2.f32 %v2800_v46  ;;  %v2790_v50 = vsub.f32 %v2758_v29, %v2780_v48  ;;  %v2789_v51 = vsub.f32 %v2757_v28, %v2777_v49 }
 0xb85   :  { %4554 = vpow2.f32 %v2798_v47 }
 0xb86   :  { %v4549_v53 = vpop.eup %4548  ;;  %v2804_v43 = vmul.f32 1.442695, %v2790_v50  ;;  %v2802_v54 = vmul.f32 1.442695, %v2789_v51 }
 0xb87   :  { %v2849_v55 = vpop.permute.xlu1 %2848  ;;  %v2783_v56 = vpop.xlane.xlu0 %2782  ;;  %v2811_v52 = vsel %vm402_vm2, %v4549_v53, 0.0 }
 0xb88   :  { %4556 = vpow2.f32 %v2804_v43  ;;  %v2791_v57 = vsub.f32 %v2759_v34, %v2783_v56  ;;  %2812 = vadd.xlane.f32.xlu0 %v2811_v52  ;;  %4332 = vmatpush3.msra.mxu0 %v2849_v55  ;;  %v3513_v43 = vld [vmem:[#allocation20 + $0x8] sm:$0xff]  ;;  %v3514_v52 = vld [vmem:[#allocation20 + $0x10] sm:$0xff] }
 0xb89   :  { %4558 = vpow2.f32 %v2802_v54  ;;  %4341 = vmatprep.subr.mxu0 %v5056_v10 }
 0xb8a   :  { %v4551_v58 = vpop.eup %4550  ;;  %v2806_v59 = vmul.f32 1.442695, %v2791_v57  ;;  %v3515_v57 = vld [vmem:[#allocation20 + $0x18] sm:$0xff] }
 0xb8b   :  { %v2925_v60 = vpop.permute.xlu0 %2924  ;;  %v2814_v61 = vsel %vm402_vm2, %v4551_v58, 0.0  ;;  %v3001_v5 = vpop.permute.xlu1 %3000 }
 0xb8c   :  { %4560 = vpow2.f32 %v2806_v59  ;;  %2815 = vadd.xlane.f32.xlu1 %v2814_v61  ;;  %4337 = vmatpush3.msra.mxu1 %v2925_v60 }
 0xb8d   :  { %4346 = vmatprep.subr.mxu1 %v5056_v10 }
 0xb8e   :  { %v4553_v63 = vpop.eup %4552 }
 0xb8f   :  { %v4555_v19 = vpop.eup %4554  ;;  %v2820_v1 = vsel %vm402_vm2, %v4553_v63, 0.0  ;;  %v3077_v15 = vpop.permute.xlu1 %3076 }
 0xb90   :  { %2821 = vadd.xlane.f32.xlu1 %v2820_v1  ;;  %v2817_v2 = vsel %vm402_vm2, %v4555_v19, 0.0 }
 0xb91   :  { %2818 = vadd.xlane.f32.xlu0 %v2817_v2 }
 0xb92   :  { %v4557_v4 = vpop.eup %4556 }
 0xb93   :  { %v4559_v21 = vpop.eup %4558  ;;  %v2826_v22 = vsel %vm402_vm2, %v4557_v4, 0.0  ;;  %v3229_v28 = vpop.permute.xlu1 %3228 }
 0xb94   :  { %2827 = vadd.xlane.f32.xlu1 %v2826_v22  ;;  %v2823_v23 = vsel %vm402_vm2, %v4559_v21, 0.0 }
 0xb95   :  { %2824 = vadd.xlane.f32.xlu0 %v2823_v23 }
 0xb96   :  { %v5851_v12 = vpop.eup %4560 }
 0xb97   :  { %v2829_v16 = vsel %vm402_vm2, %v5851_v12, 0.0 }
 0xb99   :  { %2830 = vadd.xlane.f32.xlu0 %v2829_v16 }
 0xba5   :  { %3380 = vrot.lane.b32.xlu1 %v5791_v30, %s5061_s3  ;;  %v3153_v30 = vpop.permute.xlu0 %3152 }
 0xbaf   :  { %3304 = vrot.lane.b32.xlu0 %v5799_v13, %s5061_s3 }
 0xbc4   :  { %v2810_v29 = vpop.xlane.xlu1 %2809 }
 0xbc5   :  { %4562 = vrcp.f32 %v2810_v29 }
 0xbcf   :  { %v4563_v31 = vpop.eup %4562 }
 0xbd0   :  { %v5860_v32 = vmul.f32 %v4563_v31, %v5839_v8 }
 0xbd2   :  { %4334 = vmatmul.mubr.msk.f32.vlgmr.msra.gmra.mrb[24].mxu0 %vm402_vm2, %v5860_v32 }
 0xbd3   :  { %4342 = vmatpush3.msra.mxu0 %v3001_v5  ;;  %4343 = vmatprep.mubr.msk.f32.mxu0 %vm5059_vm1, %v5056_v10 }
 0xbd4   :  { %4351 = vmatprep.subr.mxu0 %v5056_v10 }
 0xc15   :  { %v2813_v13 = vpop.xlane.xlu0 %2812 }
 0xc16   :  { %4564 = vrcp.f32 %v2813_v13 }
 0xc19   :  { %v2816_v33 = vpop.xlane.xlu1 %2815 }
 0xc1a   :  { %4566 = vrcp.f32 %v2816_v33 }
 0xc1d   :  { %v2822_v34 = vpop.xlane.xlu1 %2821 }
 0xc1e   :  { %4568 = vrcp.f32 %v2822_v34  ;;  %v2819_v35 = vpop.xlane.xlu0 %2818 }
 0xc1f   :  { %4570 = vrcp.f32 %v2819_v35 }
 0xc20   :  { %v4565_v36 = vpop.eup %4564 }
 0xc21   :  { %v5867_v39 = vmul.f32 %v4565_v36, %v4549_v53  ;;  %v2828_v38 = vpop.xlane.xlu1 %2827  ;;  %v3512_v53 = vld [vmem:[#allocation20] sm:$0xff] }
 0xc22   :  { %4572 = vrcp.f32 %v2828_v38  ;;  %v2825_v8 = vpop.xlane.xlu0 %2824  ;;  %v4444_v54 = vpack.c.bf16 %v3513_v43, %v3512_v53  ;;  %v4044_v36 = vld [vmem:[#allocation22] ss:$0 sm:$0xff] }
 0xc23   :  { %4574 = vrcp.f32 %v2825_v8  ;;  %4339 = vmatmul.mubr.msk.f32.vlgmr.msra.gmra.mrb[32].mxu1 %vm402_vm2, %v5867_v39 }
 0xc24   :  { %v4567_v11 = vpop.eup %4566  ;;  %4347 = vmatpush3.msra.mxu1 %v3077_v15  ;;  %4348 = vmatprep.mubr.msk.f32.mxu1 %vm5059_vm1, %v5056_v10 }
 0xc25   :  { %v5873_v14 = vmul.f32 %v4567_v11, %v4551_v58  ;;  %4356 = vmatprep.subr.mxu1 %v5056_v10  ;;  %v3381_v47 = vpop.permute.xlu1 %3380 }
 0xc26   :  { %v2831_v40 = vpop.xlane.xlu0 %2830 }
 0xc27   :  { %4576 = vrcp.f32 %v2831_v40  ;;  %4344 = vmatmul.mubr.msk.f32.vlgmr.msra.gmra.mrb[26].mxu0 %vm402_vm2, %v5873_v14 }
 0xc28   :  { %v4569_v41 = vpop.eup %4568  ;;  %4352 = vmatpush3.msra.mxu0 %v3153_v30  ;;  %4353 = vmatprep.mubr.msk.f32.mxu0 %vm5059_vm1, %v5056_v10 }
 0xc29   :  { %v4571_v9 = vpop.eup %4570  ;;  %v5880_v42 = vmul.f32 %v4569_v41, %v4553_v63  ;;  %4361 = vmatprep.subr.mxu0 %v5056_v10 }
 0xc2a   :  { %v5883_v7 = vmul.f32 %v4571_v9, %v4555_v19  ;;  %v3305_v44 = vpop.permute.xlu0 %3304 }
 0xc2b   :  { %4354 = vmatmul.mubr.msk.f32.vlgmr.msra.gmra.mrb[28].mxu0 %vm402_vm2, %v5880_v42 }
 0xc2c   :  { %v4573_v45 = vpop.eup %4572  ;;  %4349 = vmatmul.mubr.msk.f32.vlgmr.msra.gmra.mrb[34].mxu1 %vm402_vm2, %v5883_v7  ;;  %4362 = vmatpush3.msra.mxu0 %v3305_v44 }
 0xc2d   :  { %v4575_v3 = vpop.eup %4574  ;;  %v5889_v37 = vmul.f32 %v4573_v45, %v4557_v4  ;;  %4357 = vmatpush3.msra.mxu1 %v3229_v28  ;;  %4358 = vmatprep.mubr.msk.f32.mxu1 %vm5059_vm1, %v5056_v10 }
 0xc2e   :  { %v5893_v46 = vmul.f32 %v4575_v3, %v4559_v21  ;;  %4363 = vmatprep.mubr.msk.f32.mxu0 %vm5059_vm1, %v5056_v10  ;;  %4366 = vmatprep.subr.mxu1 %v5056_v10 }
 0xc2f   :  { %4364 = vmatmul.mubr.msk.f32.vlgmr.msra.gmra.mrb[30].mxu0 %vm402_vm2, %v5889_v37  ;;  %4445 = vmatprep.subr.bf16.mxu0 %v4444_v54 }
 0xc30   :  { %4359 = vmatmul.mubr.msk.f32.vlgmr.msra.gmra.mrb[36].mxu1 %vm402_vm2, %v5893_v46  ;;  %4447 = vmatpush3.bf16.msra.mxu0 %v4444_v54 }
 0xc31   :  { %v4577_v48 = vpop.eup %4576  ;;  %4367 = vmatpush3.msra.mxu1 %v3381_v47  ;;  %4368 = vmatprep.mubr.msk.f32.mxu1 %vm5059_vm1, %v5056_v10  ;;  %v4448_v10 = vpack.c.bf16 %v3515_v57, %v3514_v52  ;;  %v3666_v52 = vld [vmem:[#allocation26 + $0x10] sm:$0xff] }
 0xc32   :  { %v5905_v49 = vmul.f32 %v4577_v48, %v5851_v12 }
 0xc33   :  { %4449 = vmatprep.subr.bf16.mxu0 %v4448_v10 }
 0xc34   :  { %4369 = vmatmul.mubr.msk.f32.vlgmr.msra.gmra.mrb[38].mxu1 %vm402_vm2, %v5905_v49  ;;  %4451 = vmatpush3.bf16.msra.mxu0 %v4448_v10  ;;  %v3667_v10 = vld [vmem:[#allocation26 + $0x18] sm:$0xff] }
 0xca5   :  { %v2920_v50 = vpop.f32.mrb[24].mxu0 }
 0xca6   :  { %v4335_v51 = vpop.f32.mrb[25].mxu0 }
 0xcf6   :  { %v2996_v55 = vpop.f32.mrb[32].mxu1 }
 0xcf7   :  { %3483 = vrot.lane.b32.xlu0 %v2996_v55, %s6131_s9  ;;  %v4340_v56 = vpop.f32.mrb[33].mxu1 }
 0xcf8   :  { %v3665_v56 = vld [vmem:[#allocation26 + $0x8] sm:$0xff] }
 0xcfa   :  { %v3072_v58 = vpop.f32.mrb[26].mxu0 }
 0xcfb   :  { %3487 = vrot.lane.b32.xlu1 %v3072_v58, %s5063_s2  ;;  %v4345_v59 = vpop.f32.mrb[27].mxu0  ;;  %v4456_v58 = vpack.c.bf16 %v3667_v10, %v3666_v52 }
 0xcfe   :  { %v3224_v60 = vpop.f32.mrb[28].mxu0 }
 0xcff   :  { %v3148_v61 = vpop.f32.mrb[34].mxu1  ;;  %v4355_v63 = vpop.f32.mrb[29].mxu0 }
 0xd00   :  { %3491 = vrot.lane.b32.xlu1 %v3148_v61, %s5064_s10  ;;  %v4350_v19 = vpop.f32.mrb[35].mxu1 }
 0xd02   :  { %v3376_v1 = vpop.f32.mrb[30].mxu0 }
 0xd03   :  { %v3300_v2 = vpop.f32.mrb[36].mxu1  ;;  %v4365_v4 = vpop.f32.mrb[31].mxu0 }
 0xd04   :  { %3498 = vrot.lane.b32.xlu0 %v3300_v2, %s6131_s9  ;;  %v4360_v21 = vpop.f32.mrb[37].mxu1 }
 0xd07   :  { %v3452_v22 = vpop.f32.mrb[38].mxu1 }
 0xd08   :  { %3506 = vrot.lane.b32.xlu1 %v3452_v22, %s5064_s10  ;;  %v4370_v23 = vpop.f32.mrb[39].mxu1  ;;  %3502 = vrot.lane.b32.xlu0 %v3376_v1, %s5063_s2 }
 0xd69   :  { %v3484_v16 = vpop.permute.xlu0 %3483 }
 0xd6a   :  { %v3494_v5 = vsel %vm402_vm2, %v2920_v50, %v3484_v16 }
 0xd6d   :  { %v3488_v12 = vpop.permute.xlu1 %3487 }
 0xd6e   :  { %v3495_v15 = vsel %vm1731_vm3, %v3494_v5, %v3488_v12 }
 0xd72   :  { %v3492_v28 = vpop.permute.xlu1 %3491 }
 0xd73   :  { %v3496_v29 = vsel %vm1733_vm4, %v3495_v15, %v3492_v28 }
 0xd74   :  { %4379 = vmatprep.mubr.msk.f32.mxu0 %vm296_vm0, %v3496_v29 }
 0xd76   :  { %v3499_v31 = vpop.permute.xlu0 %3498 }
 0xd77   :  { %v3509_v30 = vsel %vm402_vm2, %v3224_v60, %v3499_v31  ;;  %v4047_v31 = vld [vmem:[#allocation23] ss:$0 sm:$0xff] }
 0xd7a   :  { %v3507_v13 = vpop.permute.xlu1 %3506  ;;  %v3503_v33 = vpop.permute.xlu0 %3502 }
 0xd7b   :  { %v3510_v34 = vsel %vm1731_vm3, %v3509_v30, %v3503_v33 }
 0xd7c   :  { %v3511_v35 = vsel %vm1733_vm4, %v3510_v34, %v3507_v13  ;;  %v4048_v13 = vld [vmem:[#allocation25] ss:$0 sm:$0xff] }
 0xd7d   :  { %4380 = vmatmul.mubr.msk.f32.vlgmr.msra.gmra.mrb[32].mxu0 %vm296_vm0, %v3511_v35 }
 0xe50   :  { %v4381_v38 = vpop.f32.mrb[32].mxu0 }
 0xe51   :  { %v3601_v8 = vadd.f32 %v4381_v38, %v4044_v36  ;;  %v3595_v11 = vpop.f32.mrb[33].mxu0 }
 0xe52   :  { %v3596_v40 = vadd.f32 %v4044_v36, %v3595_v11  ;;  %v3767_v11 = vld [vmem:[%s6092_s20] sm:$0xff] }
 0xe53   :  { %v3605_v41 = vadd.f32 %v3601_v8, %v5731_v18 }
 0xe54   :  { %v3604_v9 = vadd.f32 %v3596_v40, %v5726_v62  ;;  %v3664_v62 = vld [vmem:[#allocation26] sm:$0xff]  ;;  %v3768_v40 = vld [vmem:[%s6092_s20 + $0x8] sm:$0xff] }
 0xe55   :  { %v3611_v44 = vsel %vm296_vm0, %v3605_v41, 0.0  ;;  %v4452_v57 = vpack.c.bf16 %v3665_v56, %v3664_v62 }
 0xe56   :  { %3612 = vadd.xlane.f32.xlu1 %v3611_v44  ;;  %v3608_v45 = vsel %vm296_vm0, %v3604_v9, 0.0  ;;  %v3770_v44 = vld [vmem:[%s6092_s20 + $0x18] sm:$0xff] }
 0xe57   :  { %3609 = vadd.xlane.f32.xlu0 %v3608_v45  ;;  %4453 = vmatprep.subr.bf16.mxu1 %v4452_v57 }
 0xe58   :  { %4455 = vmatpush3.bf16.msra.mxu1 %v4452_v57 }
 0xe59   :  { %4457 = vmatprep.subr.bf16.mxu1 %v4456_v58 }
 0xe5c   :  { %4459 = vmatpush3.bf16.msra.mxu1 %v4456_v58 }
 0xee3   :  { %v3613_v3 = vpop.xlane.xlu1 %3612 }
 0xee4   :  { %v3615_v47 = vmul.f32 0.03125, %v3613_v3  ;;  %v3610_v48 = vpop.xlane.xlu0 %3609  ;;  %v3771_v3 = vld [vmem:[%s6092_s20 + $0x20] sm:$0xff] }
 0xee5   :  { %v3614_v50 = vmul.f32 0.03125, %v3610_v48 }
 0xee6   :  { %v3617_v51 = vsub.f32 %v3605_v41, %v3615_v47  ;;  %v4460_v41 = vpack.c.bf16 %v3768_v40, %v3767_v11  ;;  %v3772_v47 = vld [vmem:[%s6092_s20 + $0x28] sm:$0xff] }
 0xee7   :  { %v3616_v53 = vsub.f32 %v3604_v9, %v3614_v50  ;;  %v3769_v9 = vld [vmem:[%s6092_s20 + $0x10] sm:$0xff]  ;;  %v4468_v48 = vpack.c.bf16 %v3772_v47, %v3771_v3 }
 0xee8   :  { %v3619_v55 = vmul.f32 %v3617_v51, %v3617_v51  ;;  %4461 = vmatprep.subr.bf16.mxu0 %v4460_v41  ;;  %v4464_v45 = vpack.c.bf16 %v3770_v44, %v3769_v9  ;;  %v3773_v50 = vld [vmem:[%s6092_s20 + $0x30] sm:$0xff] }
 0xee9   :  { %v3618_v43 = vmul.f32 %v3616_v53, %v3616_v53  ;;  %4463 = vmatpush3.bf16.msra.mxu0 %v4460_v41 }
 0xeea   :  { %v3623_v18 = vsel %vm296_vm0, %v3619_v55, 0.0  ;;  %4465 = vmatprep.subr.bf16.mxu0 %v4464_v45 }
 0xeeb   :  { %v3620_v54 = vsel %vm296_vm0, %v3618_v43, 0.0  ;;  %v4049_v43 = vld [vmem:[%s6091_s19] ss:$0 sm:$0xff] }
 0xeec   :  { %3621 = vadd.xlane.f32.xlu0 %v3620_v54 }
 0xeed   :  { %4467 = vmatpush3.bf16.msra.mxu0 %v4464_v45 }
 0xeee   :  { %4469 = vmatprep.subr.bf16.mxu0 %v4468_v48 }
 0xef0   :  { %3624 = vadd.xlane.f32.xlu0 %v3623_v18 }
 0xef1   :  { %4471 = vmatpush3.bf16.msra.mxu0 %v4468_v48 }
 0xf79   :  { %v3622_v59 = vpop.xlane.xlu0 %3621 }
 0xf7a   :  { %v3626_v60 = vmul.f32 0.03125, %v3622_v59 }
 0xf7c   :  { %v3628_v61 = vadd.f32 1e-12, %v3626_v60 }
 0xf7d   :  { %v3625_v63 = vpop.xlane.xlu0 %3624 }
 0xf7e   :  { %4578 = vrsqrt.f32 %v3628_v61  ;;  %v3627_v19 = vmul.f32 0.03125, %v3625_v63  ;;  %vm3632_vm9 = vcmp.eq.f32.partialorder %v3628_v61, inf  ;;  %v3635_v21 = vand.u32 2147483648, %v3628_v61 }
 0xf7f   :  { %vm3634_vm10 = vcmp.eq.f32.partialorder %v3628_v61, 0.0 }
 0xf80   :  { %v3629_v1 = vadd.f32 1e-12, %v3627_v19 }
 0xf82   :  { %4580 = vrsqrt.f32 %v3629_v1  ;;  %vm3639_vm11 = vcmp.eq.f32.partialorder %v3629_v1, inf  ;;  %v3642_v5 = vand.u32 2147483648, %v3629_v1  ;;  %vm3641_vm12 = vcmp.eq.f32.partialorder %v3629_v1, 0.0 }
 0xf88   :  { %v4579_v2 = vpop.eup %4578 }
 0xf89   :  { %v3631_v4 = vmul.f32 %v4579_v2, %v3628_v61 }
 0xf8b   :  { %v3633_v22 = vsel %vm3632_vm9, %v3628_v61, %v3631_v4 }
 0xf8c   :  { %v3636_v23 = vsel %vm3634_vm10, %v3635_v21, %v3633_v22  ;;  %v4581_v12 = vpop.eup %4580 }
 0xf8d   :  { %4582 = vrcp.f32 %v3636_v23  ;;  %v3638_v16 = vmul.f32 %v4581_v12, %v3629_v1 }
 0xf8f   :  { %v3640_v15 = vsel %vm3639_vm11, %v3629_v1, %v3638_v16  ;;  %v4052_v1 = vld [vmem:[%s6093_s21] ss:$0 sm:$0xff]  ;;  %s5065_s21 = smov [#allocation29]  }
 0xf90   :  { %v3643_v28 = vsel %vm3641_vm12, %v3642_v5, %v3640_v15 }
 0xf91   :  { %4584 = vrcp.f32 %v3643_v28 }
 0xf97   :  { %v4583_v29 = vpop.eup %4582 }
 0xf98   :  { %v3645_v30 = vmul.f32 %v4583_v29, %v3616_v53 }
 0xf9a   :  { %v3654_v33 = vmul.f32 %v4047_v31, %v3645_v30 }
 0xf9b   :  { %v4585_v34 = vpop.eup %4584 }
 0xf9c   :  { %v3662_v35 = vadd.f32 %v4048_v13, %v3654_v33  ;;  %v3647_v36 = vmul.f32 %v4585_v34, %v3617_v51  ;;  %v3774_v51 = vld [vmem:[%s6092_s20 + $0x38] sm:$0xff] }
 0xf9d   :  { %v4472_v53 = vpack.c.bf16 %v3774_v51, %v3773_v50 }
 0xf9e   :  { %4390 = vmatprep.mubr.msk.f32.mxu1 %vm296_vm0, %v3662_v35  ;;  %v3655_v38 = vmul.f32 %v4047_v31, %v3647_v36 }
 0xf9f   :  { %4473 = vmatprep.subr.bf16.mxu0 %v4472_v53 }
 0xfa0   :  { %v3663_v8 = vadd.f32 %v4048_v13, %v3655_v38  ;;  %4475 = vmatpush3.bf16.msra.mxu0 %v4472_v53 }
 0xfa2   :  { %4391 = vmatmul.mubr.msk.f32.vlgmr.msra.gmra.mrb[40].mxu1 %vm296_vm0, %v3663_v8 }
0x1075   :  { %v4392_v54 = vpop.f32.mrb[40].mxu1 }
0x1076   :  { %v3753_v55 = vadd.f32 %v4392_v54, %v4049_v43  ;;  %v3747_v18 = vpop.f32.mrb[41].mxu1 }
0x1077   :  { %v3748_v62 = vadd.f32 %v4049_v43, %v3747_v18 }
0x1078   :  { %v3760_v56 = vmul.f32 0.70710677, %v3753_v55  ;;  %v3757_v61 = vmul.f32 0.5, %v3753_v55 }
0x1079   :  { %v3759_v52 = vmul.f32 0.70710677, %v3748_v62  ;;  %v3756_v59 = vmul.f32 0.5, %v3748_v62 }
0x107a   :  { %4586 = verf.f32 %v3760_v56 }
0x107b   :  { %4588 = verf.f32 %v3759_v52 }
0x1084   :  { %v4587_v57 = vpop.eup %4586 }
0x1085   :  { %v4589_v10 = vpop.eup %4588  ;;  %v3764_v58 = vadd.f32 1.0, %v4587_v57 }
0x1086   :  { %v3763_v60 = vadd.f32 1.0, %v4589_v10 }
0x1087   :  { %v3766_v19 = vmul.f32 %v3764_v58, %v3757_v61 }
0x1088   :  { %v3765_v63 = vmul.f32 %v3763_v60, %v3756_v59 }
0x108a   :  { %4409 = vmatprep.mubr.msk.f32.mxu0 %vm3782_vm13, %v3765_v63 }
0x108b   :  { %4410 = vmatmul.mubr.msk.f32.vlgmr.msra.gmra.mrb[34].mxu0 %vm3782_vm13, %v3766_v19 }
0x115e   :  { %v4411_v2 = vpop.f32.mrb[34].mxu0 }
0x115f   :  { %v3861_v4 = vadd.f32 %v4411_v2, %v4052_v1  ;;  %v3855_v21 = vpop.f32.mrb[35].mxu0 }
0x1160   :  { %v3856_v22 = vadd.f32 %v4052_v1, %v3855_v21 }
0x1161   :  { %v3865_v23 = vadd.f32 %v3861_v4, %v3663_v8 }
0x1162   :  { %v3864_v12 = vadd.f32 %v3856_v22, %v3662_v35 }
0x1163   :  { %v3871_v16 = vsel %vm296_vm0, %v3865_v23, 0.0 }
0x1164   :  { %3872 = vadd.xlane.f32.xlu0 %v3871_v16  ;;  %v3868_v5 = vsel %vm296_vm0, %v3864_v12, 0.0 }
0x1165   :  { %3869 = vadd.xlane.f32.xlu1 %v3868_v5 }
0x1176   :  { %1721 = vrot.lane.b32.xlu1 %v5642_v6, %s6131_s9 }
0x117a   :  { %1724 = vrot.lane.b32.xlu1 %v5648_v20, %s5063_s2 }
0x11f1   :  { %v3873_v15 = vpop.xlane.xlu0 %3872 }
0x11f2   :  { %v3875_v28 = vmul.f32 0.03125, %v3873_v15  ;;  %v3870_v29 = vpop.xlane.xlu1 %3869 }
0x11f3   :  { %v3874_v31 = vmul.f32 0.03125, %v3870_v29 }
0x11f4   :  { %v5967_v30 = vsub.f32 %v3865_v23, %v3875_v28 }
0x11f5   :  { %v5969_v13 = vsub.f32 %v3864_v12, %v3874_v31 }
0x11f6   :  { %v3879_v33 = vmul.f32 %v5967_v30, %v5967_v30  ;;  %v1722_v20 = vpop.permute.xlu1 %1721 }
0x11f7   :  { %v3878_v34 = vmul.f32 %v5969_v13, %v5969_v13 }
0x11f8   :  { %v3883_v35 = vsel %vm296_vm0, %v3879_v33, 0.0 }
0x11f9   :  { %3884 = vadd.xlane.f32.xlu0 %v3883_v35  ;;  %v3880_v6 = vsel %vm296_vm0, %v3878_v34, 0.0 }
0x11fa   :  { %3881 = vadd.xlane.f32.xlu1 %v3880_v6 }
0x120b   :  { %1738 = vrot.lane.b32.xlu1 %v5664_v26, %s5063_s2  ;;  %v1725_v26 = vpop.permute.xlu1 %1724 }
0x120f   :  { %1735 = vrot.lane.b32.xlu0 %v5668_v27, %s6131_s9  ;;  %3468 = vrot.lane.b32.xlu1 %v5893_v46, %s6131_s9 }
0x1213   :  { %3456 = vrot.lane.b32.xlu0 %v5867_v39, %s6131_s9  ;;  %1741 = vrot.lane.b32.xlu1 %v5680_v17, %s5064_s10 }
0x1217   :  { %1727 = vrot.lane.b32.xlu0 %v5658_v25, %s5064_s10  ;;  %3471 = vrot.lane.b32.xlu1 %v5889_v37, %s5063_s2 }
0x121b   :  { %3459 = vrot.lane.b32.xlu0 %v5873_v14, %s5063_s2  ;;  %3474 = vrot.lane.b32.xlu1 %v5905_v49, %s5064_s10  ;;  %s3943_s2 = sshll.u32 %s5065_s21, 4  ;;  %s3944_s2 = int_to_ptr.vmem [resolvable:$true] %s3943_s2 }
0x121c   :  { %p4955_p3 = scmp.lt.s32.totalorder %s3944_s2, %s3944_s2 }
0x121f   :  { %3462 = vrot.lane.b32.xlu0 %v5883_v7, %s5064_s10  ;;  %v1730_v7 = vsel %vm402_vm2, %v5635_v0, %v1722_v20  ;;  %s4950_s10 = scalar_lea.vmem %s3944_s2, 256 }
0x1220   :  { %v1732_v11 = vsel %vm1731_vm3, %v1730_v7, %v1725_v26  ;;  %p4951_p2 = scmp.ne.s32.totalorder %s3944_s2, %s4950_s10  ;;  %p4956_p4 = scmp.lt.s32.totalorder %s4950_s10, %s4950_s10 }
0x1222   :  { %p4957_p5 = por %p4956_p4, %p4955_p3 }
0x1224   :  { %p4958_p6 = pnand %p4957_p5, %p4951_p2 }
0x1286   :  { %v3885_v27 = vpop.xlane.xlu0 %3884 }
0x1287   :  { %v3887_v39 = vmul.f32 0.03125, %v3885_v27  ;;  %v3882_v17 = vpop.xlane.xlu1 %3881 }
0x1288   :  { %v3886_v46 = vmul.f32 0.03125, %v3882_v17 }
0x1289   :  { %v3889_v36 = vadd.f32 1e-12, %v3887_v39 }
0x128a   :  { %v3888_v25 = vadd.f32 1e-12, %v3886_v46  ;;  %v1736_v38 = vpop.permute.xlu0 %1735 }
0x128b   :  { %4590 = vrsqrt.f32 %v3889_v36  ;;  %v1739_v37 = vpop.permute.xlu1 %1738  ;;  %v1744_v49 = vsel %vm402_vm2, %v5655_v24, %v1736_v38 }
0x128c   :  { %4592 = vrsqrt.f32 %v3888_v25  ;;  %v1745_v41 = vsel %vm1731_vm3, %v1744_v49, %v1739_v37 }
0x128e   :  { %v3457_v8 = vpop.permute.xlu0 %3456 }
0x128f   :  { %v3469_v14 = vpop.permute.xlu1 %3468 }
0x1292   :  { %v1728_v40 = vpop.permute.xlu0 %1727 }
0x1293   :  { %v1734_v9 = vsel %vm1733_vm4, %v1732_v11, %v1728_v40  ;;  %v1742_v44 = vpop.permute.xlu1 %1741 }
0x1294   :  { %1747 = vst.msk [vmem:[#allocation29] sm:$0xff] %vm296_vm0, %v1734_v9  ;;  %v1746_v45 = vsel %vm1733_vm4, %v1745_v41, %v1742_v44 }
0x1295   :  { %v4591_v3 = vpop.eup %4590  ;;  %1748 = vst.msk [vmem:[#allocation29 + $0x8] sm:$0xff] %vm296_vm0, %v1746_v45 }
0x1296   :  { %v4593_v24 = vpop.eup %4592  ;;  %v3898_v47 = vmul.f32 %v4591_v3, %v3889_v36  ;;  %v3460_v48 = vpop.permute.xlu0 %3459 }
0x1297   :  { %4961 = shalt.err (!%p4958_p6)
}
0x1298   :  { %s4962_s8 = scalar_lea.hbm %s6097_s25, 256 }
0x1299   :  { %p4963_p7 = scmp.ne.s32.totalorder %s6097_s25, %s4962_s8  ;;  %p4966_p8 = scmp.lt.u32.totalorder %s4962_s8, %s6097_s25 }
0x129b   :  { %p4968_p9 = pnand %p4966_p8, %p4963_p7 }
0x129d   :  { %4971 = shalt.err (!%p4968_p9)
}
0x129e   :  { %3949 = dma.vmem_to_hbm [thread:$0]  %s3944_s2, 256, %s6097_s25, [#allocation30], %s6132_s28, %s6132_s28, %s6131_s9   ;;  %vm3899_vm14 = vcmp.eq.f32.partialorder %v3889_v36, inf  ;;  %v3902_v0 = vand.u32 2147483648, %v3889_v36  ;;  %v3891_v50 = vmul.f32 %v4593_v24, %v3888_v25  ;;  %v3472_v51 = vpop.permute.xlu1 %3471  ;;  %vm3901_vm15 = vcmp.eq.f32.partialorder %v3889_v36, 0.0  ;;  %v3463_v57 = vpop.permute.xlu0 %3462 }
0x129f   :  { %v3900_v53 = vsel %vm3899_vm14, %v3889_v36, %v3898_v47  ;;  %vm3892_vm1 = vcmp.eq.f32.partialorder %v3888_v25, inf  ;;  %v3895_v43 = vand.u32 2147483648, %v3888_v25  ;;  %s5066_s24 = smov [#allocation31]   ;;  %vm3894_vm5 = vcmp.eq.f32.partialorder %v3888_v25, 0.0 }
0x12a0   :  { %s3955_s30 = sshll.u32 %s5066_s24, 4  ;;  %v3903_v54 = vsel %vm3901_vm15, %v3902_v0, %v3900_v53  ;;  %v3893_v55 = vsel %vm3892_vm1, %v3888_v25, %v3891_v50  ;;  %v3465_v18 = vsel %vm402_vm2, %v5860_v32, %v3457_v8  ;;  %v3477_v56 = vsel %vm402_vm2, %v5880_v42, %v3469_v14  ;;  %s3956_s30 = int_to_ptr.vmem [resolvable:$true] %s3955_s30 }
0x12a1   :  { %4594 = vrcp.f32 %v3903_v54  ;;  %v3896_v62 = vsel %vm3894_vm5, %v3895_v43, %v3893_v55  ;;  %v3466_v52 = vsel %vm1731_vm3, %v3465_v18, %v3460_v48  ;;  %v3478_v10 = vsel %vm1731_vm3, %v3477_v56, %v3472_v51  ;;  %s4972_s25 = scalar_lea.vmem %s3956_s30, 256  ;;  %p4977_p11 = scmp.lt.s32.totalorder %s3956_s30, %s3956_s30 }
0x12a2   :  { %4596 = vrcp.f32 %v3896_v62  ;;  %v3467_v58 = vsel %vm1733_vm4, %v3466_v52, %v3463_v57  ;;  %v3475_v59 = vpop.permute.xlu1 %3474  ;;  %p4973_p10 = scmp.ne.s32.totalorder %s3956_s30, %s4972_s25  ;;  %p4978_p12 = scmp.lt.s32.totalorder %s4972_s25, %s4972_s25 }
0x12a3   :  { %3480 = vst.msk [vmem:[#allocation31] sm:$0xff] %vm296_vm0, %v3467_v58  ;;  %v3479_v60 = vsel %vm1733_vm4, %v3478_v10, %v3475_v59 }
0x12a4   :  { %3481 = vst.msk [vmem:[#allocation31 + $0x8] sm:$0xff] %vm296_vm0, %v3479_v60  ;;  %p4979_p13 = por %p4978_p12, %p4977_p11 }
0x12a6   :  { %p4980_p0 = pnand %p4979_p13, %p4973_p10 }
0x12a8   :  { %4983 = shalt.err (!%p4980_p0)
}
0x12a9   :  { %s4984_s13 = scalar_lea.hbm %s6098_s26, 256 }
0x12aa   :  { %p4985_p1 = scmp.ne.s32.totalorder %s6098_s26, %s4984_s13  ;;  %p4988_p2 = scmp.lt.u32.totalorder %s4984_s13, %s6098_s26 }
0x12ac   :  { %p4990_p3 = pnand %p4988_p2, %p4985_p1 }
0x12ae   :  { %4993 = shalt.err (!%p4990_p3)
}
0x12af   :  { %3961 = dma.vmem_to_hbm [thread:$0]  %s3956_s30, 256, %s6098_s26, [#allocation30], %s6132_s28, %s6132_s28, %s6131_s9   ;;  %v4595_v32 = vpop.eup %4594 }
0x12b0   :  { %v4055_v42 = vld [vmem:[%s6094_s22] ss:$0 sm:$0xff]  ;;  %v4597_v61 = vpop.eup %4596  ;;  %v3907_v63 = vmul.f32 %v4595_v32, %v5967_v30  ;;  %s5067_s10 = smov [#allocation28]  }
0x12b1   :  { %v4056_v19 = vld [vmem:[%s6095_s23] ss:$0 sm:$0xff]  ;;  %v3905_v1 = vmul.f32 %v4597_v61, %v5969_v13  ;;  %s3931_s18 = sshll.u32 %s5067_s10, 4  ;;  %s3932_s18 = int_to_ptr.vmem [resolvable:$true] %s3931_s18 }
0x12b2   :  { %v3915_v2 = vmul.f32 %v4055_v42, %v3907_v63  ;;  %s4994_s22 = scalar_lea.vmem %s3932_s18, 256  ;;  %p4999_p5 = scmp.lt.s32.totalorder %s3932_s18, %s3932_s18 }
0x12b3   :  { %v3914_v4 = vmul.f32 %v4055_v42, %v3905_v1  ;;  %p4995_p4 = scmp.ne.s32.totalorder %s3932_s18, %s4994_s22  ;;  %p5000_p6 = scmp.lt.s32.totalorder %s4994_s22, %s4994_s22 }
0x12b4   :  { %v3923_v21 = vadd.f32 %v4056_v19, %v3915_v2 }
0x12b5   :  { %v3922_v22 = vadd.f32 %v4056_v19, %v3914_v4  ;;  %p5001_p7 = por %p5000_p6, %p4999_p5 }
0x12b6   :  { %3925 = vst.msk [vmem:[#allocation28 + $0x8] sm:$0xff] %vm296_vm0, %v3923_v21 }
0x12b7   :  { %3924 = vst.msk [vmem:[#allocation28] sm:$0xff] %vm296_vm0, %v3922_v22  ;;  %p5002_p8 = pnand %p5001_p7, %p4995_p4 }
0x12b9   :  { %5005 = shalt.err (!%p5002_p8)
}
0x12ba   :  { %s6140_s11 = sld [smem:[#allocation54_spill]] }
0x12c0   :  { %s5006_s8 = scalar_lea.hbm %s6140_s11, 256 }
0x12c1   :  { %p5007_p9 = scmp.ne.s32.totalorder %s6140_s11, %s5006_s8  ;;  %p5010_p10 = scmp.lt.u32.totalorder %s5006_s8, %s6140_s11 }
0x12c3   :  { %p5012_p11 = pnand %p5010_p10, %p5007_p9 }
0x12c5   :  { %5015 = shalt.err (!%p5012_p11)
}
0x12c6   :  { %3937 = dma.vmem_to_hbm [thread:$0]  %s3932_s18, 256, %s6140_s11, [#allocation4], %s6132_s28, %s6132_s28, %s6131_s9  }
0x12c7   :  { %5034 = dma.done.wait [#allocation4], 256  }
0x12c8   :  { %5035 = vsyncadd [#allocation4], 4294967040 }
0x12c9   :  { %5036 = dma.done.wait [#allocation30], 512  }
0x12ca   :  { %5037 = vsyncadd [#allocation30], 4294966784 }
0x12cb   :  { %3971 = vsyncpa [#allocation3], 1 }
0x12cc   :  { %3972 = vsyncpa [#allocation6], 1 }
0x12cd   :  { %3973 = vsyncpa [#allocation9], 1 }
0x12ce   :  { %3974 = vsyncpa [#allocation12], 1 }
0x12cf   :  { %3975 = vsyncpa [#allocation15], 1 }
0x12d0   :  { %3976 = vsyncpa [#allocation18], 1 }
0x12d1   :  { %3977 = vsyncpa [#allocation21], 1 }
0x12d2   :  { %3978 = vsyncpa [#allocation24], 1 }
0x12d3   :  { %3979 = vsyncpa [#allocation27], 1 }
0x12d4   :  { %3980 = vsyncpa [#allocation4], 1 }
0x12d5   :  { %3981 = vsyncpa [#allocation30], 1 }

</bundles_post_ra>
